<compile_context>
chip_gen: v7x
topology: tpu7x:2x2x1
jax: 0.10.0
libtpu: 0.0.40
codegen_flags: <defaults>
</compile_context>

<pallas_src>
import functools

import jax
import jax.numpy as jnp
from jax.experimental import pallas as pl
from jax.experimental.pallas import tpu as pltpu

INPUT_SIZE = 784
FC1_DIMS = 1024
FC2_DIMS = 512
OUTPUT_SIZE = 10

K_PAD = 896      # 784 rounded up to a multiple of 128 (fc1 contraction dim)
OUT_PAD = 128    # 10 rounded up to a full lane width (fc3 output dim)
NEG_BIG = -1e30  # bias for padded logit columns: exp() underflows to 0 exactly


def _round_up(x, m):
    return (x + m - 1) // m * m


def mlp_kernel(x_ref, w1_ref, b1_ref, w2_ref, b2_ref, w3_ref, b3_ref, o_ref):
    # fc1 + ReLU (bf16 operands, f32 accumulation on the MXU)
    h1 = jnp.dot(x_ref[...], w1_ref[...], preferred_element_type=jnp.float32)
    h1 = jnp.maximum(h1 + b1_ref[...], 0.0)
    # fc2 + ReLU
    h2 = jnp.dot(h1.astype(jnp.bfloat16), w2_ref[...],
                 preferred_element_type=jnp.float32)
    h2 = jnp.maximum(h2 + b2_ref[...], 0.0)
    # fc3 (128 output lanes; pad columns carry a -1e30 bias)
    logits = jnp.dot(h2.astype(jnp.bfloat16), w3_ref[...],
                     preferred_element_type=jnp.float32)
    logits = logits + b3_ref[...]
    # log_softmax over dim=1 (numerically stable; pad columns contribute 0)
    m = jnp.max(logits, axis=-1, keepdims=True)
    shifted = logits - m
    lse = jnp.log(jnp.sum(jnp.exp(shifted), axis=-1, keepdims=True))
    o_ref[...] = shifted - lse


def prepare_params(w1, b1, w2, b2, w3, b3):
    """Pad + cast parameters once; reuse across calls.

    Weights are stored (in, out) vs PyTorch's (out, in), so the kernel computes
    y = x @ W + b (same math as nn.Linear).
    """
    w1p = jnp.zeros((K_PAD, FC1_DIMS), jnp.bfloat16).at[:INPUT_SIZE].set(
        w1.astype(jnp.bfloat16))
    w2p = w2.astype(jnp.bfloat16)
    w3p = jnp.zeros((FC2_DIMS, OUT_PAD), jnp.bfloat16).at[:, :OUTPUT_SIZE].set(
        w3.astype(jnp.bfloat16))
    b1p = b1.reshape(1, FC1_DIMS).astype(jnp.float32)
    b2p = b2.reshape(1, FC2_DIMS).astype(jnp.float32)
    b3p = jnp.full((1, OUT_PAD), NEG_BIG, jnp.float32).at[0, :OUTPUT_SIZE].set(
        b3.reshape(-1).astype(jnp.float32))
    return (w1p, b1p, w2p, b2p, w3p, b3p)


@functools.partial(jax.jit, static_argnames=("tm",))
def network_forward(x, params, *, tm=256):
    """x: (B, 784) float32 -> (B, 10) float32 log-probabilities."""
    w1p, b1p, w2p, b2p, w3p, b3p = params
    B = x.shape[0]
    # Batch tile: multiple of 8 sublanes, capped at `tm` (256 fills the MXU M
    # dim on v6e/v7x; pass tm=128 on v5e if desired).
    TM = min(tm, _round_up(B, 8))
    Bp = _round_up(B, TM)
    # Pad batch rows + the 784-wide contraction dim; cast activations to bf16.
    xp = jnp.zeros((Bp, K_PAD), jnp.bfloat16).at[:B, :INPUT_SIZE].set(
        x.astype(jnp.bfloat16))

    grid = (Bp // TM,)
    const = lambda shape: pl.BlockSpec(shape, lambda i: (0,) * len(shape))

    out = pl.pallas_call(
        mlp_kernel,
        out_shape=jax.ShapeDtypeStruct((Bp, OUT_PAD), jnp.float32),
        grid=grid,
        in_specs=[
            pl.BlockSpec((TM, K_PAD), lambda i: (i, 0)),   # x: streamed per tile
            const(w1p.shape), const(b1p.shape),            # weights/biases use a
            const(w2p.shape), const(b2p.shape),            # constant block index
            const(w3p.shape), const(b3p.shape),            # -> stay VMEM-resident
        ],
        out_specs=pl.BlockSpec((TM, OUT_PAD), lambda i: (i, 0)),
        compiler_params=pltpu.CompilerParams(
            dimension_semantics=("parallel",),
            vmem_limit_bytes=32 << 20,
        ),
    )(xp, w1p, b1p, w2p, b2p, w3p, b3p)
    return out[:B, :OUTPUT_SIZE]


def init_linear(key, fan_in, fan_out):
    # Deterministic init mimicking torch.nn.Linear: U(-1/sqrt(fan_in), +1/sqrt(fan_in)).
    kw, kb = jax.random.split(key)
    bound = 1.0 / jnp.sqrt(jnp.float32(fan_in))
    w = jax.random.uniform(kw, (fan_in, fan_out), jnp.float32, -bound, bound)
    b = jax.random.uniform(kb, (1, fan_out), jnp.float32, -bound, bound)
    return w, b


def reference_bf16(x, w1, b1, w2, b2, w3, b3):
    # Pure-JAX reference with the same bf16-operand / f32-accumulate math.
    h1 = jnp.maximum(
        jnp.dot(x.astype(jnp.bfloat16), w1.astype(jnp.bfloat16),
                preferred_element_type=jnp.float32) + b1, 0.0)
    h2 = jnp.maximum(
        jnp.dot(h1.astype(jnp.bfloat16), w2.astype(jnp.bfloat16),
                preferred_element_type=jnp.float32) + b2, 0.0)
    logits = jnp.dot(h2.astype(jnp.bfloat16), w3.astype(jnp.bfloat16),
                     preferred_element_type=jnp.float32) + b3
    return jax.nn.log_softmax(logits, axis=1)


def reference_f32(x, w1, b1, w2, b2, w3, b3):
    # Original full-f32 semantics of the PyTorch forward.
    h1 = jnp.maximum(x @ w1 + b1, 0.0)
    h2 = jnp.maximum(h1 @ w2 + b2, 0.0)
    return jax.nn.log_softmax(h2 @ w3 + b3, axis=1)


if __name__ == "__main__":
    key = jax.random.PRNGKey(0)
    k_x, k1, k2, k3 = jax.random.split(key, 4)

    w1, b1 = init_linear(k1, INPUT_SIZE, FC1_DIMS)
    w2, b2 = init_linear(k2, FC1_DIMS, FC2_DIMS)
    w3, b3 = init_linear(k3, FC2_DIMS, OUTPUT_SIZE)
    params = prepare_params(w1, b1, w2, b2, w3, b3)

    # Small single-tile batch.
    B = 8
    x = jax.random.normal(k_x, (B, INPUT_SIZE), jnp.float32)
    out = jax.block_until_ready(network_forward(x, params))
    assert out.shape == (B, OUTPUT_SIZE)
    ref = reference_bf16(x, w1, b1, w2, b2, w3, b3)
    assert jnp.allclose(out, ref, atol=2e-3, rtol=2e-3)
    # Loose sanity check vs the original f32 model (bf16 weights shift results slightly).
    ref32 = reference_f32(x, w1, b1, w2, b2, w3, b3)
    assert jnp.max(jnp.abs(out - ref32)) < 0.1

    # Multi-tile grid path (5 batch tiles of 8 rows, exercises pipelining +
    # VMEM-resident weights across grid steps).
    B2 = 40
    x2 = jax.random.normal(k_x, (B2, INPUT_SIZE), jnp.float32)
    out2 = jax.block_until_ready(network_forward(x2, params, tm=8))
    assert out2.shape == (B2, OUTPUT_SIZE)
    ref2 = reference_bf16(x2, w1, b1, w2, b2, w3, b3)
    assert jnp.allclose(out2, ref2, atol=2e-3, rtol=2e-3)

    print("KERNEL_OK")
</pallas_src>

<mosaic_0001>
module attributes {stable_mosaic.version = 11 : i64} {
  func.func @mlp_kernel(%arg0: i32, %arg1: memref<8x896xbf16, #tpu.memory_space<vmem>>, %arg2: memref<896x1024xbf16, #tpu.memory_space<vmem>>, %arg3: memref<1x1024xf32, #tpu.memory_space<vmem>>, %arg4: memref<1024x512xbf16, #tpu.memory_space<vmem>>, %arg5: memref<1x512xf32, #tpu.memory_space<vmem>>, %arg6: memref<512x128xbf16, #tpu.memory_space<vmem>>, %arg7: memref<1x128xf32, #tpu.memory_space<vmem>>, %arg8: memref<8x128xf32, #tpu.memory_space<vmem>>) attributes {dimension_semantics = [#tpu.dimension_semantics<parallel>], iteration_bounds = array<i64: 1>, scalar_prefetch = 0 : i64, scratch_operands = 0 : i64, tpu.core_type = #tpu.core_type<tc>, window_params = [{transform_indices = @transform_0, window_bounds = array<i64: 8, 896>}, {pipeline_mode = #tpu.pipeline_mode<synchronous>, transform_indices = @transform_1, window_bounds = array<i64: 896, 1024>}, {pipeline_mode = #tpu.pipeline_mode<synchronous>, transform_indices = @transform_2, window_bounds = array<i64: 1, 1024>}, {pipeline_mode = #tpu.pipeline_mode<synchronous>, transform_indices = @transform_3, window_bounds = array<i64: 1024, 512>}, {pipeline_mode = #tpu.pipeline_mode<synchronous>, transform_indices = @transform_4, window_bounds = array<i64: 1, 512>}, {pipeline_mode = #tpu.pipeline_mode<synchronous>, transform_indices = @transform_5, window_bounds = array<i64: 512, 128>}, {pipeline_mode = #tpu.pipeline_mode<synchronous>, transform_indices = @transform_6, window_bounds = array<i64: 1, 128>}, {transform_indices = @transform_7, window_bounds = array<i64: 8, 128>}]} {
    %c0 = arith.constant 0 : index
    %c0_0 = arith.constant 0 : index
    %0 = vector.load %arg1[%c0, %c0_0] : memref<8x896xbf16, #tpu.memory_space<vmem>>, vector<8x896xbf16>
    %c0_1 = arith.constant 0 : index
    %c0_2 = arith.constant 0 : index
    %1 = vector.load %arg2[%c0_1, %c0_2] : memref<896x1024xbf16, #tpu.memory_space<vmem>>, vector<896x1024xbf16>
    %cst = arith.constant dense<0.000000e+00> : vector<8x1024xf32>
    %2 = tpu.matmul %0, %1, %cst {dimension_numbers = #tpu.dot_dimension_numbers<[1], [0], [0], [1], [0, 0, 1, 1], [], []>} : vector<8x896xbf16>, vector<896x1024xbf16>, vector<8x1024xf32> -> vector<8x1024xf32>
    %c0_3 = arith.constant 0 : index
    %c0_4 = arith.constant 0 : index
    %3 = vector.load %arg3[%c0_3, %c0_4] : memref<1x1024xf32, #tpu.memory_space<vmem>>, vector<1x1024xf32>
    %4 = vector.broadcast %3 : vector<1x1024xf32> to vector<8x1024xf32>
    %5 = arith.addf %2, %4 : vector<8x1024xf32>
    %cst_5 = arith.constant 0.000000e+00 : f32
    %6 = vector.broadcast %cst_5 : f32 to vector<8x1024xf32>
    %7 = arith.maximumf %5, %6 : vector<8x1024xf32>
    %8 = arith.truncf %7 : vector<8x1024xf32> to vector<8x1024xbf16>
    %c0_6 = arith.constant 0 : index
    %c0_7 = arith.constant 0 : index
    %9 = vector.load %arg4[%c0_6, %c0_7] : memref<1024x512xbf16, #tpu.memory_space<vmem>>, vector<1024x512xbf16>
    %cst_8 = arith.constant dense<0.000000e+00> : vector<8x512xf32>
    %10 = tpu.matmul %8, %9, %cst_8 {dimension_numbers = #tpu.dot_dimension_numbers<[1], [0], [0], [1], [0, 0, 1, 1], [], []>} : vector<8x1024xbf16>, vector<1024x512xbf16>, vector<8x512xf32> -> vector<8x512xf32>
    %c0_9 = arith.constant 0 : index
    %c0_10 = arith.constant 0 : index
    %11 = vector.load %arg5[%c0_9, %c0_10] : memref<1x512xf32, #tpu.memory_space<vmem>>, vector<1x512xf32>
    %12 = vector.broadcast %11 : vector<1x512xf32> to vector<8x512xf32>
    %13 = arith.addf %10, %12 : vector<8x512xf32>
    %cst_11 = arith.constant 0.000000e+00 : f32
    %14 = vector.broadcast %cst_11 : f32 to vector<8x512xf32>
    %15 = arith.maximumf %13, %14 : vector<8x512xf32>
    %16 = arith.truncf %15 : vector<8x512xf32> to vector<8x512xbf16>
    %c0_12 = arith.constant 0 : index
    %c0_13 = arith.constant 0 : index
    %17 = vector.load %arg6[%c0_12, %c0_13] : memref<512x128xbf16, #tpu.memory_space<vmem>>, vector<512x128xbf16>
    %cst_14 = arith.constant dense<0.000000e+00> : vector<8x128xf32>
    %18 = tpu.matmul %16, %17, %cst_14 {dimension_numbers = #tpu.dot_dimension_numbers<[1], [0], [0], [1], [0, 0, 1, 1], [], []>} : vector<8x512xbf16>, vector<512x128xbf16>, vector<8x128xf32> -> vector<8x128xf32>
    %c0_15 = arith.constant 0 : index
    %c0_16 = arith.constant 0 : index
    %19 = vector.load %arg7[%c0_15, %c0_16] : memref<1x128xf32, #tpu.memory_space<vmem>>, vector<1x128xf32>
    %20 = vector.broadcast %19 : vector<1x128xf32> to vector<8x128xf32>
    %21 = arith.addf %18, %20 : vector<8x128xf32>
    %cst_17 = arith.constant dense<0xFF800000> : vector<8xf32>
    %22 = vector.multi_reduction <maximumf>, %21, %cst_17 [1] : vector<8x128xf32> to vector<8xf32>
    %23 = vector.shape_cast %22 : vector<8xf32> to vector<8x1xf32>
    %24 = vector.broadcast %23 : vector<8x1xf32> to vector<8x128xf32>
    %25 = arith.subf %21, %24 : vector<8x128xf32>
    %26 = math.exp %25 : vector<8x128xf32>
    %cst_18 = arith.constant dense<0.000000e+00> : vector<8xf32>
    %27 = vector.multi_reduction <add>, %26, %cst_18 [1] : vector<8x128xf32> to vector<8xf32>
    %28 = vector.shape_cast %27 : vector<8xf32> to vector<8x1xf32>
    %29 = math.log %28 : vector<8x1xf32>
    %30 = vector.broadcast %29 : vector<8x1xf32> to vector<8x128xf32>
    %31 = arith.subf %25, %30 : vector<8x128xf32>
    %c0_19 = arith.constant 0 : index
    %c0_20 = arith.constant 0 : index
    %32 = vector.load %arg8[%c0_19, %c0_20] : memref<8x128xf32, #tpu.memory_space<vmem>>, vector<8x128xf32>
    tpu.vector_store %arg8[%c0_19, %c0_20], %31 {strides = array<i32>} : memref<8x128xf32, #tpu.memory_space<vmem>>, vector<8x128xf32>,
    return
  }
  func.func @transform_0(%arg0: i32) -> (i32, i32) {
    %c0_i32 = arith.constant 0 : i32
    %c0_i32_0 = arith.constant 0 : i32
    return %arg0, %c0_i32 : i32, i32
  }
  func.func @transform_1(%arg0: i32) -> (i32, i32) {
    %c0_i32 = arith.constant 0 : i32
    %c0_i32_0 = arith.constant 0 : i32
    %c0_i32_1 = arith.constant 0 : i32
    return %c0_i32, %c0_i32_0 : i32, i32
  }
  func.func @transform_2(%arg0: i32) -> (i32, i32) {
    %c0_i32 = arith.constant 0 : i32
    %c0_i32_0 = arith.constant 0 : i32
    %c0_i32_1 = arith.constant 0 : i32
    return %c0_i32, %c0_i32_0 : i32, i32
  }
  func.func @transform_3(%arg0: i32) -> (i32, i32) {
    %c0_i32 = arith.constant 0 : i32
    %c0_i32_0 = arith.constant 0 : i32
    %c0_i32_1 = arith.constant 0 : i32
    return %c0_i32, %c0_i32_0 : i32, i32
  }
  func.func @transform_4(%arg0: i32) -> (i32, i32) {
    %c0_i32 = arith.constant 0 : i32
    %c0_i32_0 = arith.constant 0 : i32
    %c0_i32_1 = arith.constant 0 : i32
    return %c0_i32, %c0_i32_0 : i32, i32
  }
  func.func @transform_5(%arg0: i32) -> (i32, i32) {
    %c0_i32 = arith.constant 0 : i32
    %c0_i32_0 = arith.constant 0 : i32
    %c0_i32_1 = arith.constant 0 : i32
    return %c0_i32, %c0_i32_0 : i32, i32
  }
  func.func @transform_6(%arg0: i32) -> (i32, i32) {
    %c0_i32 = arith.constant 0 : i32
    %c0_i32_0 = arith.constant 0 : i32
    %c0_i32_1 = arith.constant 0 : i32
    return %c0_i32, %c0_i32_0 : i32, i32
  }
  func.func @transform_7(%arg0: i32) -> (i32, i32) {
    %c0_i32 = arith.constant 0 : i32
    %c0_i32_0 = arith.constant 0 : i32
    return %arg0, %c0_i32 : i32, i32
  }
}

</mosaic_0001>

<bundles_post_ra>
// kernel: network_forward.1
= control target key start
LH: loop header
LB: loop body
LE: loop exit
PB: predicated region body
PF: predicated region fallthrough
CT: control target
= control target key end

     0   :  { %12 = vsyncpa [#allocation3], 0  ;;  %s7538_s0 = inlined_call_operand.vmem [shape: bf16[8,896], index: 0, kind: input, shape index: {}]   ;;  %s7539_s1 = inlined_call_operand.hbm [shape: bf16[896,1024], index: 1, kind: input, shape index: {}]   ;;  %s7540_s2 = inlined_call_operand.hbm [shape: f32[1,1024], index: 2, kind: input, shape index: {}]   ;;  %s7541_s3 = inlined_call_operand.hbm [shape: bf16[1024,512], index: 3, kind: input, shape index: {}]   ;;  %s7542_s4 = inlined_call_operand.hbm [shape: f32[1,512], index: 4, kind: input, shape index: {}]   ;;  %s7543_s5 = inlined_call_operand.hbm [shape: bf16[512,128], index: 5, kind: input, shape index: {}]   ;;  %s7544_s6 = inlined_call_operand.hbm [shape: f32[1,128], index: 6, kind: input, shape index: {}]   ;;  %s7545_s7 = inlined_call_operand.hbm [shape: f32[8,128], index: 7, kind: output, shape index: {}]  }
   0x1   :  { %13 = vsyncpa [#allocation6], 0 }
   0x2   :  { %14 = vsyncpa [#allocation9], 0 }
   0x3   :  { %15 = vsyncpa [#allocation12], 0 }
   0x4   :  { %16 = vsyncpa [#allocation4], 0  ;;  %s7280_s24 = smov [#allocation5]   ;;  %s7281_s26 = smov [#allocation8]  }
   0x5   :  { %s37_s25 = sshll.u32 %s7280_s24, 4  ;;  %s59_s27 = sshll.u32 %s7281_s26, 4  ;;  %s38_s25 = int_to_ptr.vmem [resolvable:$true] %s37_s25  ;;  %s60_s27 = int_to_ptr.vmem [resolvable:$true] %s59_s27 }
   0x6   :  { %s7116_s30 = scalar_lea.hbm %s7540_s2, 128 }
   0x7   :  { %p7117_p0 = scmp.ne.s32.totalorder %s7540_s2, %s7116_s30  ;;  %p7120_p1 = scmp.lt.u32.totalorder %s7116_s30, %s7540_s2 }
   0x9   :  { %p7122_p2 = pnand %p7120_p1, %p7117_p0 }
   0xb   :  { %7125 = shalt.err (!%p7122_p2)
}
   0xc   :  { %s7126_s12 = scalar_lea.vmem %s38_s25, 128  ;;  %p7131_p4 = scmp.lt.s32.totalorder %s38_s25, %s38_s25 }
   0xd   :  { %p7127_p3 = scmp.ne.s32.totalorder %s38_s25, %s7126_s12  ;;  %p7132_p5 = scmp.lt.s32.totalorder %s7126_s12, %s7126_s12 }
   0xf   :  { %p7133_p6 = por %p7132_p5, %p7131_p4 }
  0x11   :  { %p7134_p7 = pnand %p7133_p6, %p7127_p3 }
  0x13   :  { %7137 = shalt.err (!%p7134_p7)
}
  0x14   :  { %40 = dma.hbm_to_vmem [thread:$0]  %s7540_s2, 128, %s38_s25, [#allocation6]  }
  0x15   :  { %s7138_s17 = scalar_lea.hbm %s7542_s4, 64 }
  0x16   :  { %p7139_p8 = scmp.ne.s32.totalorder %s7542_s4, %s7138_s17  ;;  %p7142_p9 = scmp.lt.u32.totalorder %s7138_s17, %s7542_s4 }
  0x18   :  { %p7144_p10 = pnand %p7142_p9, %p7139_p8 }
  0x1a   :  { %7147 = shalt.err (!%p7144_p10)
}
  0x1b   :  { %s7148_s22 = scalar_lea.vmem %s60_s27, 64  ;;  %p7153_p12 = scmp.lt.s32.totalorder %s60_s27, %s60_s27 }
  0x1c   :  { %p7149_p11 = scmp.ne.s32.totalorder %s60_s27, %s7148_s22  ;;  %p7154_p13 = scmp.lt.s32.totalorder %s7148_s22, %s7148_s22 }
  0x1e   :  { %p7155_p0 = por %p7154_p13, %p7153_p12 }
  0x20   :  { %p7156_p1 = pnand %p7155_p0, %p7149_p11 }
  0x22   :  { %7159 = shalt.err (!%p7156_p1)
}
  0x23   :  { %62 = dma.hbm_to_vmem [thread:$0]  %s7542_s4, 64, %s60_s27, [#allocation9]  }
  0x24   :  { %s7282_s24 = smov [#allocation2]   ;;  %s7160_s29 = scalar_lea.hbm %s7539_s1, 57344 }
  0x25   :  { %s24_s25 = sshll.u32 %s7282_s24, 4  ;;  %p7161_p2 = scmp.ne.s32.totalorder %s7539_s1, %s7160_s29  ;;  %s25_s25 = int_to_ptr.vmem [resolvable:$true] %s24_s25 }
  0x26   :  { %p7164_p3 = scmp.lt.u32.totalorder %s7160_s29, %s7539_s1 }
  0x28   :  { %p7166_p4 = pnand %p7164_p3, %p7161_p2 }
  0x2a   :  { %7169 = shalt.err (!%p7166_p4)
}
  0x2b   :  { %s7170_s11 = scalar_lea.vmem %s25_s25, 57344  ;;  %p7175_p6 = scmp.lt.s32.totalorder %s25_s25, %s25_s25 }
  0x2c   :  { %p7171_p5 = scmp.ne.s32.totalorder %s25_s25, %s7170_s11  ;;  %p7176_p7 = scmp.lt.s32.totalorder %s7170_s11, %s7170_s11 }
  0x2e   :  { %p7177_p8 = por %p7176_p7, %p7175_p6 }
  0x30   :  { %p7178_p9 = pnand %p7177_p8, %p7171_p5 }
  0x32   :  { %7181 = shalt.err (!%p7178_p9)
}
  0x33   :  { %s7283_s4 = smov 512   ;;  %s7284_s27 = smov 32  }
  0x34   :  { %30 = dma.hbm_to_vmem [thread:$0]  %s7539_s1, 57344, %s25_s25, [#allocation3], %s7283_s4, %s7283_s4, %s7284_s27  }
  0x35   :  { %s7285_s14 = smov [#allocation7]   ;;  %s7182_s18 = scalar_lea.hbm %s7541_s3, 32768 }
  0x36   :  { %s46_s15 = sshll.u32 %s7285_s14, 4  ;;  %p7183_p10 = scmp.ne.s32.totalorder %s7541_s3, %s7182_s18  ;;  %s47_s15 = int_to_ptr.vmem [resolvable:$true] %s46_s15 }
  0x37   :  { %p7186_p11 = scmp.lt.u32.totalorder %s7182_s18, %s7541_s3 }
  0x39   :  { %p7188_p12 = pnand %p7186_p11, %p7183_p10 }
  0x3b   :  { %7191 = shalt.err (!%p7188_p12)
}
  0x3c   :  { %s7192_s2 = scalar_lea.vmem %s47_s15, 32768  ;;  %p7197_p0 = scmp.lt.s32.totalorder %s47_s15, %s47_s15 }
  0x3d   :  { %p7193_p13 = scmp.ne.s32.totalorder %s47_s15, %s7192_s2  ;;  %p7198_p1 = scmp.lt.s32.totalorder %s7192_s2, %s7192_s2 }
  0x3f   :  { %p7199_p2 = por %p7198_p1, %p7197_p0 }
  0x41   :  { %p7200_p3 = pnand %p7199_p2, %p7193_p13 }
  0x43   :  { %7203 = shalt.err (!%p7200_p3)
}
  0x44   :  { %s7286_s1 = smov 256   ;;  %s7287_s23 = smov 16  }
  0x45   :  { %52 = dma.hbm_to_vmem [thread:$0]  %s7541_s3, 32768, %s47_s15, [#allocation6], %s7286_s1, %s7286_s1, %s7287_s23  }
  0x46   :  { %s7288_s26 = smov [#allocation10]   ;;  %s7204_s8 = scalar_lea.hbm %s7543_s5, 4096 }
  0x47   :  { %s68_s28 = sshll.u32 %s7288_s26, 4  ;;  %p7205_p4 = scmp.ne.s32.totalorder %s7543_s5, %s7204_s8  ;;  %s69_s28 = int_to_ptr.vmem [resolvable:$true] %s68_s28 }
  0x48   :  { %p7208_p5 = scmp.lt.u32.totalorder %s7204_s8, %s7543_s5 }
  0x4a   :  { %p7210_p6 = pnand %p7208_p5, %p7205_p4 }
  0x4c   :  { %7213 = shalt.err (!%p7210_p6)
}
  0x4d   :  { %s7214_s27 = scalar_lea.vmem %s69_s28, 4096  ;;  %p7219_p8 = scmp.lt.s32.totalorder %s69_s28, %s69_s28 }
  0x4e   :  { %p7215_p7 = scmp.ne.s32.totalorder %s69_s28, %s7214_s27  ;;  %p7220_p9 = scmp.lt.s32.totalorder %s7214_s27, %s7214_s27 }
  0x50   :  { %p7221_p10 = por %p7220_p9, %p7219_p8 }
  0x52   :  { %p7222_p11 = pnand %p7221_p10, %p7215_p7 }
  0x54   :  { %7225 = shalt.err (!%p7222_p11)
}
  0x55   :  { %s7289_s3 = smov 64   ;;  %s7290_s12 = smov 4  }
  0x56   :  { %74 = dma.hbm_to_vmem [thread:$0]  %s7543_s5, 4096, %s69_s28, [#allocation9], %s7289_s3, %s7289_s3, %s7290_s12  }
  0x57   :  { %s7291_s15 = smov [#allocation11]   ;;  %s7226_s19 = scalar_lea.hbm %s7544_s6, 16 }
  0x58   :  { %s81_s16 = sshll.u32 %s7291_s15, 4  ;;  %p7227_p12 = scmp.ne.s32.totalorder %s7544_s6, %s7226_s19  ;;  %s82_s16 = int_to_ptr.vmem [resolvable:$true] %s81_s16 }
  0x59   :  { %p7230_p13 = scmp.lt.u32.totalorder %s7226_s19, %s7544_s6 }
  0x5b   :  { %p7232_p0 = pnand %p7230_p13, %p7227_p12 }
  0x5d   :  { %7235 = shalt.err (!%p7232_p0)
}
  0x5e   :  { %s7236_s1 = scalar_lea.vmem %s82_s16, 16  ;;  %s7240_s5 = scalar_lea.vmem %s82_s16, 32 }
  0x5f   :  { %p7237_p1 = scmp.ne.s32.totalorder %s82_s16, %s7236_s1  ;;  %p7241_p2 = scmp.lt.s32.totalorder %s82_s16, %s82_s16 }
  0x60   :  { %p7242_p3 = scmp.lt.s32.totalorder %s7240_s5, %s7236_s1 }
  0x62   :  { %p7243_p4 = por %p7242_p3, %p7241_p2 }
  0x64   :  { %p7244_p5 = pnand %p7243_p4, %p7237_p1 }
  0x66   :  { %7247 = shalt.err (!%p7244_p5)
}
  0x67   :  { %84 = dma.hbm_to_vmem [thread:$0]  %s7544_s6, 16, %s82_s16, [#allocation12]  }
  0x68   :  { %7270 = dma.done.wait [#allocation3], 57344  }
  0x69   :  { %7271 = vsyncadd [#allocation3], 4294909952 }
  0x6a   :  { %7272 = dma.done.wait [#allocation6], 32896  }
  0x6b   :  { %7273 = vsyncadd [#allocation6], 4294934400 }
  0x6c   :  { %7274 = dma.done.wait [#allocation9], 4160  }
  0x6d   :  { %7275 = vsyncadd [#allocation9], 4294963136 }
  0x6e   :  { %7276 = dma.done.wait [#allocation12], 16  }
  0x6f   :  { %7277 = vsyncadd [#allocation12], 4294967280  ;;  %v108_v0 = vld [vmem:[#allocation2] sm:$0xff]  ;;  %v109_v2 = vld [vmem:[#allocation2 + $0x8] sm:$0xff] }
  0x70   :  { %v112_v1 = vld [vmem:[#allocation2 + $0x20] sm:$0xff]  ;;  %v113_v4 = vld [vmem:[#allocation2 + $0x28] sm:$0xff] }
  0x71   :  { %v5809_v3 = vcombine.high %v108_v0, %v112_v1  ;;  %v5808_v5 = vcombine.low %v108_v0, %v112_v1  ;;  %v116_v6 = vld [vmem:[#allocation2 + $0x40] sm:$0xff]  ;;  %v5811_v8 = vcombine.high %v109_v2, %v113_v4  ;;  %v5810_v9 = vcombine.low %v109_v2, %v113_v4  ;;  %v117_v11 = vld [vmem:[#allocation2 + $0x48] sm:$0xff] }
  0x72   :  { %v120_v7 = vld [vmem:[#allocation2 + $0x60] sm:$0xff]  ;;  %v121_v12 = vld [vmem:[#allocation2 + $0x68] sm:$0xff] }
  0x73   :  { %v5817_v10 = vcombine.high %v116_v6, %v120_v7  ;;  %v124_v13 = vld [vmem:[#allocation2 + $0x80] sm:$0xff]  ;;  %2863 = vmatprep.subr.bf16.mxu0 %v5809_v3  ;;  %v5819_v14 = vcombine.high %v117_v11, %v121_v12  ;;  %v125_v16 = vld [vmem:[#allocation2 + $0x88] sm:$0xff]  ;;  %3027 = vmatprep.subr.bf16.mxu1 %v5811_v8  ;;  %v5816_v18 = vcombine.low %v116_v6, %v120_v7 }
  0x74   :  { %v128_v15 = vld [vmem:[#allocation2 + $0xa0] sm:$0xff]  ;;  %v129_v17 = vld [vmem:[#allocation2 + $0xa8] sm:$0xff]  ;;  %2864 = vmatpush1.bf16.msra.mxu0 %v5808_v5  ;;  %3028 = vmatpush1.bf16.msra.mxu1 %v5810_v9  ;;  %v5818_v19 = vcombine.low %v117_v11, %v121_v12 }
  0x75   :  { %2865 = vmatprep.subr.bf16.mxu0 %v5817_v10  ;;  %v5825_v20 = vcombine.high %v124_v13, %v128_v15  ;;  %3029 = vmatprep.subr.bf16.mxu1 %v5819_v14  ;;  %v5827_v21 = vcombine.high %v125_v16, %v129_v17  ;;  %v132_v22 = vld [vmem:[#allocation2 + $0xc0] sm:$0xff]  ;;  %v133_v24 = vld [vmem:[#allocation2 + $0xc8] sm:$0xff]  ;;  %v5824_v26 = vcombine.low %v124_v13, %v128_v15 }
  0x76   :  { %v136_v23 = vld [vmem:[#allocation2 + $0xe0] sm:$0xff]  ;;  %v137_v25 = vld [vmem:[#allocation2 + $0xe8] sm:$0xff]  ;;  %v5826_v27 = vcombine.low %v125_v16, %v129_v17 }
  0x77   :  { %v5833_v28 = vcombine.high %v132_v22, %v136_v23  ;;  %v5835_v29 = vcombine.high %v133_v24, %v137_v25  ;;  %v140_v30 = vld [vmem:[#allocation2 + $0x100] sm:$0xff]  ;;  %v141_v32 = vld [vmem:[#allocation2 + $0x108] sm:$0xff]  ;;  %v5832_v34 = vcombine.low %v132_v22, %v136_v23  ;;  %v5834_v35 = vcombine.low %v133_v24, %v137_v25 }
  0x78   :  { %2866 = vmatpush1.bf16.msra.mxu0 %v5816_v18  ;;  %3030 = vmatpush1.bf16.msra.mxu1 %v5818_v19  ;;  %v144_v31 = vld [vmem:[#allocation2 + $0x120] sm:$0xff]  ;;  %v145_v33 = vld [vmem:[#allocation2 + $0x128] sm:$0xff] }
  0x79   :  { %2867 = vmatprep.subr.bf16.mxu0 %v5825_v20  ;;  %3031 = vmatprep.subr.bf16.mxu1 %v5827_v21  ;;  %v5841_v36 = vcombine.high %v140_v30, %v144_v31  ;;  %v5843_v37 = vcombine.high %v141_v32, %v145_v33  ;;  %v148_v38 = vld [vmem:[#allocation2 + $0x140] sm:$0xff]  ;;  %v149_v40 = vld [vmem:[#allocation2 + $0x148] sm:$0xff]  ;;  %v5840_v42 = vcombine.low %v140_v30, %v144_v31 }
  0x7a   :  { %v152_v39 = vld [vmem:[#allocation2 + $0x160] sm:$0xff]  ;;  %v153_v41 = vld [vmem:[#allocation2 + $0x168] sm:$0xff]  ;;  %v5842_v43 = vcombine.low %v141_v32, %v145_v33 }
  0x7b   :  { %v5849_v44 = vcombine.high %v148_v38, %v152_v39  ;;  %v5851_v45 = vcombine.high %v149_v40, %v153_v41  ;;  %v156_v46 = vld [vmem:[#allocation2 + $0x180] sm:$0xff]  ;;  %v157_v48 = vld [vmem:[#allocation2 + $0x188] sm:$0xff]  ;;  %v5848_v50 = vcombine.low %v148_v38, %v152_v39  ;;  %v5850_v51 = vcombine.low %v149_v40, %v153_v41 }
  0x7c   :  { %2868 = vmatpush1.bf16.msra.mxu0 %v5824_v26  ;;  %3032 = vmatpush1.bf16.msra.mxu1 %v5826_v27  ;;  %v160_v47 = vld [vmem:[#allocation2 + $0x1a0] sm:$0xff]  ;;  %v161_v49 = vld [vmem:[#allocation2 + $0x1a8] sm:$0xff] }
  0x7d   :  { %2869 = vmatprep.subr.bf16.mxu0 %v5833_v28  ;;  %3033 = vmatprep.subr.bf16.mxu1 %v5835_v29  ;;  %v5857_v52 = vcombine.high %v156_v46, %v160_v47  ;;  %v7409_v53 = vld [vmem:[%s7538_s0] sm:$0xff]  ;;  %v5859_v54 = vcombine.high %v157_v48, %v161_v49  ;;  %v165_v58 = vld [vmem:[#allocation2 + $0x1c8] sm:$0xff]  ;;  %v5856_v60 = vcombine.low %v156_v46, %v160_v47 }
  0x7e   :  { %v164_v55 = vld [vmem:[#allocation2 + $0x1c0] sm:$0xff]  ;;  %v7413_v57 = vcombine.high %v7409_v53, %v7409_v53  ;;  %v169_v59 = vld [vmem:[#allocation2 + $0x1e8] sm:$0xff]  ;;  %v5858_v61 = vcombine.low %v157_v48, %v161_v49 }
  0x7f   :  { %v168_v56 = vld [vmem:[#allocation2 + $0x1e0] sm:$0xff]  ;;  %v5867_v63 = vcombine.high %v165_v58, %v169_v59  ;;  %v173_v2 = vld [vmem:[#allocation2 + $0x208] sm:$0xff]  ;;  %v5866_v5 = vcombine.low %v165_v58, %v169_v59 }
  0x80   :  { %2870 = vmatpush1.bf16.msra.mxu0 %v5832_v34  ;;  %3034 = vmatpush1.bf16.msra.mxu1 %v5834_v35  ;;  %v5865_v62 = vcombine.high %v164_v55, %v168_v56  ;;  %v172_v0 = vld [vmem:[#allocation2 + $0x200] sm:$0xff]  ;;  %v177_v3 = vld [vmem:[#allocation2 + $0x228] sm:$0xff]  ;;  %v5864_v4 = vcombine.low %v164_v55, %v168_v56 }
  0x81   :  { %2871 = vmatprep.subr.bf16.mxu0 %v5841_v36  ;;  %3035 = vmatprep.subr.bf16.mxu1 %v5843_v37  ;;  %v176_v1 = vld [vmem:[#allocation2 + $0x220] sm:$0xff]  ;;  %v5875_v7 = vcombine.high %v173_v2, %v177_v3  ;;  %v181_v10 = vld [vmem:[#allocation2 + $0x248] sm:$0xff]  ;;  %v5874_v13 = vcombine.low %v173_v2, %v177_v3 }
  0x82   :  { %2895 = vmatprep.mubr.bf16.mxu0 %v7413_v57  ;;  %3059 = vmatprep.mubr.bf16.mxu1 %v7413_v57  ;;  %v5873_v6 = vcombine.high %v172_v0, %v176_v1  ;;  %v180_v8 = vld [vmem:[#allocation2 + $0x240] sm:$0xff]  ;;  %v185_v11 = vld [vmem:[#allocation2 + $0x268] sm:$0xff]  ;;  %v5872_v12 = vcombine.low %v172_v0, %v176_v1 }
  0x83   :  { %v184_v9 = vld [vmem:[#allocation2 + $0x260] sm:$0xff]  ;;  %v5883_v15 = vcombine.high %v181_v10, %v185_v11  ;;  %v189_v18 = vld [vmem:[#allocation2 + $0x288] sm:$0xff]  ;;  %v5882_v21 = vcombine.low %v181_v10, %v185_v11 }
  0x84   :  { %2872 = vmatpush1.bf16.msra.mxu0 %v5840_v42  ;;  %3036 = vmatpush1.bf16.msra.mxu1 %v5842_v43  ;;  %v5881_v14 = vcombine.high %v180_v8, %v184_v9  ;;  %v188_v16 = vld [vmem:[#allocation2 + $0x280] sm:$0xff]  ;;  %v193_v19 = vld [vmem:[#allocation2 + $0x2a8] sm:$0xff]  ;;  %v5880_v20 = vcombine.low %v180_v8, %v184_v9 }
  0x85   :  { %2873 = vmatprep.subr.bf16.mxu0 %v5849_v44  ;;  %3037 = vmatprep.subr.bf16.mxu1 %v5851_v45  ;;  %v192_v17 = vld [vmem:[#allocation2 + $0x2a0] sm:$0xff]  ;;  %v5891_v23 = vcombine.high %v189_v18, %v193_v19  ;;  %v197_v26 = vld [vmem:[#allocation2 + $0x2c8] sm:$0xff]  ;;  %v5890_v29 = vcombine.low %v189_v18, %v193_v19 }
  0x86   :  { %v5889_v22 = vcombine.high %v188_v16, %v192_v17  ;;  %v196_v24 = vld [vmem:[#allocation2 + $0x2c0] sm:$0xff]  ;;  %v201_v27 = vld [vmem:[#allocation2 + $0x2e8] sm:$0xff]  ;;  %v5888_v28 = vcombine.low %v188_v16, %v192_v17 }
  0x87   :  { %v200_v25 = vld [vmem:[#allocation2 + $0x2e0] sm:$0xff]  ;;  %v5899_v31 = vcombine.high %v197_v26, %v201_v27  ;;  %v205_v34 = vld [vmem:[#allocation2 + $0x308] sm:$0xff]  ;;  %v5898_v37 = vcombine.low %v197_v26, %v201_v27 }
  0x88   :  { %2874 = vmatpush1.bf16.msra.mxu0 %v5848_v50  ;;  %3038 = vmatpush1.bf16.msra.mxu1 %v5850_v51  ;;  %v5897_v30 = vcombine.high %v196_v24, %v200_v25  ;;  %v204_v32 = vld [vmem:[#allocation2 + $0x300] sm:$0xff]  ;;  %v209_v35 = vld [vmem:[#allocation2 + $0x328] sm:$0xff]  ;;  %v5896_v36 = vcombine.low %v196_v24, %v200_v25 }
  0x89   :  { %2875 = vmatprep.subr.bf16.mxu0 %v5857_v52  ;;  %3039 = vmatprep.subr.bf16.mxu1 %v5859_v54  ;;  %v208_v33 = vld [vmem:[#allocation2 + $0x320] sm:$0xff]  ;;  %v5907_v39 = vcombine.high %v205_v34, %v209_v35  ;;  %v213_v42 = vld [vmem:[#allocation2 + $0x348] sm:$0xff]  ;;  %v5906_v45 = vcombine.low %v205_v34, %v209_v35 }
  0x8a   :  { %v5905_v38 = vcombine.high %v204_v32, %v208_v33  ;;  %v212_v40 = vld [vmem:[#allocation2 + $0x340] sm:$0xff]  ;;  %v217_v43 = vld [vmem:[#allocation2 + $0x368] sm:$0xff]  ;;  %v5904_v44 = vcombine.low %v204_v32, %v208_v33 }
  0x8b   :  { %v216_v41 = vld [vmem:[#allocation2 + $0x360] sm:$0xff]  ;;  %v5915_v47 = vcombine.high %v213_v42, %v217_v43  ;;  %v221_v50 = vld [vmem:[#allocation2 + $0x388] sm:$0xff]  ;;  %v5914_v54 = vcombine.low %v213_v42, %v217_v43 }
  0x8c   :  { %2876 = vmatpush1.bf16.msra.mxu0 %v5856_v60  ;;  %3040 = vmatpush1.bf16.msra.mxu1 %v5858_v61  ;;  %v5913_v46 = vcombine.high %v212_v40, %v216_v41  ;;  %v220_v48 = vld [vmem:[#allocation2 + $0x380] sm:$0xff]  ;;  %v225_v51 = vld [vmem:[#allocation2 + $0x3a8] sm:$0xff]  ;;  %v5912_v52 = vcombine.low %v212_v40, %v216_v41 }
  0x8d   :  { %2877 = vmatprep.subr.bf16.mxu0 %v5865_v62  ;;  %3041 = vmatprep.subr.bf16.mxu1 %v5867_v63  ;;  %v224_v49 = vld [vmem:[#allocation2 + $0x3a0] sm:$0xff]  ;;  %v5923_v56 = vcombine.high %v221_v50, %v225_v51  ;;  %v229_v60 = vld [vmem:[#allocation2 + $0x3c8] sm:$0xff]  ;;  %v5922_v63 = vcombine.low %v221_v50, %v225_v51 }
  0x8e   :  { %v5921_v55 = vcombine.high %v220_v48, %v224_v49  ;;  %v228_v58 = vld [vmem:[#allocation2 + $0x3c0] sm:$0xff]  ;;  %v233_v61 = vld [vmem:[#allocation2 + $0x3e8] sm:$0xff]  ;;  %v5920_v62 = vcombine.low %v220_v48, %v224_v49 }
  0x8f   :  { %v232_v59 = vld [vmem:[#allocation2 + $0x3e0] sm:$0xff]  ;;  %v5931_v1 = vcombine.high %v229_v60, %v233_v61 }
  0x90   :  { %2878 = vmatpush1.bf16.msra.mxu0 %v5864_v4  ;;  %3042 = vmatpush1.bf16.msra.mxu1 %v5866_v5  ;;  %v5929_v0 = vcombine.high %v228_v58, %v232_v59  ;;  %v236_v2 = vld [vmem:[#allocation2 + $0x400] sm:$0xff]  ;;  %v237_v4 = vld [vmem:[#allocation2 + $0x408] sm:$0xff] }
  0x91   :  { %2879 = vmatprep.subr.bf16.mxu0 %v5873_v6  ;;  %3043 = vmatprep.subr.bf16.mxu1 %v5875_v7  ;;  %v240_v3 = vld [vmem:[#allocation2 + $0x420] sm:$0xff]  ;;  %v241_v5 = vld [vmem:[#allocation2 + $0x428] sm:$0xff]  ;;  %v5928_v6 = vcombine.low %v228_v58, %v232_v59  ;;  %v5930_v7 = vcombine.low %v229_v60, %v233_v61 }
  0x92   :  { %v5937_v8 = vcombine.high %v236_v2, %v240_v3  ;;  %v5939_v9 = vcombine.high %v237_v4, %v241_v5  ;;  %v244_v10 = vld [vmem:[#allocation2 + $0x440] sm:$0xff]  ;;  %v5936_v16 = vcombine.low %v236_v2, %v240_v3  ;;  %v5938_v17 = vcombine.low %v237_v4, %v241_v5 }
  0x93   :  { %v248_v11 = vld [vmem:[#allocation2 + $0x460] sm:$0xff] }
  0x94   :  { %2880 = vmatpush1.bf16.msra.mxu0 %v5872_v12  ;;  %3044 = vmatpush1.bf16.msra.mxu1 %v5874_v13  ;;  %v7419_v12 = vcombine.low %v7409_v53, %v7409_v53  ;;  %v245_v13 = vld [vmem:[#allocation2 + $0x448] sm:$0xff]  ;;  %v5945_v18 = vcombine.high %v244_v10, %v248_v11  ;;  %v252_v19 = vld [vmem:[#allocation2 + $0x480] sm:$0xff]  ;;  %v5944_v24 = vcombine.low %v244_v10, %v248_v11 }
  0x95   :  { %2881 = vmatprep.subr.bf16.mxu0 %v5881_v14  ;;  %3045 = vmatprep.subr.bf16.mxu1 %v5883_v15  ;;  %v249_v14 = vld [vmem:[#allocation2 + $0x468] sm:$0xff]  ;;  %v260_v27 = vld [vmem:[#allocation2 + $0x4c0] sm:$0xff] }
  0x96   :  { %v7424_v15 = vld [vmem:[%s7538_s0 + $0x8] sm:$0xff]  ;;  %v5946_v25 = vcombine.low %v245_v13, %v249_v14  ;;  %v268_v35 = vld [vmem:[#allocation2 + $0x500] sm:$0xff] }
  0x97   :  { %v257_v53 = vld [vmem:[#allocation2 + $0x4a8] sm:$0xff]  ;;  %v276_v43 = vld [vmem:[#allocation2 + $0x540] sm:$0xff] }
  0x98   :  { %2882 = vmatpush1.bf16.msra.mxu0 %v5880_v20  ;;  %3046 = vmatpush1.bf16.msra.mxu1 %v5882_v21  ;;  %v256_v20 = vld [vmem:[#allocation2 + $0x4a0] sm:$0xff]  ;;  %v5947_v21 = vcombine.high %v245_v13, %v249_v14 }
  0x99   :  { %2883 = vmatprep.subr.bf16.mxu0 %v5889_v22  ;;  %3047 = vmatprep.subr.bf16.mxu1 %v5891_v23  ;;  %v253_v22 = vld [vmem:[#allocation2 + $0x488] sm:$0xff]  ;;  %v7428_v23 = vcombine.high %v7424_v15, %v7424_v15  ;;  %v5953_v26 = vcombine.high %v252_v19, %v256_v20  ;;  %v5952_v32 = vcombine.low %v252_v19, %v256_v20  ;;  %v284_v51 = vld [vmem:[#allocation2 + $0x580] sm:$0xff] }
  0x9a   :  { %v5954_v33 = vcombine.low %v253_v22, %v257_v53  ;;  %v292_v61 = vld [vmem:[#allocation2 + $0x5c0] sm:$0xff]  ;;  %v313_v19 = vld [vmem:[#allocation2 + $0x668] sm:$0xff] }
  0x9b   :  { %v300_v5 = vld [vmem:[#allocation2 + $0x600] sm:$0xff] }
  0x9c   :  { %2884 = vmatpush1.bf16.msra.mxu0 %v5888_v28  ;;  %3048 = vmatpush1.bf16.msra.mxu1 %v5890_v29  ;;  %v264_v28 = vld [vmem:[#allocation2 + $0x4e0] sm:$0xff]  ;;  %v261_v29 = vld [vmem:[#allocation2 + $0x4c8] sm:$0xff] }
  0x9d   :  { %2885 = vmatprep.subr.bf16.mxu0 %v5897_v30  ;;  %3049 = vmatprep.subr.bf16.mxu1 %v5899_v31  ;;  %v5955_v30 = vcombine.high %v253_v22, %v257_v53  ;;  %v265_v31 = vld [vmem:[#allocation2 + $0x4e8] sm:$0xff]  ;;  %v5961_v34 = vcombine.high %v260_v27, %v264_v28  ;;  %v5960_v40 = vcombine.low %v260_v27, %v264_v28  ;;  %v308_v14 = vld [vmem:[#allocation2 + $0x640] sm:$0xff] }
  0x9e   :  { %v5962_v41 = vcombine.low %v261_v29, %v265_v31  ;;  %v316_v53 = vld [vmem:[#allocation2 + $0x680] sm:$0xff]  ;;  %v321_v27 = vld [vmem:[#allocation2 + $0x6a8] sm:$0xff] }
  0xa0   :  { %2886 = vmatpush1.bf16.msra.mxu0 %v5896_v36  ;;  %3050 = vmatpush1.bf16.msra.mxu1 %v5898_v37  ;;  %v272_v36 = vld [vmem:[#allocation2 + $0x520] sm:$0xff]  ;;  %v269_v37 = vld [vmem:[#allocation2 + $0x508] sm:$0xff] }
  0xa1   :  { %2887 = vmatprep.subr.bf16.mxu0 %v5905_v38  ;;  %3051 = vmatprep.subr.bf16.mxu1 %v5907_v39  ;;  %v5963_v38 = vcombine.high %v261_v29, %v265_v31  ;;  %v273_v39 = vld [vmem:[#allocation2 + $0x528] sm:$0xff]  ;;  %v5969_v42 = vcombine.high %v268_v35, %v272_v36  ;;  %v5968_v48 = vcombine.low %v268_v35, %v272_v36  ;;  %v324_v31 = vld [vmem:[#allocation2 + $0x6c0] sm:$0xff] }
  0xa2   :  { %v5970_v49 = vcombine.low %v269_v37, %v273_v39  ;;  %v329_v35 = vld [vmem:[#allocation2 + $0x6e8] sm:$0xff] }
  0xa4   :  { %2888 = vmatpush1.bf16.msra.mxu0 %v5904_v44  ;;  %3052 = vmatpush1.bf16.msra.mxu1 %v5906_v45  ;;  %v280_v44 = vld [vmem:[#allocation2 + $0x560] sm:$0xff]  ;;  %v277_v45 = vld [vmem:[#allocation2 + $0x548] sm:$0xff] }
  0xa5   :  { %2889 = vmatprep.subr.bf16.mxu0 %v5913_v46  ;;  %3053 = vmatprep.subr.bf16.mxu1 %v5915_v47  ;;  %v5971_v46 = vcombine.high %v269_v37, %v273_v39  ;;  %v281_v47 = vld [vmem:[#allocation2 + $0x568] sm:$0xff]  ;;  %v5977_v50 = vcombine.high %v276_v43, %v280_v44  ;;  %v5976_v58 = vcombine.low %v276_v43, %v280_v44  ;;  %v332_v39 = vld [vmem:[#allocation2 + $0x700] sm:$0xff] }
  0xa6   :  { %v5978_v59 = vcombine.low %v277_v45, %v281_v47  ;;  %v337_v43 = vld [vmem:[#allocation2 + $0x728] sm:$0xff] }
  0xa8   :  { %2890 = vmatpush1.bf16.msra.mxu0 %v5912_v52  ;;  %3054 = vmatpush1.bf16.msra.mxu1 %v5914_v54  ;;  %v288_v52 = vld [vmem:[#allocation2 + $0x5a0] sm:$0xff]  ;;  %v285_v54 = vld [vmem:[#allocation2 + $0x588] sm:$0xff] }
  0xa9   :  { %2891 = vmatprep.subr.bf16.mxu0 %v5921_v55  ;;  %3055 = vmatprep.subr.bf16.mxu1 %v5923_v56  ;;  %v5979_v55 = vcombine.high %v277_v45, %v281_v47  ;;  %v289_v56 = vld [vmem:[#allocation2 + $0x5a8] sm:$0xff]  ;;  %v5985_v60 = vcombine.high %v284_v51, %v288_v52  ;;  %v5984_v2 = vcombine.low %v284_v51, %v288_v52  ;;  %v340_v47 = vld [vmem:[#allocation2 + $0x740] sm:$0xff] }
  0xaa   :  { %v5986_v3 = vcombine.low %v285_v54, %v289_v56  ;;  %v345_v51 = vld [vmem:[#allocation2 + $0x768] sm:$0xff] }
  0xac   :  { %2892 = vmatpush1.bf16.msra.mxu0 %v5920_v62  ;;  %3056 = vmatpush1.bf16.msra.mxu1 %v5922_v63  ;;  %v296_v62 = vld [vmem:[#allocation2 + $0x5e0] sm:$0xff]  ;;  %v293_v63 = vld [vmem:[#allocation2 + $0x5c8] sm:$0xff] }
  0xad   :  { %2893 = vmatprep.subr.bf16.mxu0 %v5929_v0  ;;  %3057 = vmatprep.subr.bf16.mxu1 %v5931_v1  ;;  %v5987_v0 = vcombine.high %v285_v54, %v289_v56  ;;  %v297_v1 = vld [vmem:[#allocation2 + $0x5e8] sm:$0xff]  ;;  %v5993_v4 = vcombine.high %v292_v61, %v296_v62  ;;  %v5992_v10 = vcombine.low %v292_v61, %v296_v62  ;;  %v348_v56 = vld [vmem:[#allocation2 + $0x780] sm:$0xff] }
  0xae   :  { %v5994_v11 = vcombine.low %v293_v63, %v297_v1  ;;  %v353_v61 = vld [vmem:[#allocation2 + $0x7a8] sm:$0xff] }
  0xb0   :  { %2894 = vmatpush1.bf16.msra.mxu0 %v5928_v6  ;;  %3058 = vmatpush1.bf16.msra.mxu1 %v5930_v7  ;;  %v304_v6 = vld [vmem:[#allocation2 + $0x620] sm:$0xff]  ;;  %v301_v7 = vld [vmem:[#allocation2 + $0x608] sm:$0xff] }
  0xb1   :  { %2904 = vmatprep.subr.bf16.mxu0 %v5937_v8  ;;  %3068 = vmatprep.subr.bf16.mxu1 %v5939_v9  ;;  %v5995_v8 = vcombine.high %v293_v63, %v297_v1  ;;  %v305_v9 = vld [vmem:[#allocation2 + $0x628] sm:$0xff]  ;;  %v6001_v13 = vcombine.high %v300_v5, %v304_v6  ;;  %v6000_v20 = vcombine.low %v300_v5, %v304_v6  ;;  %v356_v1 = vld [vmem:[#allocation2 + $0x7c0] sm:$0xff] }
  0xb2   :  { %v361_v5 = vld [vmem:[#allocation2 + $0x7e8] sm:$0xff] }
  0xb3   :  { %2896 = vmatmul.mubr.bf16.vlgmr.msra.gmra.mrb[0].mxu0 %v7419_v12  ;;  %3060 = vmatmul.mubr.bf16.vlgmr.msra.gmra.mrb[0].mxu1 %v7419_v12 }
  0xb4   :  { %2905 = vmatpush1.bf16.msra.mxu0 %v5936_v16  ;;  %3069 = vmatpush1.bf16.msra.mxu1 %v5938_v17  ;;  %v312_v16 = vld [vmem:[#allocation2 + $0x660] sm:$0xff]  ;;  %v309_v17 = vld [vmem:[#allocation2 + $0x648] sm:$0xff] }
  0xb5   :  { %2906 = vmatprep.subr.bf16.mxu0 %v5945_v18  ;;  %3070 = vmatprep.subr.bf16.mxu1 %v5947_v21  ;;  %v6003_v18 = vcombine.high %v301_v7, %v305_v9  ;;  %v6002_v21 = vcombine.low %v301_v7, %v305_v9  ;;  %v6009_v22 = vcombine.high %v308_v14, %v312_v16  ;;  %v364_v9 = vld [vmem:[#allocation2 + $0x800] sm:$0xff] }
  0xb6   :  { %2936 = vmatprep.mubr.bf16.mxu0 %v7428_v23  ;;  %3100 = vmatprep.mubr.bf16.mxu1 %v7428_v23  ;;  %v6008_v28 = vcombine.low %v308_v14, %v312_v16  ;;  %v6010_v29 = vcombine.low %v309_v17, %v313_v19  ;;  %v369_v14 = vld [vmem:[#allocation2 + $0x828] sm:$0xff] }
  0xb8   :  { %2907 = vmatpush1.bf16.msra.mxu0 %v5944_v24  ;;  %3071 = vmatpush1.bf16.msra.mxu1 %v5946_v25  ;;  %v320_v24 = vld [vmem:[#allocation2 + $0x6a0] sm:$0xff]  ;;  %v6011_v25 = vcombine.high %v309_v17, %v313_v19 }
  0xb9   :  { %2908 = vmatprep.subr.bf16.mxu0 %v5953_v26  ;;  %3072 = vmatprep.subr.bf16.mxu1 %v5955_v30  ;;  %v317_v26 = vld [vmem:[#allocation2 + $0x688] sm:$0xff]  ;;  %v6017_v30 = vcombine.high %v316_v53, %v320_v24  ;;  %v6016_v36 = vcombine.low %v316_v53, %v320_v24  ;;  %v372_v17 = vld [vmem:[#allocation2 + $0x840] sm:$0xff]  ;;  %v7437_v24 = vld [vmem:[%s7538_s0 + $0x10] sm:$0xff] }
  0xba   :  { %v6018_v37 = vcombine.low %v317_v26, %v321_v27 }
  0xbc   :  { %2909 = vmatpush1.bf16.msra.mxu0 %v5952_v32  ;;  %3073 = vmatpush1.bf16.msra.mxu1 %v5954_v33  ;;  %v328_v32 = vld [vmem:[#allocation2 + $0x6e0] sm:$0xff]  ;;  %v325_v33 = vld [vmem:[#allocation2 + $0x6c8] sm:$0xff] }
  0xbd   :  { %2910 = vmatprep.subr.bf16.mxu0 %v5961_v34  ;;  %3074 = vmatprep.subr.bf16.mxu1 %v5963_v38  ;;  %v6019_v34 = vcombine.high %v317_v26, %v321_v27  ;;  %v6025_v38 = vcombine.high %v324_v31, %v328_v32  ;;  %v6024_v44 = vcombine.low %v324_v31, %v328_v32  ;;  %v381_v31 = vld [vmem:[#allocation2 + $0x888] sm:$0xff] }
  0xbe   :  { %v6026_v45 = vcombine.low %v325_v33, %v329_v35 }
  0xc0   :  { %2911 = vmatpush1.bf16.msra.mxu0 %v5960_v40  ;;  %3075 = vmatpush1.bf16.msra.mxu1 %v5962_v41  ;;  %v336_v40 = vld [vmem:[#allocation2 + $0x720] sm:$0xff]  ;;  %v333_v41 = vld [vmem:[#allocation2 + $0x708] sm:$0xff] }
  0xc1   :  { %2912 = vmatprep.subr.bf16.mxu0 %v5969_v42  ;;  %3076 = vmatprep.subr.bf16.mxu1 %v5971_v46  ;;  %v6027_v42 = vcombine.high %v325_v33, %v329_v35  ;;  %v6033_v46 = vcombine.high %v332_v39, %v336_v40  ;;  %v6032_v52 = vcombine.low %v332_v39, %v336_v40  ;;  %v385_v33 = vld [vmem:[#allocation2 + $0x8a8] sm:$0xff] }
  0xc2   :  { %v6034_v54 = vcombine.low %v333_v41, %v337_v43  ;;  %v389_v39 = vld [vmem:[#allocation2 + $0x8c8] sm:$0xff]  ;;  %v6083_v40 = vcombine.high %v381_v31, %v385_v33 }
  0xc4   :  { %2913 = vmatpush1.bf16.msra.mxu0 %v5968_v48  ;;  %3077 = vmatpush1.bf16.msra.mxu1 %v5970_v49  ;;  %v344_v48 = vld [vmem:[#allocation2 + $0x760] sm:$0xff]  ;;  %v341_v49 = vld [vmem:[#allocation2 + $0x748] sm:$0xff] }
  0xc5   :  { %2914 = vmatprep.subr.bf16.mxu0 %v5977_v50  ;;  %3078 = vmatprep.subr.bf16.mxu1 %v5979_v55  ;;  %v6035_v50 = vcombine.high %v333_v41, %v337_v43  ;;  %v6041_v55 = vcombine.high %v340_v47, %v344_v48  ;;  %v6040_v62 = vcombine.low %v340_v47, %v344_v48  ;;  %v393_v41 = vld [vmem:[#allocation2 + $0x8e8] sm:$0xff] }
  0xc6   :  { %v6042_v63 = vcombine.low %v341_v49, %v345_v51  ;;  %v6082_v43 = vcombine.low %v381_v31, %v385_v33  ;;  %v397_v47 = vld [vmem:[#allocation2 + $0x908] sm:$0xff]  ;;  %v6091_v48 = vcombine.high %v389_v39, %v393_v41 }
  0xc7   :  { %v441_v31 = vld [vmem:[#allocation2 + $0xa68] sm:$0xff] }
  0xc8   :  { %2915 = vmatpush1.bf16.msra.mxu0 %v5976_v58  ;;  %3079 = vmatpush1.bf16.msra.mxu1 %v5978_v59  ;;  %v352_v58 = vld [vmem:[#allocation2 + $0x7a0] sm:$0xff]  ;;  %v349_v59 = vld [vmem:[#allocation2 + $0x788] sm:$0xff] }
  0xc9   :  { %2916 = vmatprep.subr.bf16.mxu0 %v5985_v60  ;;  %3080 = vmatprep.subr.bf16.mxu1 %v5987_v0  ;;  %v6043_v60 = vcombine.high %v341_v49, %v345_v51  ;;  %v6049_v0 = vcombine.high %v348_v56, %v352_v58  ;;  %v6048_v6 = vcombine.low %v348_v56, %v352_v58  ;;  %v401_v49 = vld [vmem:[#allocation2 + $0x928] sm:$0xff] }
  0xca   :  { %v6050_v7 = vcombine.low %v349_v59, %v353_v61  ;;  %v6090_v51 = vcombine.low %v389_v39, %v393_v41  ;;  %v405_v56 = vld [vmem:[#allocation2 + $0x948] sm:$0xff]  ;;  %v6099_v58 = vcombine.high %v397_v47, %v401_v49 }
  0xcb   :  { %v449_v39 = vld [vmem:[#allocation2 + $0xaa8] sm:$0xff] }
  0xcc   :  { %2917 = vmatpush1.bf16.msra.mxu0 %v5984_v2  ;;  %3081 = vmatpush1.bf16.msra.mxu1 %v5986_v3  ;;  %v360_v2 = vld [vmem:[#allocation2 + $0x7e0] sm:$0xff]  ;;  %v357_v3 = vld [vmem:[#allocation2 + $0x7c8] sm:$0xff] }
  0xcd   :  { %2918 = vmatprep.subr.bf16.mxu0 %v5993_v4  ;;  %3082 = vmatprep.subr.bf16.mxu1 %v5995_v8  ;;  %v6051_v4 = vcombine.high %v349_v59, %v353_v61  ;;  %v6057_v8 = vcombine.high %v356_v1, %v360_v2  ;;  %v6056_v16 = vcombine.low %v356_v1, %v360_v2  ;;  %v409_v59 = vld [vmem:[#allocation2 + $0x968] sm:$0xff] }
  0xce   :  { %v6098_v61 = vcombine.low %v397_v47, %v401_v49  ;;  %v413_v1 = vld [vmem:[#allocation2 + $0x988] sm:$0xff]  ;;  %v6107_v2 = vcombine.high %v405_v56, %v409_v59 }
  0xcf   :  { %v457_v47 = vld [vmem:[#allocation2 + $0xae8] sm:$0xff] }
  0xd0   :  { %2919 = vmatpush1.bf16.msra.mxu0 %v5992_v10  ;;  %3083 = vmatpush1.bf16.msra.mxu1 %v5994_v11  ;;  %v368_v10 = vld [vmem:[#allocation2 + $0x820] sm:$0xff]  ;;  %v365_v11 = vld [vmem:[#allocation2 + $0x808] sm:$0xff] }
  0xd1   :  { %2920 = vmatprep.subr.bf16.mxu0 %v6001_v13  ;;  %3084 = vmatprep.subr.bf16.mxu1 %v6003_v18  ;;  %v6059_v13 = vcombine.high %v357_v3, %v361_v5  ;;  %v6058_v18 = vcombine.low %v357_v3, %v361_v5  ;;  %v6065_v19 = vcombine.high %v364_v9, %v368_v10  ;;  %v417_v3 = vld [vmem:[#allocation2 + $0x9a8] sm:$0xff] }
  0xd2   :  { %v6067_v53 = vcombine.high %v365_v11, %v369_v14  ;;  %v6064_v26 = vcombine.low %v364_v9, %v368_v10  ;;  %v6066_v27 = vcombine.low %v365_v11, %v369_v14  ;;  %v6106_v5 = vcombine.low %v405_v56, %v409_v59  ;;  %v421_v9 = vld [vmem:[#allocation2 + $0x9c8] sm:$0xff] }
  0xd3   :  { %v6115_v10 = vcombine.high %v413_v1, %v417_v3  ;;  %v425_v11 = vld [vmem:[#allocation2 + $0x9e8] sm:$0xff]  ;;  %v6114_v14 = vcombine.low %v413_v1, %v417_v3 }
  0xd4   :  { %2921 = vmatpush1.bf16.msra.mxu0 %v6000_v20  ;;  %3085 = vmatpush1.bf16.msra.mxu1 %v6002_v21  ;;  %v376_v20 = vld [vmem:[#allocation2 + $0x860] sm:$0xff]  ;;  %v373_v21 = vld [vmem:[#allocation2 + $0x848] sm:$0xff] }
  0xd5   :  { %2922 = vmatprep.subr.bf16.mxu0 %v6009_v22  ;;  %3086 = vmatprep.subr.bf16.mxu1 %v6011_v25  ;;  %v377_v22 = vld [vmem:[#allocation2 + $0x868] sm:$0xff]  ;;  %v7441_v25 = vcombine.low %v7424_v15, %v7424_v15  ;;  %v6072_v15 = vcombine.low %v372_v17, %v376_v20 }
  0xd6   :  { %v6075_v32 = vcombine.high %v373_v21, %v377_v22  ;;  %v6074_v35 = vcombine.low %v373_v21, %v377_v22  ;;  %v433_v21 = vld [vmem:[#allocation2 + $0xa28] sm:$0xff] }
  0xd7   :  { %v465_v56 = vld [vmem:[#allocation2 + $0xb28] sm:$0xff] }
  0xd8   :  { %2923 = vmatpush1.bf16.msra.mxu0 %v6008_v28  ;;  %3087 = vmatpush1.bf16.msra.mxu1 %v6010_v29  ;;  %v6073_v28 = vcombine.high %v372_v17, %v376_v20  ;;  %v380_v29 = vld [vmem:[#allocation2 + $0x880] sm:$0xff]  ;;  %v6123_v20 = vcombine.high %v421_v9, %v425_v11  ;;  %v473_v1 = vld [vmem:[#allocation2 + $0xb68] sm:$0xff] }
  0xd9   :  { %2924 = vmatprep.subr.bf16.mxu0 %v6017_v30  ;;  %3088 = vmatprep.subr.bf16.mxu1 %v6019_v34  ;;  %v384_v30 = vld [vmem:[#allocation2 + $0x8a0] sm:$0xff]  ;;  %v7445_v34 = vcombine.high %v7437_v24, %v7437_v24 }
  0xda   :  { %v428_v17 = vld [vmem:[#allocation2 + $0xa00] sm:$0xff] }
  0xdc   :  { %2925 = vmatpush1.bf16.msra.mxu0 %v6016_v36  ;;  %3089 = vmatpush1.bf16.msra.mxu1 %v6018_v37  ;;  %v6081_v36 = vcombine.high %v380_v29, %v384_v30  ;;  %v388_v37 = vld [vmem:[#allocation2 + $0x8c0] sm:$0xff] }
  0xdd   :  { %2926 = vmatprep.subr.bf16.mxu0 %v6025_v38  ;;  %3090 = vmatprep.subr.bf16.mxu1 %v6027_v42  ;;  %v392_v38 = vld [vmem:[#allocation2 + $0x8e0] sm:$0xff]  ;;  %v6080_v42 = vcombine.low %v380_v29, %v384_v30  ;;  %v437_v29 = vld [vmem:[#allocation2 + $0xa48] sm:$0xff] }
  0xde   :  { %v6138_v41 = vcombine.low %v437_v29, %v441_v31 }
  0xe0   :  { %2927 = vmatpush1.bf16.msra.mxu0 %v6024_v44  ;;  %3091 = vmatpush1.bf16.msra.mxu1 %v6026_v45  ;;  %v6089_v44 = vcombine.high %v388_v37, %v392_v38  ;;  %v396_v45 = vld [vmem:[#allocation2 + $0x900] sm:$0xff] }
  0xe1   :  { %2928 = vmatprep.subr.bf16.mxu0 %v6033_v46  ;;  %3092 = vmatprep.subr.bf16.mxu1 %v6035_v50  ;;  %v400_v46 = vld [vmem:[#allocation2 + $0x920] sm:$0xff]  ;;  %v6088_v50 = vcombine.low %v388_v37, %v392_v38  ;;  %v445_v37 = vld [vmem:[#allocation2 + $0xa88] sm:$0xff]  ;;  %v6139_v38 = vcombine.high %v437_v29, %v441_v31 }
  0xe2   :  { %v6146_v49 = vcombine.low %v445_v37, %v449_v39  ;;  %v497_v29 = vld [vmem:[#allocation2 + $0xc28] sm:$0xff] }
  0xe4   :  { %2929 = vmatpush1.bf16.msra.mxu0 %v6032_v52  ;;  %3093 = vmatpush1.bf16.msra.mxu1 %v6034_v54  ;;  %v6097_v52 = vcombine.high %v396_v45, %v400_v46  ;;  %v404_v54 = vld [vmem:[#allocation2 + $0x940] sm:$0xff] }
  0xe5   :  { %2930 = vmatprep.subr.bf16.mxu0 %v6041_v55  ;;  %3094 = vmatprep.subr.bf16.mxu1 %v6043_v60  ;;  %v408_v55 = vld [vmem:[#allocation2 + $0x960] sm:$0xff]  ;;  %v6096_v60 = vcombine.low %v396_v45, %v400_v46  ;;  %v453_v45 = vld [vmem:[#allocation2 + $0xac8] sm:$0xff]  ;;  %v6147_v46 = vcombine.high %v445_v37, %v449_v39 }
  0xe6   :  { %v6154_v59 = vcombine.low %v453_v45, %v457_v47  ;;  %v505_v37 = vld [vmem:[#allocation2 + $0xc68] sm:$0xff] }
  0xe8   :  { %2931 = vmatpush1.bf16.msra.mxu0 %v6040_v62  ;;  %3095 = vmatpush1.bf16.msra.mxu1 %v6042_v63  ;;  %v6105_v62 = vcombine.high %v404_v54, %v408_v55  ;;  %v412_v63 = vld [vmem:[#allocation2 + $0x980] sm:$0xff] }
  0xe9   :  { %2932 = vmatprep.subr.bf16.mxu0 %v6049_v0  ;;  %3096 = vmatprep.subr.bf16.mxu1 %v6051_v4  ;;  %v416_v0 = vld [vmem:[#allocation2 + $0x9a0] sm:$0xff]  ;;  %v6104_v4 = vcombine.low %v404_v54, %v408_v55  ;;  %v461_v54 = vld [vmem:[#allocation2 + $0xb08] sm:$0xff]  ;;  %v6155_v55 = vcombine.high %v453_v45, %v457_v47 }
  0xea   :  { %v6162_v3 = vcombine.low %v461_v54, %v465_v56 }
  0xec   :  { %2933 = vmatpush1.bf16.msra.mxu0 %v6048_v6  ;;  %3097 = vmatpush1.bf16.msra.mxu1 %v6050_v7  ;;  %v6113_v6 = vcombine.high %v412_v63, %v416_v0  ;;  %v420_v7 = vld [vmem:[#allocation2 + $0x9c0] sm:$0xff] }
  0xed   :  { %2934 = vmatprep.subr.bf16.mxu0 %v6057_v8  ;;  %3098 = vmatprep.subr.bf16.mxu1 %v6059_v13  ;;  %v424_v8 = vld [vmem:[#allocation2 + $0x9e0] sm:$0xff]  ;;  %v6112_v13 = vcombine.low %v412_v63, %v416_v0  ;;  %v469_v63 = vld [vmem:[#allocation2 + $0xb48] sm:$0xff]  ;;  %v6163_v0 = vcombine.high %v461_v54, %v465_v56 }
  0xee   :  { %v6120_v22 = vcombine.low %v420_v7, %v424_v8  ;;  %v521_v54 = vld [vmem:[#allocation2 + $0xce8] sm:$0xff] }
  0xf0   :  { %2935 = vmatpush1.bf16.msra.mxu0 %v6056_v16  ;;  %3099 = vmatpush1.bf16.msra.mxu1 %v6058_v18  ;;  %v6121_v16 = vcombine.high %v420_v7, %v424_v8  ;;  %v432_v18 = vld [vmem:[#allocation2 + $0xa20] sm:$0xff]  ;;  %v477_v7 = vld [vmem:[#allocation2 + $0xb88] sm:$0xff]  ;;  %v6171_v8 = vcombine.high %v469_v63, %v473_v1 }
  0xf1   :  { %2945 = vmatprep.subr.bf16.mxu0 %v6065_v19  ;;  %3109 = vmatprep.subr.bf16.mxu1 %v6067_v53  ;;  %v429_v19 = vld [vmem:[#allocation2 + $0xa08] sm:$0xff]  ;;  %v6122_v53 = vcombine.low %v421_v9, %v425_v11  ;;  %v6170_v11 = vcombine.low %v469_v63, %v473_v1 }
  0xf2   :  { %v6131_v30 = vcombine.high %v429_v19, %v433_v21  ;;  %v6130_v33 = vcombine.low %v429_v19, %v433_v21  ;;  %v481_v9 = vld [vmem:[#allocation2 + $0xba8] sm:$0xff] }
  0xf3   :  { %2937 = vmatmul.mubr.bf16.vlgmr.msra.gmra.mrb[0].mxu0 %v7441_v25  ;;  %3101 = vmatmul.mubr.bf16.vlgmr.msra.gmra.mrb[0].mxu1 %v7441_v25  ;;  %v489_v19 = vld [vmem:[#allocation2 + $0xbe8] sm:$0xff]  ;;  %v6178_v21 = vcombine.low %v477_v7, %v481_v9 }
  0xf4   :  { %2946 = vmatpush1.bf16.msra.mxu0 %v6064_v26  ;;  %3110 = vmatpush1.bf16.msra.mxu1 %v6066_v27  ;;  %v6129_v26 = vcombine.high %v428_v17, %v432_v18  ;;  %v436_v27 = vld [vmem:[#allocation2 + $0xa40] sm:$0xff] }
  0xf5   :  { %2947 = vmatprep.subr.bf16.mxu0 %v6073_v28  ;;  %3111 = vmatprep.subr.bf16.mxu1 %v6075_v32  ;;  %v440_v28 = vld [vmem:[#allocation2 + $0xa60] sm:$0xff]  ;;  %v6128_v32 = vcombine.low %v428_v17, %v432_v18  ;;  %v485_v17 = vld [vmem:[#allocation2 + $0xbc8] sm:$0xff]  ;;  %v6179_v18 = vcombine.high %v477_v7, %v481_v9 }
  0xf6   :  { %2977 = vmatprep.mubr.bf16.mxu0 %v7445_v34  ;;  %3141 = vmatprep.mubr.bf16.mxu1 %v7445_v34  ;;  %v6186_v31 = vcombine.low %v485_v17, %v489_v19 }
  0xf8   :  { %2948 = vmatpush1.bf16.msra.mxu0 %v6072_v15  ;;  %3112 = vmatpush1.bf16.msra.mxu1 %v6074_v35  ;;  %v6137_v15 = vcombine.high %v436_v27, %v440_v28  ;;  %v444_v35 = vld [vmem:[#allocation2 + $0xa80] sm:$0xff] }
  0xf9   :  { %2949 = vmatprep.subr.bf16.mxu0 %v6081_v36  ;;  %3113 = vmatprep.subr.bf16.mxu1 %v6083_v40  ;;  %v448_v36 = vld [vmem:[#allocation2 + $0xaa0] sm:$0xff]  ;;  %v6136_v40 = vcombine.low %v436_v27, %v440_v28  ;;  %v493_v27 = vld [vmem:[#allocation2 + $0xc08] sm:$0xff]  ;;  %v6187_v28 = vcombine.high %v485_v17, %v489_v19 }
  0xfc   :  { %2950 = vmatpush1.bf16.msra.mxu0 %v6080_v42  ;;  %3114 = vmatpush1.bf16.msra.mxu1 %v6082_v43  ;;  %v6145_v42 = vcombine.high %v444_v35, %v448_v36  ;;  %v452_v43 = vld [vmem:[#allocation2 + $0xac0] sm:$0xff] }
  0xfd   :  { %2951 = vmatprep.subr.bf16.mxu0 %v6089_v44  ;;  %3115 = vmatprep.subr.bf16.mxu1 %v6091_v48  ;;  %v456_v44 = vld [vmem:[#allocation2 + $0xae0] sm:$0xff]  ;;  %v6144_v48 = vcombine.low %v444_v35, %v448_v36  ;;  %v501_v35 = vld [vmem:[#allocation2 + $0xc48] sm:$0xff]  ;;  %v6195_v36 = vcombine.high %v493_v27, %v497_v29 }
  0xfe   :  { %v6203_v45 = vcombine.high %v501_v35, %v505_v37 }
 0x100   :  { %2952 = vmatpush1.bf16.msra.mxu0 %v6088_v50  ;;  %3116 = vmatpush1.bf16.msra.mxu1 %v6090_v51  ;;  %v6153_v50 = vcombine.high %v452_v43, %v456_v44  ;;  %v460_v51 = vld [vmem:[#allocation2 + $0xb00] sm:$0xff] }
 0x101   :  { %2953 = vmatprep.subr.bf16.mxu0 %v6097_v52  ;;  %3117 = vmatprep.subr.bf16.mxu1 %v6099_v58  ;;  %v464_v52 = vld [vmem:[#allocation2 + $0xb20] sm:$0xff]  ;;  %v6152_v58 = vcombine.low %v452_v43, %v456_v44  ;;  %v509_v44 = vld [vmem:[#allocation2 + $0xc88] sm:$0xff] }
 0x102   :  { %v512_v43 = vld [vmem:[#allocation2 + $0xca0] sm:$0xff] }
 0x104   :  { %2954 = vmatpush1.bf16.msra.mxu0 %v6096_v60  ;;  %3118 = vmatpush1.bf16.msra.mxu1 %v6098_v61  ;;  %v6161_v60 = vcombine.high %v460_v51, %v464_v52  ;;  %v468_v61 = vld [vmem:[#allocation2 + $0xb40] sm:$0xff] }
 0x105   :  { %2955 = vmatprep.subr.bf16.mxu0 %v6105_v62  ;;  %3119 = vmatprep.subr.bf16.mxu1 %v6107_v2  ;;  %v472_v62 = vld [vmem:[#allocation2 + $0xb60] sm:$0xff]  ;;  %v6160_v2 = vcombine.low %v460_v51, %v464_v52  ;;  %v517_v51 = vld [vmem:[#allocation2 + $0xcc8] sm:$0xff] }
 0x106   :  { %v6219_v63 = vcombine.high %v517_v51, %v521_v54 }
 0x108   :  { %2956 = vmatpush1.bf16.msra.mxu0 %v6104_v4  ;;  %3120 = vmatpush1.bf16.msra.mxu1 %v6106_v5  ;;  %v6169_v4 = vcombine.high %v468_v61, %v472_v62  ;;  %v476_v5 = vld [vmem:[#allocation2 + $0xb80] sm:$0xff] }
 0x109   :  { %2957 = vmatprep.subr.bf16.mxu0 %v6113_v6  ;;  %3121 = vmatprep.subr.bf16.mxu1 %v6115_v10  ;;  %v480_v6 = vld [vmem:[#allocation2 + $0xba0] sm:$0xff]  ;;  %v6168_v10 = vcombine.low %v468_v61, %v472_v62  ;;  %v525_v62 = vld [vmem:[#allocation2 + $0xd08] sm:$0xff] }
 0x10a   :  { %v528_v61 = vld [vmem:[#allocation2 + $0xd20] sm:$0xff] }
 0x10c   :  { %2958 = vmatpush1.bf16.msra.mxu0 %v6112_v13  ;;  %3122 = vmatpush1.bf16.msra.mxu1 %v6114_v14  ;;  %v6177_v13 = vcombine.high %v476_v5, %v480_v6  ;;  %v484_v14 = vld [vmem:[#allocation2 + $0xbc0] sm:$0xff] }
 0x10d   :  { %2959 = vmatprep.subr.bf16.mxu0 %v6121_v16  ;;  %3123 = vmatprep.subr.bf16.mxu1 %v6123_v20  ;;  %v488_v16 = vld [vmem:[#allocation2 + $0xbe0] sm:$0xff]  ;;  %v6176_v20 = vcombine.low %v476_v5, %v480_v6  ;;  %v533_v6 = vld [vmem:[#allocation2 + $0xd48] sm:$0xff] }
 0x10e   :  { %v536_v5 = vld [vmem:[#allocation2 + $0xd60] sm:$0xff] }
 0x110   :  { %2960 = vmatpush1.bf16.msra.mxu0 %v6120_v22  ;;  %3124 = vmatpush1.bf16.msra.mxu1 %v6122_v53  ;;  %v6185_v22 = vcombine.high %v484_v14, %v488_v16  ;;  %v492_v53 = vld [vmem:[#allocation2 + $0xc00] sm:$0xff] }
 0x111   :  { %2961 = vmatprep.subr.bf16.mxu0 %v6129_v26  ;;  %3125 = vmatprep.subr.bf16.mxu1 %v6131_v30  ;;  %v496_v26 = vld [vmem:[#allocation2 + $0xc20] sm:$0xff]  ;;  %v6184_v30 = vcombine.low %v484_v14, %v488_v16  ;;  %v541_v16 = vld [vmem:[#allocation2 + $0xd88] sm:$0xff] }
 0x112   :  { %v6192_v39 = vcombine.low %v492_v53, %v496_v26  ;;  %v544_v14 = vld [vmem:[#allocation2 + $0xda0] sm:$0xff] }
 0x114   :  { %2962 = vmatpush1.bf16.msra.mxu0 %v6128_v32  ;;  %3126 = vmatpush1.bf16.msra.mxu1 %v6130_v33  ;;  %v6193_v32 = vcombine.high %v492_v53, %v496_v26  ;;  %v500_v33 = vld [vmem:[#allocation2 + $0xc40] sm:$0xff]  ;;  %v549_v26 = vld [vmem:[#allocation2 + $0xdc8] sm:$0xff] }
 0x115   :  { %2963 = vmatprep.subr.bf16.mxu0 %v6137_v15  ;;  %3127 = vmatprep.subr.bf16.mxu1 %v6139_v38  ;;  %v504_v15 = vld [vmem:[#allocation2 + $0xc60] sm:$0xff]  ;;  %v7453_v38 = vcombine.low %v7437_v24, %v7437_v24  ;;  %v6202_v24 = vcombine.low %v501_v35, %v505_v37 }
 0x116   :  { %v6200_v47 = vcombine.low %v500_v33, %v504_v15  ;;  %v552_v53 = vld [vmem:[#allocation2 + $0xde0] sm:$0xff] }
 0x118   :  { %2964 = vmatpush1.bf16.msra.mxu0 %v6136_v40  ;;  %3128 = vmatpush1.bf16.msra.mxu1 %v6138_v41  ;;  %v6194_v40 = vcombine.low %v493_v27, %v497_v29  ;;  %v6201_v41 = vcombine.high %v500_v33, %v504_v15  ;;  %v114_v33 = vld [vmem:[#allocation2 + $0x30] sm:$0xff]  ;;  %v111_v15 = vld [vmem:[#allocation2 + $0x18] sm:$0xff] }
 0x119   :  { %2965 = vmatprep.subr.bf16.mxu0 %v6145_v42  ;;  %3129 = vmatprep.subr.bf16.mxu1 %v6147_v46  ;;  %v508_v42 = vld [vmem:[#allocation2 + $0xc80] sm:$0xff]  ;;  %v513_v46 = vld [vmem:[#allocation2 + $0xca8] sm:$0xff] }
 0x11a   :  { %v6211_v52 = vcombine.high %v509_v44, %v513_v46  ;;  %v6208_v56 = vcombine.low %v508_v42, %v512_v43 }
 0x11c   :  { %2966 = vmatpush1.bf16.msra.mxu0 %v6144_v48  ;;  %3130 = vmatpush1.bf16.msra.mxu1 %v6146_v49  ;;  %v6209_v48 = vcombine.high %v508_v42, %v512_v43  ;;  %v516_v49 = vld [vmem:[#allocation2 + $0xcc0] sm:$0xff]  ;;  %v118_v42 = vld [vmem:[#allocation2 + $0x50] sm:$0xff] }
 0x11d   :  { %2967 = vmatprep.subr.bf16.mxu0 %v6153_v50  ;;  %3131 = vmatprep.subr.bf16.mxu1 %v6155_v55  ;;  %v520_v50 = vld [vmem:[#allocation2 + $0xce0] sm:$0xff]  ;;  %v7292_v55 = vmov 0   ;;  %v122_v43 = vld [vmem:[#allocation2 + $0x70] sm:$0xff] }
 0x11e   :  { %v6216_v1 = vcombine.low %v516_v49, %v520_v50 }
 0x120   :  { %2968 = vmatpush1.bf16.msra.mxu0 %v6152_v58  ;;  %3132 = vmatpush1.bf16.msra.mxu1 %v6154_v59  ;;  %v6210_v58 = vcombine.low %v509_v44, %v513_v46  ;;  %v6217_v59 = vcombine.high %v516_v49, %v520_v50  ;;  %v119_v44 = vld [vmem:[#allocation2 + $0x58] sm:$0xff]  ;;  %v126_v49 = vld [vmem:[#allocation2 + $0x90] sm:$0xff] }
 0x121   :  { %2969 = vmatprep.subr.bf16.mxu0 %v6161_v60  ;;  %3133 = vmatprep.subr.bf16.mxu1 %v6163_v0  ;;  %v524_v60 = vld [vmem:[#allocation2 + $0xd00] sm:$0xff]  ;;  %v529_v0 = vld [vmem:[#allocation2 + $0xd28] sm:$0xff]  ;;  %v123_v46 = vld [vmem:[#allocation2 + $0x78] sm:$0xff] }
 0x122   :  { %v6227_v7 = vcombine.high %v525_v62, %v529_v0  ;;  %v6224_v9 = vcombine.low %v524_v60, %v528_v61  ;;  %v5823_v50 = vcombine.high %v119_v44, %v123_v46 }
 0x124   :  { %2970 = vmatpush1.bf16.msra.mxu0 %v6160_v2  ;;  %3134 = vmatpush1.bf16.msra.mxu1 %v6162_v3  ;;  %v6218_v2 = vcombine.low %v517_v51, %v521_v54  ;;  %v6225_v3 = vcombine.high %v524_v60, %v528_v61  ;;  %v130_v51 = vld [vmem:[#allocation2 + $0xb0] sm:$0xff]  ;;  %v131_v54 = vld [vmem:[#allocation2 + $0xb8] sm:$0xff] }
 0x125   :  { %2971 = vmatprep.subr.bf16.mxu0 %v6169_v4  ;;  %3135 = vmatprep.subr.bf16.mxu1 %v6171_v8  ;;  %v532_v4 = vld [vmem:[#allocation2 + $0xd40] sm:$0xff]  ;;  %v537_v8 = vld [vmem:[#allocation2 + $0xd68] sm:$0xff]  ;;  %v134_v61 = vld [vmem:[#allocation2 + $0xd0] sm:$0xff] }
 0x126   :  { %v6235_v17 = vcombine.high %v533_v6, %v537_v8  ;;  %v6232_v19 = vcombine.low %v532_v4, %v536_v5 }
 0x128   :  { %2972 = vmatpush1.bf16.msra.mxu0 %v6168_v10  ;;  %3136 = vmatpush1.bf16.msra.mxu1 %v6170_v11  ;;  %v6226_v10 = vcombine.low %v525_v62, %v529_v0  ;;  %v6233_v11 = vcombine.high %v532_v4, %v536_v5  ;;  %v138_v62 = vld [vmem:[#allocation2 + $0xf0] sm:$0xff]  ;;  %v139_v0 = vld [vmem:[#allocation2 + $0xf8] sm:$0xff] }
 0x129   :  { %2973 = vmatprep.subr.bf16.mxu0 %v6177_v13  ;;  %3137 = vmatprep.subr.bf16.mxu1 %v6179_v18  ;;  %v540_v13 = vld [vmem:[#allocation2 + $0xd80] sm:$0xff]  ;;  %v545_v18 = vld [vmem:[#allocation2 + $0xda8] sm:$0xff]  ;;  %v142_v5 = vld [vmem:[#allocation2 + $0x110] sm:$0xff] }
 0x12a   :  { %v6243_v27 = vcombine.high %v541_v16, %v545_v18  ;;  %v6240_v29 = vcombine.low %v540_v13, %v544_v14 }
 0x12c   :  { %2974 = vmatpush1.bf16.msra.mxu0 %v6176_v20  ;;  %3138 = vmatpush1.bf16.msra.mxu1 %v6178_v21  ;;  %v6234_v20 = vcombine.low %v533_v6, %v537_v8  ;;  %v6241_v21 = vcombine.high %v540_v13, %v544_v14  ;;  %v146_v6 = vld [vmem:[#allocation2 + $0x130] sm:$0xff]  ;;  %v147_v8 = vld [vmem:[#allocation2 + $0x138] sm:$0xff] }
 0x12d   :  { %2975 = vmatprep.subr.bf16.mxu0 %v6185_v22  ;;  %3139 = vmatprep.subr.bf16.mxu1 %v6187_v28  ;;  %v548_v22 = vld [vmem:[#allocation2 + $0xdc0] sm:$0xff]  ;;  %v553_v28 = vld [vmem:[#allocation2 + $0xde8] sm:$0xff]  ;;  %v150_v13 = vld [vmem:[#allocation2 + $0x150] sm:$0xff] }
 0x12e   :  { %v6251_v35 = vcombine.high %v549_v26, %v553_v28  ;;  %v6248_v37 = vcombine.low %v548_v22, %v552_v53  ;;  %v154_v14 = vld [vmem:[#allocation2 + $0x170] sm:$0xff] }
 0x130   :  { %2976 = vmatpush1.bf16.msra.mxu0 %v6184_v30  ;;  %3140 = vmatpush1.bf16.msra.mxu1 %v6186_v31  ;;  %v6242_v30 = vcombine.low %v541_v16, %v545_v18  ;;  %v6249_v31 = vcombine.high %v548_v22, %v552_v53  ;;  %v151_v16 = vld [vmem:[#allocation2 + $0x158] sm:$0xff]  ;;  %v5844_v18 = vcombine.low %v142_v5, %v146_v6  ;;  %v158_v22 = vld [vmem:[#allocation2 + $0x190] sm:$0xff] }
 0x131   :  { %2986 = vmatprep.subr.bf16.mxu0 %v6193_v32  ;;  %3150 = vmatprep.subr.bf16.mxu1 %v6195_v36  ;;  %v110_v32 = vld [vmem:[#allocation2 + $0x10] sm:$0xff]  ;;  %v115_v36 = vld [vmem:[#allocation2 + $0x38] sm:$0xff] }
 0x132   :  { %v162_v53 = vld [vmem:[#allocation2 + $0x1b0] sm:$0xff] }
 0x133   :  { %2978 = vmatmul.mubr.bf16.vlgmr.msra.gmra.mrb[0].mxu0 %v7453_v38  ;;  %3142 = vmatmul.mubr.bf16.vlgmr.msra.gmra.mrb[0].mxu1 %v7453_v38 }
 0x134   :  { %2987 = vmatpush1.bf16.msra.mxu0 %v6192_v39  ;;  %3151 = vmatpush1.bf16.msra.mxu1 %v6194_v40  ;;  %v6250_v39 = vcombine.low %v549_v26, %v553_v28  ;;  %v6693_v40 = vld [vmem:[%s7538_s0 + $0x18] ss:$0 sps:$4 sm:$0xff]   ;;  %v5852_v28 = vcombine.low %v150_v13, %v154_v14 }
 0x135   :  { %2988 = vmatprep.subr.bf16.mxu0 %v6201_v41  ;;  %3152 = vmatprep.subr.bf16.mxu1 %v6203_v45  ;;  %v5813_v41 = vcombine.high %v110_v32, %v114_v33  ;;  %v5815_v45 = vcombine.high %v111_v15, %v115_v36  ;;  %v159_v26 = vld [vmem:[#allocation2 + $0x198] sm:$0xff] }
 0x136   :  { %3018 = vmatprep.mubr.bf16.mxu0 %v7292_v55  ;;  %3182 = vmatprep.mubr.bf16.mxu1 %v7292_v55 }
 0x138   :  { %2989 = vmatpush1.bf16.msra.mxu0 %v6200_v47  ;;  %3153 = vmatpush1.bf16.msra.mxu1 %v6202_v24  ;;  %v5812_v47 = vcombine.low %v110_v32, %v114_v33  ;;  %v5814_v24 = vcombine.low %v111_v15, %v115_v36  ;;  %v166_v32 = vld [vmem:[#allocation2 + $0x1d0] sm:$0xff]  ;;  %v167_v15 = vld [vmem:[#allocation2 + $0x1d8] sm:$0xff]  ;;  %v5860_v36 = vcombine.low %v158_v22, %v162_v53 }
 0x139   :  { %2990 = vmatprep.subr.bf16.mxu0 %v6209_v48  ;;  %3154 = vmatprep.subr.bf16.mxu1 %v6211_v52  ;;  %v5821_v48 = vcombine.high %v118_v42, %v122_v43  ;;  %v127_v52 = vld [vmem:[#allocation2 + $0x98] sm:$0xff]  ;;  %v170_v33 = vld [vmem:[#allocation2 + $0x1f0] sm:$0xff] }
 0x13a   :  { %v5831_v60 = vcombine.high %v127_v52, %v131_v54 }
 0x13c   :  { %2991 = vmatpush1.bf16.msra.mxu0 %v6208_v56  ;;  %3155 = vmatpush1.bf16.msra.mxu1 %v6210_v58  ;;  %v5820_v56 = vcombine.low %v118_v42, %v122_v43  ;;  %v5822_v58 = vcombine.low %v119_v44, %v123_v46  ;;  %v178_v42 = vld [vmem:[#allocation2 + $0x230] sm:$0xff]  ;;  %v175_v43 = vld [vmem:[#allocation2 + $0x218] sm:$0xff] }
 0x13d   :  { %2992 = vmatprep.subr.bf16.mxu0 %v6217_v59  ;;  %3156 = vmatprep.subr.bf16.mxu1 %v6219_v63  ;;  %v5829_v59 = vcombine.high %v126_v49, %v130_v51  ;;  %v135_v63 = vld [vmem:[#allocation2 + $0xd8] sm:$0xff] }
 0x13e   :  { %v5839_v4 = vcombine.high %v135_v63, %v139_v0  ;;  %v179_v44 = vld [vmem:[#allocation2 + $0x238] sm:$0xff] }
 0x140   :  { %2993 = vmatpush1.bf16.msra.mxu0 %v6216_v1  ;;  %3157 = vmatpush1.bf16.msra.mxu1 %v6218_v2  ;;  %v5828_v1 = vcombine.low %v126_v49, %v130_v51  ;;  %v5830_v2 = vcombine.low %v127_v52, %v131_v54  ;;  %v186_v49 = vld [vmem:[#allocation2 + $0x270] sm:$0xff]  ;;  %v187_v51 = vld [vmem:[#allocation2 + $0x278] sm:$0xff]  ;;  %v5878_v54 = vcombine.low %v175_v43, %v179_v44 }
 0x141   :  { %2994 = vmatprep.subr.bf16.mxu0 %v6225_v3  ;;  %3158 = vmatprep.subr.bf16.mxu1 %v6227_v7  ;;  %v5837_v3 = vcombine.high %v134_v61, %v138_v62  ;;  %v143_v7 = vld [vmem:[#allocation2 + $0x118] sm:$0xff] }
 0x144   :  { %2995 = vmatpush1.bf16.msra.mxu0 %v6224_v9  ;;  %3159 = vmatpush1.bf16.msra.mxu1 %v6226_v10  ;;  %v5836_v9 = vcombine.low %v134_v61, %v138_v62  ;;  %v5838_v10 = vcombine.low %v135_v63, %v139_v0  ;;  %v191_v61 = vld [vmem:[#allocation2 + $0x298] sm:$0xff] }
 0x145   :  { %2996 = vmatprep.subr.bf16.mxu0 %v6233_v11  ;;  %3160 = vmatprep.subr.bf16.mxu1 %v6235_v17  ;;  %v5845_v11 = vcombine.high %v142_v5, %v146_v6  ;;  %v155_v17 = vld [vmem:[#allocation2 + $0x178] sm:$0xff] }
 0x146   :  { %v195_v62 = vld [vmem:[#allocation2 + $0x2b8] sm:$0xff] }
 0x147   :  { %v199_v5 = vld [vmem:[#allocation2 + $0x2d8] sm:$0xff] }
 0x148   :  { %2997 = vmatpush1.bf16.msra.mxu0 %v6232_v19  ;;  %3161 = vmatpush1.bf16.msra.mxu1 %v6234_v20  ;;  %v5846_v19 = vcombine.low %v143_v7, %v147_v8  ;;  %v5853_v20 = vcombine.high %v150_v13, %v154_v14  ;;  %v203_v6 = vld [vmem:[#allocation2 + $0x2f8] sm:$0xff] }
 0x149   :  { %2998 = vmatprep.subr.bf16.mxu0 %v6241_v21  ;;  %3162 = vmatprep.subr.bf16.mxu1 %v6243_v27  ;;  %v5855_v21 = vcombine.high %v151_v16, %v155_v17  ;;  %v163_v27 = vld [vmem:[#allocation2 + $0x1b8] sm:$0xff] }
 0x14a   :  { %v207_v13 = vld [vmem:[#allocation2 + $0x318] sm:$0xff] }
 0x14b   :  { %v211_v14 = vld [vmem:[#allocation2 + $0x338] sm:$0xff] }
 0x14c   :  { %2999 = vmatpush1.bf16.msra.mxu0 %v6240_v29  ;;  %3163 = vmatpush1.bf16.msra.mxu1 %v6242_v30  ;;  %v5854_v29 = vcombine.low %v151_v16, %v155_v17  ;;  %v5861_v30 = vcombine.high %v158_v22, %v162_v53  ;;  %v5902_v17 = vcombine.low %v199_v5, %v203_v6  ;;  %v215_v22 = vld [vmem:[#allocation2 + $0x358] sm:$0xff] }
 0x14d   :  { %3000 = vmatprep.subr.bf16.mxu0 %v6249_v31  ;;  %3164 = vmatprep.subr.bf16.mxu1 %v6251_v35  ;;  %v5863_v31 = vcombine.high %v159_v26, %v163_v27  ;;  %v171_v35 = vld [vmem:[#allocation2 + $0x1f8] sm:$0xff] }
 0x14e   :  { %v5870_v46 = vcombine.low %v167_v15, %v171_v35  ;;  %v219_v53 = vld [vmem:[#allocation2 + $0x378] sm:$0xff] }
 0x150   :  { %3001 = vmatpush1.bf16.msra.mxu0 %v6248_v37  ;;  %3165 = vmatpush1.bf16.msra.mxu1 %v6250_v39  ;;  %v5862_v37 = vcombine.low %v159_v26, %v163_v27  ;;  %v5869_v39 = vcombine.high %v166_v32, %v170_v33  ;;  %v5910_v27 = vcombine.low %v207_v13, %v211_v14 }
 0x151   :  { %3191 = vmatprep.subr.bf16.mxu0 %v5813_v41  ;;  %3355 = vmatprep.subr.bf16.mxu1 %v5815_v45  ;;  %v174_v41 = vld [vmem:[#allocation2 + $0x210] sm:$0xff]  ;;  %v5868_v45 = vcombine.low %v166_v32, %v170_v33  ;;  %v223_v32 = vld [vmem:[#allocation2 + $0x398] sm:$0xff] }
 0x152   :  { %v5876_v52 = vcombine.low %v174_v41, %v178_v42  ;;  %v227_v33 = vld [vmem:[#allocation2 + $0x3b8] sm:$0xff] }
 0x153   :  { %3019 = vmatmul.mubr.bf16.vlgmr.msra.gmra.mrb[0].mxu0 %v6693_v40  ;;  %3183 = vmatmul.mubr.bf16.vlgmr.msra.gmra.mrb[0].mxu1 %v6693_v40  ;;  %v5871_v40 = vcombine.high %v167_v15, %v171_v35  ;;  %v5918_v35 = vcombine.low %v215_v22, %v219_v53 }
 0x154   :  { %3192 = vmatpush1.bf16.msra.mxu0 %v5812_v47  ;;  %3356 = vmatpush1.bf16.msra.mxu1 %v5814_v24  ;;  %v5877_v47 = vcombine.high %v174_v41, %v178_v42  ;;  %v5879_v24 = vcombine.high %v175_v43, %v179_v44  ;;  %v231_v41 = vld [vmem:[#allocation2 + $0x3d8] sm:$0xff]  ;;  %v5926_v44 = vcombine.low %v223_v32, %v227_v33 }
 0x155   :  { %3193 = vmatprep.subr.bf16.mxu0 %v5821_v48  ;;  %3357 = vmatprep.subr.bf16.mxu1 %v5823_v50  ;;  %v182_v48 = vld [vmem:[#allocation2 + $0x250] sm:$0xff]  ;;  %v183_v50 = vld [vmem:[#allocation2 + $0x258] sm:$0xff] }
 0x156   :  { %3223 = vmatprep.mubr.bf16.mxu0 %v7413_v57  ;;  %3387 = vmatprep.mubr.bf16.mxu1 %v7413_v57  ;;  %v5847_v57 = vcombine.high %v143_v7, %v147_v8  ;;  %v5884_v63 = vcombine.low %v182_v48, %v186_v49  ;;  %v5886_v0 = vcombine.low %v183_v50, %v187_v51  ;;  %v235_v42 = vld [vmem:[#allocation2 + $0x3f8] sm:$0xff] }
 0x157   :  { %v5894_v8 = vcombine.low %v191_v61, %v195_v62 }
 0x158   :  { %3194 = vmatpush1.bf16.msra.mxu0 %v5820_v56  ;;  %3358 = vmatpush1.bf16.msra.mxu1 %v5822_v58  ;;  %v5885_v56 = vcombine.high %v182_v48, %v186_v49  ;;  %v5887_v58 = vcombine.high %v183_v50, %v187_v51  ;;  %v239_v48 = vld [vmem:[#allocation2 + $0x418] sm:$0xff]  ;;  %v5934_v51 = vcombine.low %v231_v41, %v235_v42 }
 0x159   :  { %3195 = vmatprep.subr.bf16.mxu0 %v5829_v59  ;;  %3359 = vmatprep.subr.bf16.mxu1 %v5831_v60  ;;  %v190_v59 = vld [vmem:[#allocation2 + $0x290] sm:$0xff]  ;;  %v243_v49 = vld [vmem:[#allocation2 + $0x438] sm:$0xff] }
 0x15a   :  { %v194_v60 = vld [vmem:[#allocation2 + $0x2b0] sm:$0xff] }
 0x15b   :  { %v5892_v7 = vcombine.low %v190_v59, %v194_v60 }
 0x15c   :  { %3196 = vmatpush1.bf16.msra.mxu0 %v5828_v1  ;;  %3360 = vmatpush1.bf16.msra.mxu1 %v5830_v2  ;;  %v5893_v1 = vcombine.high %v190_v59, %v194_v60  ;;  %v5895_v2 = vcombine.high %v191_v61, %v195_v62  ;;  %v247_v59 = vld [vmem:[#allocation2 + $0x458] sm:$0xff]  ;;  %v5942_v62 = vcombine.low %v239_v48, %v243_v49 }
 0x15d   :  { %3197 = vmatprep.subr.bf16.mxu0 %v5837_v3  ;;  %3361 = vmatprep.subr.bf16.mxu1 %v5839_v4  ;;  %v198_v3 = vld [vmem:[#allocation2 + $0x2d0] sm:$0xff]  ;;  %v251_v60 = vld [vmem:[#allocation2 + $0x478] sm:$0xff] }
 0x15e   :  { %v202_v4 = vld [vmem:[#allocation2 + $0x2f0] sm:$0xff] }
 0x15f   :  { %v5900_v16 = vcombine.low %v198_v3, %v202_v4 }
 0x160   :  { %3198 = vmatpush1.bf16.msra.mxu0 %v5836_v9  ;;  %3362 = vmatpush1.bf16.msra.mxu1 %v5838_v10  ;;  %v5901_v9 = vcombine.high %v198_v3, %v202_v4  ;;  %v5903_v10 = vcombine.high %v199_v5, %v203_v6  ;;  %v255_v3 = vld [vmem:[#allocation2 + $0x498] sm:$0xff]  ;;  %v5950_v6 = vcombine.low %v247_v59, %v251_v60 }
 0x161   :  { %3199 = vmatprep.subr.bf16.mxu0 %v5845_v11  ;;  %3363 = vmatprep.subr.bf16.mxu1 %v5847_v57  ;;  %v206_v11 = vld [vmem:[#allocation2 + $0x310] sm:$0xff]  ;;  %v259_v4 = vld [vmem:[#allocation2 + $0x4b8] sm:$0xff] }
 0x162   :  { %v210_v57 = vld [vmem:[#allocation2 + $0x330] sm:$0xff] }
 0x163   :  { %v5908_v26 = vcombine.low %v206_v11, %v210_v57 }
 0x164   :  { %3200 = vmatpush1.bf16.msra.mxu0 %v5844_v18  ;;  %3364 = vmatpush1.bf16.msra.mxu1 %v5846_v19  ;;  %v5909_v18 = vcombine.high %v206_v11, %v210_v57  ;;  %v5911_v19 = vcombine.high %v207_v13, %v211_v14  ;;  %v263_v11 = vld [vmem:[#allocation2 + $0x4d8] sm:$0xff] }
 0x165   :  { %3201 = vmatprep.subr.bf16.mxu0 %v5853_v20  ;;  %3365 = vmatprep.subr.bf16.mxu1 %v5855_v21  ;;  %v214_v20 = vld [vmem:[#allocation2 + $0x350] sm:$0xff]  ;;  %v267_v57 = vld [vmem:[#allocation2 + $0x4f8] sm:$0xff] }
 0x166   :  { %v218_v21 = vld [vmem:[#allocation2 + $0x370] sm:$0xff] }
 0x167   :  { %v5916_v15 = vcombine.low %v214_v20, %v218_v21 }
 0x168   :  { %3202 = vmatpush1.bf16.msra.mxu0 %v5852_v28  ;;  %3366 = vmatpush1.bf16.msra.mxu1 %v5854_v29  ;;  %v5917_v28 = vcombine.high %v214_v20, %v218_v21  ;;  %v5919_v29 = vcombine.high %v215_v22, %v219_v53  ;;  %v275_v20 = vld [vmem:[#allocation2 + $0x538] sm:$0xff]  ;;  %v5966_v22 = vcombine.low %v263_v11, %v267_v57 }
 0x169   :  { %3203 = vmatprep.subr.bf16.mxu0 %v5861_v30  ;;  %3367 = vmatprep.subr.bf16.mxu1 %v5863_v31  ;;  %v222_v30 = vld [vmem:[#allocation2 + $0x390] sm:$0xff] }
 0x16a   :  { %v226_v31 = vld [vmem:[#allocation2 + $0x3b0] sm:$0xff] }
 0x16b   :  { %v5924_v43 = vcombine.low %v222_v30, %v226_v31 }
 0x16c   :  { %3204 = vmatpush1.bf16.msra.mxu0 %v5860_v36  ;;  %3368 = vmatpush1.bf16.msra.mxu1 %v5862_v37  ;;  %v5925_v36 = vcombine.high %v222_v30, %v226_v31  ;;  %v5927_v37 = vcombine.high %v223_v32, %v227_v33 }
 0x16d   :  { %3205 = vmatprep.subr.bf16.mxu0 %v5869_v39  ;;  %3369 = vmatprep.subr.bf16.mxu1 %v5871_v40  ;;  %v230_v39 = vld [vmem:[#allocation2 + $0x3d0] sm:$0xff] }
 0x16e   :  { %v234_v40 = vld [vmem:[#allocation2 + $0x3f0] sm:$0xff] }
 0x16f   :  { %v5932_v50 = vcombine.low %v230_v39, %v234_v40 }
 0x170   :  { %3206 = vmatpush1.bf16.msra.mxu0 %v5868_v45  ;;  %3370 = vmatpush1.bf16.msra.mxu1 %v5870_v46  ;;  %v5933_v45 = vcombine.high %v230_v39, %v234_v40  ;;  %v5935_v46 = vcombine.high %v231_v41, %v235_v42 }
 0x171   :  { %3207 = vmatprep.subr.bf16.mxu0 %v5877_v47  ;;  %3371 = vmatprep.subr.bf16.mxu1 %v5879_v24  ;;  %v238_v47 = vld [vmem:[#allocation2 + $0x410] sm:$0xff] }
 0x172   :  { %v242_v24 = vld [vmem:[#allocation2 + $0x430] sm:$0xff] }
 0x173   :  { %v5940_v61 = vcombine.low %v238_v47, %v242_v24 }
 0x174   :  { %3208 = vmatpush1.bf16.msra.mxu0 %v5876_v52  ;;  %3372 = vmatpush1.bf16.msra.mxu1 %v5878_v54  ;;  %v5941_v52 = vcombine.high %v238_v47, %v242_v24  ;;  %v5943_v54 = vcombine.high %v239_v48, %v243_v49 }
 0x175   :  { %3209 = vmatprep.subr.bf16.mxu0 %v5885_v56  ;;  %3373 = vmatprep.subr.bf16.mxu1 %v5887_v58  ;;  %v246_v56 = vld [vmem:[#allocation2 + $0x450] sm:$0xff] }
 0x176   :  { %v250_v58 = vld [vmem:[#allocation2 + $0x470] sm:$0xff] }
 0x177   :  { %v5948_v5 = vcombine.low %v246_v56, %v250_v58 }
 0x178   :  { %3210 = vmatpush1.bf16.msra.mxu0 %v5884_v63  ;;  %3374 = vmatpush1.bf16.msra.mxu1 %v5886_v0  ;;  %v5949_v63 = vcombine.high %v246_v56, %v250_v58  ;;  %v5951_v0 = vcombine.high %v247_v59, %v251_v60 }
 0x179   :  { %3211 = vmatprep.subr.bf16.mxu0 %v5893_v1  ;;  %3375 = vmatprep.subr.bf16.mxu1 %v5895_v2  ;;  %v254_v1 = vld [vmem:[#allocation2 + $0x490] sm:$0xff] }
 0x17a   :  { %v258_v2 = vld [vmem:[#allocation2 + $0x4b0] sm:$0xff] }
 0x17b   :  { %v5956_v13 = vcombine.low %v254_v1, %v258_v2 }
 0x17c   :  { %3212 = vmatpush1.bf16.msra.mxu0 %v5892_v7  ;;  %3376 = vmatpush1.bf16.msra.mxu1 %v5894_v8  ;;  %v5957_v7 = vcombine.high %v254_v1, %v258_v2  ;;  %v5959_v8 = vcombine.high %v255_v3, %v259_v4 }
 0x17d   :  { %3213 = vmatprep.subr.bf16.mxu0 %v5901_v9  ;;  %3377 = vmatprep.subr.bf16.mxu1 %v5903_v10  ;;  %v262_v9 = vld [vmem:[#allocation2 + $0x4d0] sm:$0xff] }
 0x17e   :  { %v266_v10 = vld [vmem:[#allocation2 + $0x4f0] sm:$0xff] }
 0x17f   :  { %v5965_v14 = vcombine.high %v262_v9, %v266_v10  ;;  %v5964_v21 = vcombine.low %v262_v9, %v266_v10 }
 0x180   :  { %3214 = vmatpush1.bf16.msra.mxu0 %v5900_v16  ;;  %3378 = vmatpush1.bf16.msra.mxu1 %v5902_v17  ;;  %v5967_v16 = vcombine.high %v263_v11, %v267_v57  ;;  %v270_v17 = vld [vmem:[#allocation2 + $0x510] sm:$0xff] }
 0x181   :  { %3215 = vmatprep.subr.bf16.mxu0 %v5909_v18  ;;  %3379 = vmatprep.subr.bf16.mxu1 %v5911_v19  ;;  %v274_v18 = vld [vmem:[#allocation2 + $0x530] sm:$0xff]  ;;  %v271_v19 = vld [vmem:[#allocation2 + $0x518] sm:$0xff] }
 0x182   :  { %v5973_v53 = vcombine.high %v270_v17, %v274_v18  ;;  %v5972_v30 = vcombine.low %v270_v17, %v274_v18  ;;  %v5974_v31 = vcombine.low %v271_v19, %v275_v20 }
 0x184   :  { %3216 = vmatpush1.bf16.msra.mxu0 %v5908_v26  ;;  %3380 = vmatpush1.bf16.msra.mxu1 %v5910_v27  ;;  %v278_v26 = vld [vmem:[#allocation2 + $0x550] sm:$0xff] }
 0x185   :  { %3217 = vmatprep.subr.bf16.mxu0 %v5917_v28  ;;  %3381 = vmatprep.subr.bf16.mxu1 %v5919_v29  ;;  %v282_v27 = vld [vmem:[#allocation2 + $0x570] sm:$0xff]  ;;  %v279_v28 = vld [vmem:[#allocation2 + $0x558] sm:$0xff] }
 0x186   :  { %v283_v29 = vld [vmem:[#allocation2 + $0x578] sm:$0xff]  ;;  %v5981_v32 = vcombine.high %v278_v26, %v282_v27  ;;  %v5980_v39 = vcombine.low %v278_v26, %v282_v27 }
 0x187   :  { %v5983_v33 = vcombine.high %v279_v28, %v283_v29  ;;  %v5982_v40 = vcombine.low %v279_v28, %v283_v29 }
 0x188   :  { %3218 = vmatpush1.bf16.msra.mxu0 %v5916_v15  ;;  %3382 = vmatpush1.bf16.msra.mxu1 %v5918_v35  ;;  %v286_v15 = vld [vmem:[#allocation2 + $0x590] sm:$0xff] }
 0x189   :  { %3219 = vmatprep.subr.bf16.mxu0 %v5925_v36  ;;  %3383 = vmatprep.subr.bf16.mxu1 %v5927_v37  ;;  %v290_v35 = vld [vmem:[#allocation2 + $0x5b0] sm:$0xff]  ;;  %v287_v36 = vld [vmem:[#allocation2 + $0x598] sm:$0xff] }
 0x18a   :  { %v291_v37 = vld [vmem:[#allocation2 + $0x5b8] sm:$0xff]  ;;  %v5989_v41 = vcombine.high %v286_v15, %v290_v35  ;;  %v5988_v47 = vcombine.low %v286_v15, %v290_v35 }
 0x18b   :  { %v5991_v42 = vcombine.high %v287_v36, %v291_v37  ;;  %v5990_v24 = vcombine.low %v287_v36, %v291_v37 }
 0x18c   :  { %3220 = vmatpush1.bf16.msra.mxu0 %v5924_v43  ;;  %3384 = vmatpush1.bf16.msra.mxu1 %v5926_v44  ;;  %v294_v43 = vld [vmem:[#allocation2 + $0x5d0] sm:$0xff] }
 0x18d   :  { %3221 = vmatprep.subr.bf16.mxu0 %v5933_v45  ;;  %3385 = vmatprep.subr.bf16.mxu1 %v5935_v46  ;;  %v298_v44 = vld [vmem:[#allocation2 + $0x5f0] sm:$0xff]  ;;  %v295_v45 = vld [vmem:[#allocation2 + $0x5d8] sm:$0xff] }
 0x18e   :  { %v299_v46 = vld [vmem:[#allocation2 + $0x5f8] sm:$0xff]  ;;  %v5997_v48 = vcombine.high %v294_v43, %v298_v44  ;;  %v5996_v56 = vcombine.low %v294_v43, %v298_v44 }
 0x18f   :  { %v5999_v49 = vcombine.high %v295_v45, %v299_v46  ;;  %v5998_v58 = vcombine.low %v295_v45, %v299_v46 }
 0x190   :  { %3222 = vmatpush1.bf16.msra.mxu0 %v5932_v50  ;;  %3386 = vmatpush1.bf16.msra.mxu1 %v5934_v51  ;;  %v302_v50 = vld [vmem:[#allocation2 + $0x610] sm:$0xff] }
 0x191   :  { %3232 = vmatprep.subr.bf16.mxu0 %v5941_v52  ;;  %3396 = vmatprep.subr.bf16.mxu1 %v5943_v54  ;;  %v306_v51 = vld [vmem:[#allocation2 + $0x630] sm:$0xff]  ;;  %v303_v52 = vld [vmem:[#allocation2 + $0x618] sm:$0xff] }
 0x192   :  { %v307_v54 = vld [vmem:[#allocation2 + $0x638] sm:$0xff]  ;;  %v6005_v59 = vcombine.high %v302_v50, %v306_v51  ;;  %v6004_v1 = vcombine.low %v302_v50, %v306_v51 }
 0x193   :  { %3224 = vmatmul.mubr.bf16.vlgmr.msra.gmra.mrb[4].mxu0 %v7419_v12  ;;  %3388 = vmatmul.mubr.bf16.vlgmr.msra.gmra.mrb[4].mxu1 %v7419_v12  ;;  %v5958_v12 = vcombine.low %v255_v3, %v259_v4  ;;  %v6007_v60 = vcombine.high %v303_v52, %v307_v54  ;;  %v6006_v2 = vcombine.low %v303_v52, %v307_v54 }
 0x194   :  { %3233 = vmatpush1.bf16.msra.mxu0 %v5940_v61  ;;  %3397 = vmatpush1.bf16.msra.mxu1 %v5942_v62  ;;  %v310_v61 = vld [vmem:[#allocation2 + $0x650] sm:$0xff] }
 0x195   :  { %3234 = vmatprep.subr.bf16.mxu0 %v5949_v63  ;;  %3398 = vmatprep.subr.bf16.mxu1 %v5951_v0  ;;  %v314_v62 = vld [vmem:[#allocation2 + $0x670] sm:$0xff]  ;;  %v311_v63 = vld [vmem:[#allocation2 + $0x658] sm:$0xff] }
 0x196   :  { %3264 = vmatprep.mubr.bf16.mxu0 %v7428_v23  ;;  %3428 = vmatprep.mubr.bf16.mxu1 %v7428_v23  ;;  %v5975_v23 = vcombine.high %v271_v19, %v275_v20  ;;  %v315_v0 = vld [vmem:[#allocation2 + $0x678] sm:$0xff]  ;;  %v6013_v3 = vcombine.high %v310_v61, %v314_v62  ;;  %v6012_v9 = vcombine.low %v310_v61, %v314_v62 }
 0x197   :  { %v6015_v4 = vcombine.high %v311_v63, %v315_v0  ;;  %v6014_v10 = vcombine.low %v311_v63, %v315_v0 }
 0x198   :  { %3235 = vmatpush1.bf16.msra.mxu0 %v5948_v5  ;;  %3399 = vmatpush1.bf16.msra.mxu1 %v5950_v6  ;;  %v318_v5 = vld [vmem:[#allocation2 + $0x690] sm:$0xff] }
 0x199   :  { %3236 = vmatprep.subr.bf16.mxu0 %v5957_v7  ;;  %3400 = vmatprep.subr.bf16.mxu1 %v5959_v8  ;;  %v322_v6 = vld [vmem:[#allocation2 + $0x6b0] sm:$0xff]  ;;  %v319_v7 = vld [vmem:[#allocation2 + $0x698] sm:$0xff] }
 0x19a   :  { %v323_v8 = vld [vmem:[#allocation2 + $0x6b8] sm:$0xff]  ;;  %v6021_v11 = vcombine.high %v318_v5, %v322_v6  ;;  %v6020_v17 = vcombine.low %v318_v5, %v322_v6 }
 0x19b   :  { %v6023_v57 = vcombine.high %v319_v7, %v323_v8  ;;  %v6022_v18 = vcombine.low %v319_v7, %v323_v8 }
 0x19c   :  { %3237 = vmatpush1.bf16.msra.mxu0 %v5956_v13  ;;  %3401 = vmatpush1.bf16.msra.mxu1 %v5958_v12  ;;  %v326_v13 = vld [vmem:[#allocation2 + $0x6d0] sm:$0xff] }
 0x19d   :  { %3238 = vmatprep.subr.bf16.mxu0 %v5965_v14  ;;  %3402 = vmatprep.subr.bf16.mxu1 %v5967_v16  ;;  %v330_v12 = vld [vmem:[#allocation2 + $0x6f0] sm:$0xff]  ;;  %v327_v14 = vld [vmem:[#allocation2 + $0x6d8] sm:$0xff] }
 0x19e   :  { %v331_v16 = vld [vmem:[#allocation2 + $0x6f8] sm:$0xff]  ;;  %v6029_v19 = vcombine.high %v326_v13, %v330_v12  ;;  %v6028_v26 = vcombine.low %v326_v13, %v330_v12 }
 0x19f   :  { %v6031_v20 = vcombine.high %v327_v14, %v331_v16  ;;  %v6030_v27 = vcombine.low %v327_v14, %v331_v16 }
 0x1a0   :  { %3239 = vmatpush1.bf16.msra.mxu0 %v5964_v21  ;;  %3403 = vmatpush1.bf16.msra.mxu1 %v5966_v22  ;;  %v334_v21 = vld [vmem:[#allocation2 + $0x710] sm:$0xff] }
 0x1a1   :  { %3240 = vmatprep.subr.bf16.mxu0 %v5973_v53  ;;  %3404 = vmatprep.subr.bf16.mxu1 %v5975_v23  ;;  %v338_v22 = vld [vmem:[#allocation2 + $0x730] sm:$0xff]  ;;  %v335_v53 = vld [vmem:[#allocation2 + $0x718] sm:$0xff] }
 0x1a2   :  { %v339_v23 = vld [vmem:[#allocation2 + $0x738] sm:$0xff]  ;;  %v6037_v28 = vcombine.high %v334_v21, %v338_v22  ;;  %v6036_v15 = vcombine.low %v334_v21, %v338_v22 }
 0x1a3   :  { %v6039_v29 = vcombine.high %v335_v53, %v339_v23  ;;  %v6038_v35 = vcombine.low %v335_v53, %v339_v23  ;;  %v398_v23 = vld [vmem:[#allocation2 + $0x910] sm:$0xff] }
 0x1a4   :  { %3241 = vmatpush1.bf16.msra.mxu0 %v5972_v30  ;;  %3405 = vmatpush1.bf16.msra.mxu1 %v5974_v31  ;;  %v342_v30 = vld [vmem:[#allocation2 + $0x750] sm:$0xff] }
 0x1a5   :  { %3242 = vmatprep.subr.bf16.mxu0 %v5981_v32  ;;  %3406 = vmatprep.subr.bf16.mxu1 %v5983_v33  ;;  %v346_v31 = vld [vmem:[#allocation2 + $0x770] sm:$0xff]  ;;  %v343_v32 = vld [vmem:[#allocation2 + $0x758] sm:$0xff] }
 0x1a6   :  { %v347_v33 = vld [vmem:[#allocation2 + $0x778] sm:$0xff]  ;;  %v6045_v36 = vcombine.high %v342_v30, %v346_v31  ;;  %v6044_v43 = vcombine.low %v342_v30, %v346_v31 }
 0x1a7   :  { %v6047_v37 = vcombine.high %v343_v32, %v347_v33  ;;  %v6046_v44 = vcombine.low %v343_v32, %v347_v33  ;;  %v406_v32 = vld [vmem:[#allocation2 + $0x950] sm:$0xff] }
 0x1a8   :  { %3243 = vmatpush1.bf16.msra.mxu0 %v5980_v39  ;;  %3407 = vmatpush1.bf16.msra.mxu1 %v5982_v40  ;;  %v350_v39 = vld [vmem:[#allocation2 + $0x790] sm:$0xff] }
 0x1a9   :  { %3244 = vmatprep.subr.bf16.mxu0 %v5989_v41  ;;  %3408 = vmatprep.subr.bf16.mxu1 %v5991_v42  ;;  %v354_v40 = vld [vmem:[#allocation2 + $0x7b0] sm:$0xff]  ;;  %v351_v41 = vld [vmem:[#allocation2 + $0x798] sm:$0xff] }
 0x1aa   :  { %v355_v42 = vld [vmem:[#allocation2 + $0x7b8] sm:$0xff]  ;;  %v6053_v45 = vcombine.high %v350_v39, %v354_v40  ;;  %v6052_v50 = vcombine.low %v350_v39, %v354_v40  ;;  %v410_v33 = vld [vmem:[#allocation2 + $0x970] sm:$0xff] }
 0x1ab   :  { %v6055_v46 = vcombine.high %v351_v41, %v355_v42  ;;  %v6054_v51 = vcombine.low %v351_v41, %v355_v42  ;;  %v6109_v39 = vcombine.high %v406_v32, %v410_v33  ;;  %v414_v41 = vld [vmem:[#allocation2 + $0x990] sm:$0xff] }
 0x1ac   :  { %3245 = vmatpush1.bf16.msra.mxu0 %v5988_v47  ;;  %3409 = vmatpush1.bf16.msra.mxu1 %v5990_v24  ;;  %v358_v47 = vld [vmem:[#allocation2 + $0x7d0] sm:$0xff] }
 0x1ad   :  { %3246 = vmatprep.subr.bf16.mxu0 %v5997_v48  ;;  %3410 = vmatprep.subr.bf16.mxu1 %v5999_v49  ;;  %v362_v24 = vld [vmem:[#allocation2 + $0x7f0] sm:$0xff]  ;;  %v359_v48 = vld [vmem:[#allocation2 + $0x7d8] sm:$0xff] }
 0x1ae   :  { %v363_v49 = vld [vmem:[#allocation2 + $0x7f8] sm:$0xff]  ;;  %v6061_v52 = vcombine.high %v358_v47, %v362_v24  ;;  %v6060_v61 = vcombine.low %v358_v47, %v362_v24  ;;  %v418_v42 = vld [vmem:[#allocation2 + $0x9b0] sm:$0xff] }
 0x1af   :  { %v6063_v54 = vcombine.high %v359_v48, %v363_v49  ;;  %v6062_v62 = vcombine.low %v359_v48, %v363_v49  ;;  %v6117_v47 = vcombine.high %v414_v41, %v418_v42  ;;  %v422_v48 = vld [vmem:[#allocation2 + $0x9d0] sm:$0xff] }
 0x1b0   :  { %3247 = vmatpush1.bf16.msra.mxu0 %v5996_v56  ;;  %3411 = vmatpush1.bf16.msra.mxu1 %v5998_v58  ;;  %v366_v56 = vld [vmem:[#allocation2 + $0x810] sm:$0xff] }
 0x1b1   :  { %3248 = vmatprep.subr.bf16.mxu0 %v6005_v59  ;;  %3412 = vmatprep.subr.bf16.mxu1 %v6007_v60  ;;  %v370_v58 = vld [vmem:[#allocation2 + $0x830] sm:$0xff]  ;;  %v367_v59 = vld [vmem:[#allocation2 + $0x818] sm:$0xff] }
 0x1b2   :  { %v371_v60 = vld [vmem:[#allocation2 + $0x838] sm:$0xff]  ;;  %v6069_v63 = vcombine.high %v366_v56, %v370_v58  ;;  %v6068_v5 = vcombine.low %v366_v56, %v370_v58  ;;  %v426_v49 = vld [vmem:[#allocation2 + $0x9f0] sm:$0xff] }
 0x1b3   :  { %v6071_v0 = vcombine.high %v367_v59, %v371_v60  ;;  %v6070_v6 = vcombine.low %v367_v59, %v371_v60  ;;  %v6125_v56 = vcombine.high %v422_v48, %v426_v49  ;;  %v430_v59 = vld [vmem:[#allocation2 + $0xa10] sm:$0xff] }
 0x1b4   :  { %3249 = vmatpush1.bf16.msra.mxu0 %v6004_v1  ;;  %3413 = vmatpush1.bf16.msra.mxu1 %v6006_v2  ;;  %v374_v1 = vld [vmem:[#allocation2 + $0x850] sm:$0xff] }
 0x1b5   :  { %3250 = vmatprep.subr.bf16.mxu0 %v6013_v3  ;;  %3414 = vmatprep.subr.bf16.mxu1 %v6015_v4  ;;  %v378_v2 = vld [vmem:[#allocation2 + $0x870] sm:$0xff]  ;;  %v375_v3 = vld [vmem:[#allocation2 + $0x858] sm:$0xff] }
 0x1b6   :  { %v379_v4 = vld [vmem:[#allocation2 + $0x878] sm:$0xff]  ;;  %v6077_v7 = vcombine.high %v374_v1, %v378_v2  ;;  %v6076_v13 = vcombine.low %v374_v1, %v378_v2  ;;  %v434_v60 = vld [vmem:[#allocation2 + $0xa30] sm:$0xff] }
 0x1b7   :  { %v6079_v8 = vcombine.high %v375_v3, %v379_v4  ;;  %v6078_v12 = vcombine.low %v375_v3, %v379_v4  ;;  %v6133_v1 = vcombine.high %v430_v59, %v434_v60  ;;  %v438_v3 = vld [vmem:[#allocation2 + $0xa50] sm:$0xff] }
 0x1b8   :  { %3251 = vmatpush1.bf16.msra.mxu0 %v6012_v9  ;;  %3415 = vmatpush1.bf16.msra.mxu1 %v6014_v10  ;;  %v382_v9 = vld [vmem:[#allocation2 + $0x890] sm:$0xff] }
 0x1b9   :  { %3252 = vmatprep.subr.bf16.mxu0 %v6021_v11  ;;  %3416 = vmatprep.subr.bf16.mxu1 %v6023_v57  ;;  %v386_v10 = vld [vmem:[#allocation2 + $0x8b0] sm:$0xff]  ;;  %v383_v11 = vld [vmem:[#allocation2 + $0x898] sm:$0xff] }
 0x1ba   :  { %v387_v57 = vld [vmem:[#allocation2 + $0x8b8] sm:$0xff]  ;;  %v6085_v14 = vcombine.high %v382_v9, %v386_v10  ;;  %v6084_v21 = vcombine.low %v382_v9, %v386_v10  ;;  %v442_v4 = vld [vmem:[#allocation2 + $0xa70] sm:$0xff] }
 0x1bb   :  { %v6087_v16 = vcombine.high %v383_v11, %v387_v57  ;;  %v6141_v9 = vcombine.high %v438_v3, %v442_v4 }
 0x1bc   :  { %3253 = vmatpush1.bf16.msra.mxu0 %v6020_v17  ;;  %3417 = vmatpush1.bf16.msra.mxu1 %v6022_v18  ;;  %v390_v17 = vld [vmem:[#allocation2 + $0x8d0] sm:$0xff] }
 0x1bd   :  { %3254 = vmatprep.subr.bf16.mxu0 %v6029_v19  ;;  %3418 = vmatprep.subr.bf16.mxu1 %v6031_v20  ;;  %v394_v18 = vld [vmem:[#allocation2 + $0x8f0] sm:$0xff]  ;;  %v391_v19 = vld [vmem:[#allocation2 + $0x8d8] sm:$0xff] }
 0x1be   :  { %v395_v20 = vld [vmem:[#allocation2 + $0x8f8] sm:$0xff]  ;;  %v6093_v22 = vcombine.high %v390_v17, %v394_v18 }
 0x1bf   :  { %v6095_v53 = vcombine.high %v391_v19, %v395_v20  ;;  %v6094_v30 = vcombine.low %v391_v19, %v395_v20  ;;  %v454_v19 = vld [vmem:[#allocation2 + $0xad0] sm:$0xff] }
 0x1c0   :  { %3255 = vmatpush1.bf16.msra.mxu0 %v6028_v26  ;;  %3419 = vmatpush1.bf16.msra.mxu1 %v6030_v27  ;;  %v402_v26 = vld [vmem:[#allocation2 + $0x930] sm:$0xff]  ;;  %v399_v27 = vld [vmem:[#allocation2 + $0x918] sm:$0xff] }
 0x1c1   :  { %3256 = vmatprep.subr.bf16.mxu0 %v6037_v28  ;;  %3420 = vmatprep.subr.bf16.mxu1 %v6039_v29  ;;  %v403_v28 = vld [vmem:[#allocation2 + $0x938] sm:$0xff]  ;;  %v6092_v29 = vcombine.low %v390_v17, %v394_v18  ;;  %v6101_v31 = vcombine.high %v398_v23, %v402_v26  ;;  %v458_v20 = vld [vmem:[#allocation2 + $0xaf0] sm:$0xff] }
 0x1c4   :  { %3257 = vmatpush1.bf16.msra.mxu0 %v6036_v15  ;;  %3421 = vmatpush1.bf16.msra.mxu1 %v6038_v35  ;;  %v407_v15 = vld [vmem:[#allocation2 + $0x958] sm:$0xff] }
 0x1c5   :  { %3258 = vmatprep.subr.bf16.mxu0 %v6045_v36  ;;  %3422 = vmatprep.subr.bf16.mxu1 %v6047_v37  ;;  %v411_v35 = vld [vmem:[#allocation2 + $0x978] sm:$0xff]  ;;  %v6100_v36 = vcombine.low %v398_v23, %v402_v26  ;;  %v6102_v37 = vcombine.low %v399_v27, %v403_v28  ;;  %v6157_v23 = vcombine.high %v454_v19, %v458_v20 }
 0x1c6   :  { %v6111_v40 = vcombine.high %v407_v15, %v411_v35 }
 0x1c8   :  { %3259 = vmatpush1.bf16.msra.mxu0 %v6044_v43  ;;  %3423 = vmatpush1.bf16.msra.mxu1 %v6046_v44  ;;  %v415_v43 = vld [vmem:[#allocation2 + $0x998] sm:$0xff] }
 0x1c9   :  { %3260 = vmatprep.subr.bf16.mxu0 %v6053_v45  ;;  %3424 = vmatprep.subr.bf16.mxu1 %v6055_v46  ;;  %v419_v44 = vld [vmem:[#allocation2 + $0x9b8] sm:$0xff]  ;;  %v6108_v45 = vcombine.low %v406_v32, %v410_v33  ;;  %v6110_v46 = vcombine.low %v407_v15, %v411_v35  ;;  %v470_v15 = vld [vmem:[#allocation2 + $0xb50] sm:$0xff] }
 0x1ca   :  { %v6119_v24 = vcombine.high %v415_v43, %v419_v44  ;;  %v474_v35 = vld [vmem:[#allocation2 + $0xb70] sm:$0xff] }
 0x1cc   :  { %3261 = vmatpush1.bf16.msra.mxu0 %v6052_v50  ;;  %3425 = vmatpush1.bf16.msra.mxu1 %v6054_v51  ;;  %v423_v50 = vld [vmem:[#allocation2 + $0x9d8] sm:$0xff] }
 0x1cd   :  { %3262 = vmatprep.subr.bf16.mxu0 %v6061_v52  ;;  %3426 = vmatprep.subr.bf16.mxu1 %v6063_v54  ;;  %v427_v51 = vld [vmem:[#allocation2 + $0x9f8] sm:$0xff]  ;;  %v6116_v52 = vcombine.low %v414_v41, %v418_v42  ;;  %v6118_v54 = vcombine.low %v415_v43, %v419_v44  ;;  %v6173_v41 = vcombine.high %v470_v15, %v474_v35  ;;  %v478_v43 = vld [vmem:[#allocation2 + $0xb90] sm:$0xff] }
 0x1ce   :  { %v6127_v58 = vcombine.high %v423_v50, %v427_v51  ;;  %v482_v44 = vld [vmem:[#allocation2 + $0xbb0] sm:$0xff] }
 0x1d0   :  { %3263 = vmatpush1.bf16.msra.mxu0 %v6060_v61  ;;  %3427 = vmatpush1.bf16.msra.mxu1 %v6062_v62  ;;  %v431_v61 = vld [vmem:[#allocation2 + $0xa18] sm:$0xff] }
 0x1d1   :  { %3273 = vmatprep.subr.bf16.mxu0 %v6069_v63  ;;  %3437 = vmatprep.subr.bf16.mxu1 %v6071_v0  ;;  %v435_v62 = vld [vmem:[#allocation2 + $0xa38] sm:$0xff]  ;;  %v6124_v63 = vcombine.low %v422_v48, %v426_v49  ;;  %v6126_v0 = vcombine.low %v423_v50, %v427_v51  ;;  %v6181_v48 = vcombine.high %v478_v43, %v482_v44  ;;  %v486_v50 = vld [vmem:[#allocation2 + $0xbd0] sm:$0xff] }
 0x1d2   :  { %v6135_v2 = vcombine.high %v431_v61, %v435_v62  ;;  %v490_v51 = vld [vmem:[#allocation2 + $0xbf0] sm:$0xff] }
 0x1d3   :  { %3265 = vmatmul.mubr.bf16.vlgmr.msra.gmra.mrb[4].mxu0 %v7441_v25  ;;  %3429 = vmatmul.mubr.bf16.vlgmr.msra.gmra.mrb[4].mxu1 %v7441_v25  ;;  %v6086_v25 = vcombine.low %v383_v11, %v387_v57  ;;  %v446_v11 = vld [vmem:[#allocation2 + $0xa90] sm:$0xff] }
 0x1d4   :  { %3274 = vmatpush1.bf16.msra.mxu0 %v6068_v5  ;;  %3438 = vmatpush1.bf16.msra.mxu1 %v6070_v6  ;;  %v439_v5 = vld [vmem:[#allocation2 + $0xa58] sm:$0xff]  ;;  %v450_v57 = vld [vmem:[#allocation2 + $0xab0] sm:$0xff] }
 0x1d5   :  { %3275 = vmatprep.subr.bf16.mxu0 %v6077_v7  ;;  %3439 = vmatprep.subr.bf16.mxu1 %v6079_v8  ;;  %v443_v6 = vld [vmem:[#allocation2 + $0xa78] sm:$0xff]  ;;  %v6132_v7 = vcombine.low %v430_v59, %v434_v60  ;;  %v6134_v8 = vcombine.low %v431_v61, %v435_v62  ;;  %v6149_v17 = vcombine.high %v446_v11, %v450_v57  ;;  %v494_v61 = vld [vmem:[#allocation2 + $0xc10] sm:$0xff] }
 0x1d6   :  { %3305 = vmatprep.mubr.bf16.mxu0 %v7445_v34  ;;  %3469 = vmatprep.mubr.bf16.mxu1 %v7445_v34  ;;  %v6103_v34 = vcombine.high %v399_v27, %v403_v28  ;;  %v6143_v10 = vcombine.high %v439_v5, %v443_v6  ;;  %v462_v27 = vld [vmem:[#allocation2 + $0xb10] sm:$0xff]  ;;  %v6189_v59 = vcombine.high %v486_v50, %v490_v51 }
 0x1d7   :  { %v466_v28 = vld [vmem:[#allocation2 + $0xb30] sm:$0xff] }
 0x1d8   :  { %3276 = vmatpush1.bf16.msra.mxu0 %v6076_v13  ;;  %3440 = vmatpush1.bf16.msra.mxu1 %v6078_v12  ;;  %v447_v13 = vld [vmem:[#allocation2 + $0xa98] sm:$0xff]  ;;  %v6165_v32 = vcombine.high %v462_v27, %v466_v28  ;;  %v498_v62 = vld [vmem:[#allocation2 + $0xc30] sm:$0xff] }
 0x1d9   :  { %3277 = vmatprep.subr.bf16.mxu0 %v6085_v14  ;;  %3441 = vmatprep.subr.bf16.mxu1 %v6087_v16  ;;  %v451_v12 = vld [vmem:[#allocation2 + $0xab8] sm:$0xff]  ;;  %v6140_v14 = vcombine.low %v438_v3, %v442_v4  ;;  %v6142_v16 = vcombine.low %v439_v5, %v443_v6  ;;  %v6197_v3 = vcombine.high %v494_v61, %v498_v62  ;;  %v502_v5 = vld [vmem:[#allocation2 + $0xc50] sm:$0xff] }
 0x1da   :  { %v6151_v18 = vcombine.high %v447_v13, %v451_v12  ;;  %v506_v6 = vld [vmem:[#allocation2 + $0xc70] sm:$0xff] }
 0x1dc   :  { %3278 = vmatpush1.bf16.msra.mxu0 %v6084_v21  ;;  %3442 = vmatpush1.bf16.msra.mxu1 %v6086_v25  ;;  %v455_v21 = vld [vmem:[#allocation2 + $0xad8] sm:$0xff] }
 0x1dd   :  { %3279 = vmatprep.subr.bf16.mxu0 %v6093_v22  ;;  %3443 = vmatprep.subr.bf16.mxu1 %v6095_v53  ;;  %v459_v25 = vld [vmem:[#allocation2 + $0xaf8] sm:$0xff]  ;;  %v6148_v22 = vcombine.low %v446_v11, %v450_v57  ;;  %v6150_v53 = vcombine.low %v447_v13, %v451_v12  ;;  %v6205_v11 = vcombine.high %v502_v5, %v506_v6  ;;  %v510_v13 = vld [vmem:[#allocation2 + $0xc90] sm:$0xff] }
 0x1de   :  { %v6159_v26 = vcombine.high %v455_v21, %v459_v25  ;;  %v514_v12 = vld [vmem:[#allocation2 + $0xcb0] sm:$0xff] }
 0x1e0   :  { %3280 = vmatpush1.bf16.msra.mxu0 %v6092_v29  ;;  %3444 = vmatpush1.bf16.msra.mxu1 %v6094_v30  ;;  %v463_v29 = vld [vmem:[#allocation2 + $0xb18] sm:$0xff] }
 0x1e1   :  { %3281 = vmatprep.subr.bf16.mxu0 %v6101_v31  ;;  %3445 = vmatprep.subr.bf16.mxu1 %v6103_v34  ;;  %v467_v30 = vld [vmem:[#allocation2 + $0xb38] sm:$0xff]  ;;  %v6156_v31 = vcombine.low %v454_v19, %v458_v20  ;;  %v6158_v34 = vcombine.low %v455_v21, %v459_v25  ;;  %v6213_v19 = vcombine.high %v510_v13, %v514_v12  ;;  %v518_v21 = vld [vmem:[#allocation2 + $0xcd0] sm:$0xff] }
 0x1e2   :  { %v6167_v33 = vcombine.high %v463_v29, %v467_v30  ;;  %v522_v25 = vld [vmem:[#allocation2 + $0xcf0] sm:$0xff] }
 0x1e4   :  { %3282 = vmatpush1.bf16.msra.mxu0 %v6100_v36  ;;  %3446 = vmatpush1.bf16.msra.mxu1 %v6102_v37  ;;  %v471_v36 = vld [vmem:[#allocation2 + $0xb58] sm:$0xff] }
 0x1e5   :  { %3283 = vmatprep.subr.bf16.mxu0 %v6109_v39  ;;  %3447 = vmatprep.subr.bf16.mxu1 %v6111_v40  ;;  %v475_v37 = vld [vmem:[#allocation2 + $0xb78] sm:$0xff]  ;;  %v6164_v39 = vcombine.low %v462_v27, %v466_v28  ;;  %v6166_v40 = vcombine.low %v463_v29, %v467_v30  ;;  %v526_v28 = vld [vmem:[#allocation2 + $0xd10] sm:$0xff] }
 0x1e6   :  { %v6175_v42 = vcombine.high %v471_v36, %v475_v37  ;;  %v530_v29 = vld [vmem:[#allocation2 + $0xd30] sm:$0xff]  ;;  %v527_v30 = vld [vmem:[#allocation2 + $0xd18] sm:$0xff] }
 0x1e8   :  { %3284 = vmatpush1.bf16.msra.mxu0 %v6108_v45  ;;  %3448 = vmatpush1.bf16.msra.mxu1 %v6110_v46  ;;  %v479_v45 = vld [vmem:[#allocation2 + $0xb98] sm:$0xff] }
 0x1e9   :  { %3285 = vmatprep.subr.bf16.mxu0 %v6117_v47  ;;  %3449 = vmatprep.subr.bf16.mxu1 %v6119_v24  ;;  %v483_v46 = vld [vmem:[#allocation2 + $0xbb8] sm:$0xff]  ;;  %v6172_v47 = vcombine.low %v470_v15, %v474_v35  ;;  %v6174_v24 = vcombine.low %v471_v36, %v475_v37  ;;  %v6229_v15 = vcombine.high %v526_v28, %v530_v29  ;;  %v534_v35 = vld [vmem:[#allocation2 + $0xd50] sm:$0xff] }
 0x1ea   :  { %v6183_v49 = vcombine.high %v479_v45, %v483_v46  ;;  %v538_v36 = vld [vmem:[#allocation2 + $0xd70] sm:$0xff] }
 0x1ec   :  { %3286 = vmatpush1.bf16.msra.mxu0 %v6116_v52  ;;  %3450 = vmatpush1.bf16.msra.mxu1 %v6118_v54  ;;  %v487_v52 = vld [vmem:[#allocation2 + $0xbd8] sm:$0xff] }
 0x1ed   :  { %3287 = vmatprep.subr.bf16.mxu0 %v6125_v56  ;;  %3451 = vmatprep.subr.bf16.mxu1 %v6127_v58  ;;  %v491_v54 = vld [vmem:[#allocation2 + $0xbf8] sm:$0xff]  ;;  %v6180_v56 = vcombine.low %v478_v43, %v482_v44  ;;  %v6182_v58 = vcombine.low %v479_v45, %v483_v46  ;;  %v6237_v43 = vcombine.high %v534_v35, %v538_v36  ;;  %v542_v45 = vld [vmem:[#allocation2 + $0xd90] sm:$0xff] }
 0x1ee   :  { %v6191_v60 = vcombine.high %v487_v52, %v491_v54  ;;  %v546_v46 = vld [vmem:[#allocation2 + $0xdb0] sm:$0xff] }
 0x1f0   :  { %3288 = vmatpush1.bf16.msra.mxu0 %v6124_v63  ;;  %3452 = vmatpush1.bf16.msra.mxu1 %v6126_v0  ;;  %v495_v63 = vld [vmem:[#allocation2 + $0xc18] sm:$0xff] }
 0x1f1   :  { %3289 = vmatprep.subr.bf16.mxu0 %v6133_v1  ;;  %3453 = vmatprep.subr.bf16.mxu1 %v6135_v2  ;;  %v499_v0 = vld [vmem:[#allocation2 + $0xc38] sm:$0xff]  ;;  %v6188_v1 = vcombine.low %v486_v50, %v490_v51  ;;  %v6190_v2 = vcombine.low %v487_v52, %v491_v54  ;;  %v6236_v50 = vcombine.low %v534_v35, %v538_v36  ;;  %v6727_v36 = vld [vmem:[#allocation7 + $0xa8] ss:$16 sps:$4 sm:$0xff]  }
 0x1f2   :  { %v6199_v4 = vcombine.high %v495_v63, %v499_v0  ;;  %v6245_v52 = vcombine.high %v542_v45, %v546_v46  ;;  %v6724_v35 = vld [vmem:[#allocation7 + $0xa0] ss:$16 sps:$4 sm:$0xff]  }
 0x1f4   :  { %3290 = vmatpush1.bf16.msra.mxu0 %v6132_v7  ;;  %3454 = vmatpush1.bf16.msra.mxu1 %v6134_v8  ;;  %v503_v7 = vld [vmem:[#allocation2 + $0xc58] sm:$0xff] }
 0x1f5   :  { %3291 = vmatprep.subr.bf16.mxu0 %v6141_v9  ;;  %3455 = vmatprep.subr.bf16.mxu1 %v6143_v10  ;;  %v507_v8 = vld [vmem:[#allocation2 + $0xc78] sm:$0xff]  ;;  %v6196_v9 = vcombine.low %v494_v61, %v498_v62  ;;  %v6198_v10 = vcombine.low %v495_v63, %v499_v0 }
 0x1f6   :  { %v6207_v57 = vcombine.high %v503_v7, %v507_v8  ;;  %v551_v63 = vld [vmem:[#allocation2 + $0xdd8] sm:$0xff] }
 0x1f7   :  { %v555_v0 = vld [vmem:[#allocation2 + $0xdf8] sm:$0xff] }
 0x1f8   :  { %3292 = vmatpush1.bf16.msra.mxu0 %v6140_v14  ;;  %3456 = vmatpush1.bf16.msra.mxu1 %v6142_v16  ;;  %v511_v14 = vld [vmem:[#allocation2 + $0xc98] sm:$0xff] }
 0x1f9   :  { %3293 = vmatprep.subr.bf16.mxu0 %v6149_v17  ;;  %3457 = vmatprep.subr.bf16.mxu1 %v6151_v18  ;;  %v515_v16 = vld [vmem:[#allocation2 + $0xcb8] sm:$0xff]  ;;  %v6204_v17 = vcombine.low %v502_v5, %v506_v6  ;;  %v6206_v18 = vcombine.low %v503_v7, %v507_v8 }
 0x1fa   :  { %v6215_v20 = vcombine.high %v511_v14, %v515_v16 }
 0x1fc   :  { %3294 = vmatpush1.bf16.msra.mxu0 %v6148_v22  ;;  %3458 = vmatpush1.bf16.msra.mxu1 %v6150_v53  ;;  %v519_v22 = vld [vmem:[#allocation2 + $0xcd8] sm:$0xff] }
 0x1fd   :  { %3295 = vmatprep.subr.bf16.mxu0 %v6157_v23  ;;  %3459 = vmatprep.subr.bf16.mxu1 %v6159_v26  ;;  %v523_v53 = vld [vmem:[#allocation2 + $0xcf8] sm:$0xff]  ;;  %v6212_v23 = vcombine.low %v510_v13, %v514_v12  ;;  %v6221_v26 = vcombine.high %v518_v21, %v522_v25  ;;  %v6699_v12 = vld [vmem:[#allocation7 + $0xc] ss:$16 sps:$4 sm:$0xff]  }
 0x1fe   :  { %v6223_v27 = vcombine.high %v519_v22, %v523_v53  ;;  %v6696_v13 = vld [vmem:[#allocation7 + $0x4] ss:$16 sps:$4 sm:$0xff]  }
 0x200   :  { %3296 = vmatpush1.bf16.msra.mxu0 %v6156_v31  ;;  %3460 = vmatpush1.bf16.msra.mxu1 %v6158_v34  ;;  %v531_v31 = vld [vmem:[#allocation2 + $0xd38] sm:$0xff]  ;;  %v558_v34 = vlaneseq }
 0x201   :  { %3297 = vmatprep.subr.bf16.mxu0 %v6165_v32  ;;  %3461 = vmatprep.subr.bf16.mxu1 %v6167_v33  ;;  %v6220_v32 = vcombine.low %v518_v21, %v522_v25  ;;  %v6222_v33 = vcombine.low %v519_v22, %v523_v53  ;;  %v6705_v21 = vld [vmem:[#allocation7 + $0x2c] ss:$16 sps:$4 sm:$0xff]   ;;  %v6700_v25 = vld [vmem:[#allocation7 + $0x20] ss:$16 sps:$4 sm:$0xff]   ;;  %v6703_v22 = vld [vmem:[#allocation7 + $0x28] ss:$16 sps:$4 sm:$0xff]  }
 0x202   :  { %v7476_v37 = vshrl.u32 %v558_v34, 7  ;;  %v6708_v53 = vld [vmem:[#allocation7 + $0x44] ss:$16 sps:$4 sm:$0xff]   ;;  %v6723_v34 = vld [vmem:[#allocation7 + $0x8c] ss:$16 sps:$4 sm:$0xff]  }
 0x204   :  { %3298 = vmatpush1.bf16.msra.mxu0 %v6164_v39  ;;  %3462 = vmatpush1.bf16.msra.mxu1 %v6166_v40  ;;  %v535_v39 = vld [vmem:[#allocation2 + $0xd58] sm:$0xff] }
 0x205   :  { %3299 = vmatprep.subr.bf16.mxu0 %v6173_v41  ;;  %3463 = vmatprep.subr.bf16.mxu1 %v6175_v42  ;;  %v539_v40 = vld [vmem:[#allocation2 + $0xd78] sm:$0xff]  ;;  %v6228_v41 = vcombine.low %v526_v28, %v530_v29  ;;  %v6230_v42 = vcombine.low %v527_v30, %v531_v31  ;;  %v6717_v28 = vld [vmem:[#allocation7 + $0x6c] ss:$16 sps:$4 sm:$0xff]  }
 0x206   :  { %v6239_v44 = vcombine.high %v535_v39, %v539_v40  ;;  %v6238_v51 = vcombine.low %v535_v39, %v539_v40  ;;  %v6712_v29 = vld [vmem:[#allocation7 + $0x60] ss:$16 sps:$4 sm:$0xff]   ;;  %v6732_v39 = vld [vmem:[#allocation7 + $0xc4] ss:$16 sps:$4 sm:$0xff]   ;;  %v6735_v40 = vld [vmem:[#allocation7 + $0xcc] ss:$16 sps:$4 sm:$0xff]  }
 0x208   :  { %3300 = vmatpush1.bf16.msra.mxu0 %v6172_v47  ;;  %3464 = vmatpush1.bf16.msra.mxu1 %v6174_v24  ;;  %v564_v47 = vsub.s32 1, %v7476_v37  ;;  %v543_v24 = vld [vmem:[#allocation2 + $0xd98] sm:$0xff] }
 0x209   :  { %3301 = vmatprep.subr.bf16.mxu0 %v6181_v48  ;;  %3465 = vmatprep.subr.bf16.mxu1 %v6183_v49  ;;  %v547_v48 = vld [vmem:[#allocation2 + $0xdb8] sm:$0xff]  ;;  %v7479_v49 = vld [vmem:[#allocation5] sm:$0xff] }
 0x20a   :  { %v565_v61 = vrot.slane %v7479_v49, %v564_v47  ;;  %v6246_v6 = vcombine.low %v543_v24, %v547_v48 }
 0x20c   :  { %3302 = vmatpush1.bf16.msra.mxu0 %v6180_v56  ;;  %3466 = vmatpush1.bf16.msra.mxu1 %v6182_v58  ;;  %v6247_v56 = vcombine.high %v543_v24, %v547_v48  ;;  %v550_v58 = vld [vmem:[#allocation2 + $0xdd0] sm:$0xff]  ;;  %v6744_v24 = vld [vmem:[#allocation7 + $0x104] ss:$16 sps:$4 sm:$0xff]  }
 0x20d   :  { %3303 = vmatprep.subr.bf16.mxu0 %v6189_v59  ;;  %3467 = vmatprep.subr.bf16.mxu1 %v6191_v60  ;;  %v554_v59 = vld [vmem:[#allocation2 + $0xdf0] sm:$0xff] }
 0x20e   :  { %v6253_v7 = vcombine.high %v550_v58, %v554_v59  ;;  %v6747_v48 = vld [vmem:[#allocation7 + $0x10c] ss:$16 sps:$4 sm:$0xff]  }
 0x210   :  { %3304 = vmatpush1.bf16.msra.mxu0 %v6188_v1  ;;  %3468 = vmatpush1.bf16.msra.mxu1 %v6190_v2 }
 0x211   :  { %3314 = vmatprep.subr.bf16.mxu0 %v6197_v3  ;;  %3478 = vmatprep.subr.bf16.mxu1 %v6199_v4  ;;  %v6244_v3 = vcombine.low %v542_v45, %v546_v46  ;;  %v6736_v45 = vld [vmem:[#allocation7 + $0xe0] ss:$16 sps:$4 sm:$0xff]   ;;  %v6739_v46 = vld [vmem:[#allocation7 + $0xe8] ss:$16 sps:$4 sm:$0xff]  }
 0x213   :  { %3306 = vmatmul.mubr.bf16.vlgmr.msra.gmra.mrb[4].mxu0 %v7453_v38  ;;  %3470 = vmatmul.mubr.bf16.vlgmr.msra.gmra.mrb[4].mxu1 %v7453_v38  ;;  %v6214_v38 = vcombine.low %v511_v14, %v515_v16  ;;  %v6694_v16 = vld [vmem:[#allocation7] ss:$16 sps:$4 sm:$0xff]  }
 0x214   :  { %3315 = vmatpush1.bf16.msra.mxu0 %v6196_v9  ;;  %3479 = vmatpush1.bf16.msra.mxu1 %v6198_v10  ;;  %v6255_v9 = vcombine.high %v551_v63, %v555_v0 }
 0x215   :  { %3316 = vmatprep.subr.bf16.mxu0 %v6205_v11  ;;  %3480 = vmatprep.subr.bf16.mxu1 %v6207_v57  ;;  %v6252_v11 = vcombine.low %v550_v58, %v554_v59  ;;  %v6254_v57 = vcombine.low %v551_v63, %v555_v0  ;;  %v6748_v58 = vld [vmem:[#allocation7 + $0x120] ss:$16 sps:$4 sm:$0xff]   ;;  %v6751_v59 = vld [vmem:[#allocation7 + $0x128] ss:$16 sps:$4 sm:$0xff]  }
 0x216   :  { %3346 = vmatprep.mubr.bf16.mxu0 %v7292_v55  ;;  %3510 = vmatprep.mubr.bf16.mxu1 %v7292_v55  ;;  %v6231_v55 = vcombine.high %v527_v30, %v531_v31  ;;  %v6715_v30 = vld [vmem:[#allocation7 + $0x68] ss:$16 sps:$4 sm:$0xff]   ;;  %v6720_v31 = vld [vmem:[#allocation7 + $0x84] ss:$16 sps:$4 sm:$0xff]   ;;  %v6754_v63 = vld [vmem:[#allocation7 + $0x140] ss:$16 sps:$4 sm:$0xff]  }
 0x217   :  { %v6757_v0 = vld [vmem:[#allocation7 + $0x148] ss:$16 sps:$4 sm:$0xff]  }
 0x218   :  { %3317 = vmatpush1.bf16.msra.mxu0 %v6204_v17  ;;  %3481 = vmatpush1.bf16.msra.mxu1 %v6206_v18  ;;  %v6697_v17 = vld [vmem:[#allocation7 + $0x8] ss:$16 sps:$4 sm:$0xff]   ;;  %v6702_v18 = vld [vmem:[#allocation7 + $0x24] ss:$16 sps:$4 sm:$0xff]  }
 0x219   :  { %3318 = vmatprep.subr.bf16.mxu0 %v6213_v19  ;;  %3482 = vmatprep.subr.bf16.mxu1 %v6215_v20  ;;  %v7114_v20 = vld [vmem:[%s7538_s0 + $0x18] ss:$0 sps:$4 sm:$0xff]   ;;  %s7293_s0 = smov [#allocation13]  }
 0x21a   :  { %s5789_s4 = sshll.u32 %s7293_s0, 4  ;;  %s5790_s4 = int_to_ptr.vmem [resolvable:$true] %s5789_s4 }
 0x21b   :  { %s7248_s27 = scalar_lea.vmem %s5790_s4, 128  ;;  %p7253_p7 = scmp.lt.s32.totalorder %s5790_s4, %s5790_s4 }
 0x21c   :  { %3319 = vmatpush1.bf16.msra.mxu0 %v6212_v23  ;;  %3483 = vmatpush1.bf16.msra.mxu1 %v6214_v38  ;;  %v6711_v23 = vld [vmem:[#allocation7 + $0x4c] ss:$16 sps:$4 sm:$0xff]   ;;  %v6706_v38 = vld [vmem:[#allocation7 + $0x40] ss:$16 sps:$4 sm:$0xff]   ;;  %p7249_p6 = scmp.ne.s32.totalorder %s5790_s4, %s7248_s27  ;;  %p7254_p8 = scmp.lt.s32.totalorder %s7248_s27, %s7248_s27 }
 0x21d   :  { %3320 = vmatprep.subr.bf16.mxu0 %v6221_v26  ;;  %3484 = vmatprep.subr.bf16.mxu1 %v6223_v27  ;;  %v6709_v26 = vld [vmem:[#allocation7 + $0x48] ss:$16 sps:$4 sm:$0xff]   ;;  %v6714_v27 = vld [vmem:[#allocation7 + $0x64] ss:$16 sps:$4 sm:$0xff]  }
 0x21e   :  { %p7255_p9 = por %p7254_p8, %p7253_p7 }
 0x220   :  { %3321 = vmatpush1.bf16.msra.mxu0 %v6220_v32  ;;  %3485 = vmatpush1.bf16.msra.mxu1 %v6222_v33  ;;  %v6718_v32 = vld [vmem:[#allocation7 + $0x80] ss:$16 sps:$4 sm:$0xff]   ;;  %v6721_v33 = vld [vmem:[#allocation7 + $0x88] ss:$16 sps:$4 sm:$0xff]   ;;  %p7256_p10 = pnand %p7255_p9, %p7249_p6 }
 0x221   :  { %3322 = vmatprep.subr.bf16.mxu0 %v6229_v15  ;;  %3486 = vmatprep.subr.bf16.mxu1 %v6231_v55  ;;  %v6726_v15 = vld [vmem:[#allocation7 + $0xa4] ss:$16 sps:$4 sm:$0xff]   ;;  %v6729_v55 = vld [vmem:[#allocation7 + $0xac] ss:$16 sps:$4 sm:$0xff]  }
 0x224   :  { %3323 = vmatpush1.bf16.msra.mxu0 %v6228_v41  ;;  %3487 = vmatpush1.bf16.msra.mxu1 %v6230_v42  ;;  %v6730_v41 = vld [vmem:[#allocation7 + $0xc0] ss:$16 sps:$4 sm:$0xff]   ;;  %v6733_v42 = vld [vmem:[#allocation7 + $0xc8] ss:$16 sps:$4 sm:$0xff]  }
 0x225   :  { %3324 = vmatprep.subr.bf16.mxu0 %v6237_v43  ;;  %3488 = vmatprep.subr.bf16.mxu1 %v6239_v44  ;;  %v6738_v43 = vld [vmem:[#allocation7 + $0xe4] ss:$16 sps:$4 sm:$0xff]   ;;  %v6741_v44 = vld [vmem:[#allocation7 + $0xec] ss:$16 sps:$4 sm:$0xff]  }
 0x226   :  { %v7481_v54 = vpop.f32.mrb[0].mxu0  ;;  %v7483_v60 = vpop.f32.mrb[0].mxu1 }
 0x227   :  { %v3022_v62 = vpop.f32.mrb[1].mxu0  ;;  %v7488_v1 = vpop.f32.mrb[1].mxu1 }
 0x228   :  { %v3024_v2 = vpop.f32.mrb[2].mxu0  ;;  %3325 = vmatpush1.bf16.msra.mxu0 %v6236_v50  ;;  %v3188_v4 = vpop.f32.mrb[2].mxu1  ;;  %3489 = vmatpush1.bf16.msra.mxu1 %v6238_v51  ;;  %v6590_v10 = vadd.f32 %v3022_v62, %v565_v61  ;;  %v6742_v50 = vld [vmem:[#allocation7 + $0x100] ss:$16 sps:$4 sm:$0xff]   ;;  %v6745_v51 = vld [vmem:[#allocation7 + $0x108] ss:$16 sps:$4 sm:$0xff]  }
 0x229   :  { %v3025_v5 = vpop.f32.mrb[3].mxu0  ;;  %3326 = vmatprep.subr.bf16.mxu0 %v6245_v52  ;;  %v3189_v8 = vpop.f32.mrb[3].mxu1  ;;  %3490 = vmatprep.subr.bf16.mxu1 %v6247_v56  ;;  %v6750_v52 = vld [vmem:[#allocation7 + $0x124] ss:$16 sps:$4 sm:$0xff]   ;;  %v6753_v56 = vld [vmem:[#allocation7 + $0x12c] ss:$16 sps:$4 sm:$0xff]  }
 0x22a   :  { %v3520_v14 = vmax.f32 %v6590_v10, 0.0  ;;  %v6756_v61 = vld [vmem:[#allocation7 + $0x144] ss:$16 sps:$4 sm:$0xff]   ;;  %v6759_v62 = vld [vmem:[#allocation7 + $0x14c] ss:$16 sps:$4 sm:$0xff]  }
 0x22b   :  { %v6762_v2 = vld [vmem:[#allocation7 + $0x164] ss:$16 sps:$4 sm:$0xff]   ;;  %v6760_v4 = vld [vmem:[#allocation7 + $0x160] ss:$16 sps:$4 sm:$0xff]   ;;  %v6763_v5 = vld [vmem:[#allocation7 + $0x168] ss:$16 sps:$4 sm:$0xff]  }
 0x22c   :  { %3327 = vmatpush1.bf16.msra.mxu0 %v6244_v3  ;;  %3491 = vmatpush1.bf16.msra.mxu1 %v6246_v6  ;;  %v3528_v19 = vpack.c.bf16 %v3520_v14, %v3520_v14  ;;  %v6765_v3 = vld [vmem:[#allocation7 + $0x16c] ss:$16 sps:$4 sm:$0xff]   ;;  %v6768_v6 = vld [vmem:[#allocation7 + $0x184] ss:$16 sps:$4 sm:$0xff]   ;;  %v6766_v8 = vld [vmem:[#allocation7 + $0x180] ss:$16 sps:$4 sm:$0xff]  }
 0x22d   :  { %3328 = vmatprep.subr.bf16.mxu0 %v6253_v7  ;;  %3492 = vmatprep.subr.bf16.mxu1 %v6255_v9  ;;  %v6771_v7 = vld [vmem:[#allocation7 + $0x18c] ss:$16 sps:$4 sm:$0xff]   ;;  %v560_v9 = vsub.s32 0, %v7476_v37  ;;  %v6769_v10 = vld [vmem:[#allocation7 + $0x188] ss:$16 sps:$4 sm:$0xff]  }
 0x22f   :  { %v561_v14 = vrot.slane %v7479_v49, %v560_v9 }
 0x230   :  { %3329 = vmatpush1.bf16.msra.mxu0 %v6252_v11  ;;  %3493 = vmatpush1.bf16.msra.mxu1 %v6254_v57  ;;  %v6774_v11 = vld [vmem:[#allocation7 + $0x1a4] ss:$16 sps:$4 sm:$0xff]   ;;  %v6777_v57 = vld [vmem:[#allocation7 + $0x1ac] ss:$16 sps:$4 sm:$0xff]  }
 0x231   :  { %5093 = vmatprep.subr.bf16.mxu0 %v6696_v13  ;;  %5257 = vmatprep.subr.bf16.mxu1 %v6699_v12  ;;  %v572_v13 = vsub.s32 3, %v7476_v37  ;;  %v6772_v12 = vld [vmem:[#allocation7 + $0x1a0] ss:$16 sps:$4 sm:$0xff]  }
 0x233   :  { %3347 = vmatmul.mubr.bf16.vlgmr.msra.gmra.mrb[4].mxu0 %v7114_v20  ;;  %3511 = vmatmul.mubr.bf16.vlgmr.msra.gmra.mrb[4].mxu1 %v7114_v20  ;;  %v6778_v20 = vld [vmem:[#allocation7 + $0x1c0] ss:$16 sps:$4 sm:$0xff]  }
 0x234   :  { %5094 = vmatpush1.bf16.msra.mxu0 %v6694_v16  ;;  %5125 = vmatprep.mubr.bf16.mxu0 %v3528_v19  ;;  %v6775_v16 = vld [vmem:[#allocation7 + $0x1a8] ss:$16 sps:$4 sm:$0xff]  }
 0x235   :  { %5258 = vmatpush1.bf16.msra.mxu1 %v6697_v17  ;;  %5289 = vmatprep.mubr.bf16.mxu1 %v3528_v19  ;;  %v6780_v17 = vld [vmem:[#allocation7 + $0x1c4] ss:$16 sps:$4 sm:$0xff]   ;;  %v573_v19 = vrot.slane %v7479_v49, %v572_v13 }
 0x236   :  { %5095 = vmatprep.subr.bf16.mxu0 %v6702_v18  ;;  %5259 = vmatprep.subr.bf16.mxu1 %v6705_v21  ;;  %v6783_v18 = vld [vmem:[#allocation7 + $0x1cc] ss:$16 sps:$4 sm:$0xff]   ;;  %v6589_v21 = vadd.f32 %v7481_v54, %v561_v14  ;;  %v6790_v54 = vld [vmem:[#allocation7 + $0x200] ss:$16 sps:$4 sm:$0xff]  }
 0x237   :  { %v6855_v14 = vld [vmem:[#allocation7 + $0x34c] ss:$16 sps:$4 sm:$0xff]  }
 0x238   :  { %5096 = vmatpush1.bf16.msra.mxu0 %v6700_v25  ;;  %v6781_v25 = vld [vmem:[#allocation7 + $0x1c8] ss:$16 sps:$4 sm:$0xff]  }
 0x239   :  { %5260 = vmatpush1.bf16.msra.mxu1 %v6703_v22  ;;  %5097 = vmatprep.subr.bf16.mxu0 %v6708_v53  ;;  %v6786_v22 = vld [vmem:[#allocation7 + $0x1e4] ss:$16 sps:$4 sm:$0xff]   ;;  %v6789_v53 = vld [vmem:[#allocation7 + $0x1ec] ss:$16 sps:$4 sm:$0xff]  }
 0x23a   :  { %5261 = vmatprep.subr.bf16.mxu1 %v6711_v23  ;;  %v6592_v23 = vadd.f32 %v7488_v1, %v573_v19  ;;  %v6801_v1 = vld [vmem:[#allocation7 + $0x22c] ss:$16 sps:$4 sm:$0xff]  }
 0x23b   :  { %v6861_v19 = vld [vmem:[#allocation7 + $0x36c] ss:$16 sps:$4 sm:$0xff]  }
 0x23c   :  { %5098 = vmatpush1.bf16.msra.mxu0 %v6706_v38  ;;  %v6784_v38 = vld [vmem:[#allocation7 + $0x1e0] ss:$16 sps:$4 sm:$0xff]  }
 0x23d   :  { %5262 = vmatpush1.bf16.msra.mxu1 %v6709_v26  ;;  %5099 = vmatprep.subr.bf16.mxu0 %v6714_v27  ;;  %v3519_v26 = vmax.f32 %v6589_v21, 0.0  ;;  %v6787_v27 = vld [vmem:[#allocation7 + $0x1e8] ss:$16 sps:$4 sm:$0xff]  }
 0x23e   :  { %5263 = vmatprep.subr.bf16.mxu1 %v6717_v28  ;;  %v6792_v28 = vld [vmem:[#allocation7 + $0x204] ss:$16 sps:$4 sm:$0xff]   ;;  %v6859_v21 = vld [vmem:[#allocation7 + $0x368] ss:$16 sps:$4 sm:$0xff]  }
 0x240   :  { %5100 = vmatpush1.bf16.msra.mxu0 %v6712_v29  ;;  %v6795_v29 = vld [vmem:[#allocation7 + $0x20c] ss:$16 sps:$4 sm:$0xff]  }
 0x241   :  { %5264 = vmatpush1.bf16.msra.mxu1 %v6715_v30  ;;  %5101 = vmatprep.subr.bf16.mxu0 %v6720_v31  ;;  %v3522_v30 = vmax.f32 %v6592_v23, 0.0  ;;  %v3527_v31 = vpack.c.bf16 %v3519_v26, %v3519_v26  ;;  %v568_v23 = vsub.s32 2, %v7476_v37  ;;  %v6870_v26 = vld [vmem:[#allocation7 + $0x3a4] ss:$16 sps:$4 sm:$0xff]  }
 0x242   :  { %5265 = vmatprep.subr.bf16.mxu1 %v6723_v34  ;;  %v6793_v34 = vld [vmem:[#allocation7 + $0x208] ss:$16 sps:$4 sm:$0xff]  }
 0x244   :  { %5102 = vmatpush1.bf16.msra.mxu0 %v6718_v32  ;;  %v6798_v32 = vld [vmem:[#allocation7 + $0x224] ss:$16 sps:$4 sm:$0xff]  }
 0x245   :  { %5266 = vmatpush1.bf16.msra.mxu1 %v6721_v33  ;;  %5103 = vmatprep.subr.bf16.mxu0 %v6726_v15  ;;  %v3530_v33 = vpack.c.bf16 %v3522_v30, %v3522_v30  ;;  %v6796_v15 = vld [vmem:[#allocation7 + $0x220] ss:$16 sps:$4 sm:$0xff]   ;;  %v6871_v30 = vld [vmem:[#allocation7 + $0x3a8] ss:$16 sps:$4 sm:$0xff]  }
 0x246   :  { %5267 = vmatprep.subr.bf16.mxu1 %v6729_v55  ;;  %v6799_v55 = vld [vmem:[#allocation7 + $0x228] ss:$16 sps:$4 sm:$0xff]  }
 0x248   :  { %5104 = vmatpush1.bf16.msra.mxu0 %v6724_v35  ;;  %v6804_v35 = vld [vmem:[#allocation7 + $0x244] ss:$16 sps:$4 sm:$0xff]  }
 0x249   :  { %5268 = vmatpush1.bf16.msra.mxu1 %v6727_v36  ;;  %5105 = vmatprep.subr.bf16.mxu0 %v6732_v39  ;;  %v6807_v36 = vld [vmem:[#allocation7 + $0x24c] ss:$16 sps:$4 sm:$0xff]   ;;  %v6802_v39 = vld [vmem:[#allocation7 + $0x240] ss:$16 sps:$4 sm:$0xff]  }
 0x24a   :  { %5269 = vmatprep.subr.bf16.mxu1 %v6735_v40  ;;  %v6805_v40 = vld [vmem:[#allocation7 + $0x248] ss:$16 sps:$4 sm:$0xff]  }
 0x24c   :  { %5106 = vmatpush1.bf16.msra.mxu0 %v6730_v41  ;;  %v6810_v41 = vld [vmem:[#allocation7 + $0x264] ss:$16 sps:$4 sm:$0xff]  }
 0x24d   :  { %5270 = vmatpush1.bf16.msra.mxu1 %v6733_v42  ;;  %5107 = vmatprep.subr.bf16.mxu0 %v6738_v43  ;;  %v6813_v42 = vld [vmem:[#allocation7 + $0x26c] ss:$16 sps:$4 sm:$0xff]   ;;  %v6808_v43 = vld [vmem:[#allocation7 + $0x260] ss:$16 sps:$4 sm:$0xff]  }
 0x24e   :  { %5271 = vmatprep.subr.bf16.mxu1 %v6741_v44  ;;  %v6811_v44 = vld [vmem:[#allocation7 + $0x268] ss:$16 sps:$4 sm:$0xff]  }
 0x250   :  { %5108 = vmatpush1.bf16.msra.mxu0 %v6736_v45  ;;  %v6816_v45 = vld [vmem:[#allocation7 + $0x284] ss:$16 sps:$4 sm:$0xff]  }
 0x251   :  { %5272 = vmatpush1.bf16.msra.mxu1 %v6739_v46  ;;  %5109 = vmatprep.subr.bf16.mxu0 %v6744_v24  ;;  %v6819_v46 = vld [vmem:[#allocation7 + $0x28c] ss:$16 sps:$4 sm:$0xff]   ;;  %v6814_v24 = vld [vmem:[#allocation7 + $0x280] ss:$16 sps:$4 sm:$0xff]  }
 0x252   :  { %5273 = vmatprep.subr.bf16.mxu1 %v6747_v48  ;;  %v6817_v48 = vld [vmem:[#allocation7 + $0x288] ss:$16 sps:$4 sm:$0xff]  }
 0x254   :  { %5110 = vmatpush1.bf16.msra.mxu0 %v6742_v50  ;;  %v6822_v50 = vld [vmem:[#allocation7 + $0x2a4] ss:$16 sps:$4 sm:$0xff]  }
 0x255   :  { %5274 = vmatpush1.bf16.msra.mxu1 %v6745_v51  ;;  %5111 = vmatprep.subr.bf16.mxu0 %v6750_v52  ;;  %v6825_v51 = vld [vmem:[#allocation7 + $0x2ac] ss:$16 sps:$4 sm:$0xff]   ;;  %v6820_v52 = vld [vmem:[#allocation7 + $0x2a0] ss:$16 sps:$4 sm:$0xff]  }
 0x256   :  { %5275 = vmatprep.subr.bf16.mxu1 %v6753_v56  ;;  %v6823_v56 = vld [vmem:[#allocation7 + $0x2a8] ss:$16 sps:$4 sm:$0xff]  }
 0x258   :  { %5112 = vmatpush1.bf16.msra.mxu0 %v6748_v58  ;;  %v6828_v58 = vld [vmem:[#allocation7 + $0x2c4] ss:$16 sps:$4 sm:$0xff]  }
 0x259   :  { %5276 = vmatpush1.bf16.msra.mxu1 %v6751_v59  ;;  %5113 = vmatprep.subr.bf16.mxu0 %v6756_v61  ;;  %v6831_v59 = vld [vmem:[#allocation7 + $0x2cc] ss:$16 sps:$4 sm:$0xff]   ;;  %v6826_v61 = vld [vmem:[#allocation7 + $0x2c0] ss:$16 sps:$4 sm:$0xff]  }
 0x25a   :  { %5277 = vmatprep.subr.bf16.mxu1 %v6759_v62  ;;  %v6829_v62 = vld [vmem:[#allocation7 + $0x2c8] ss:$16 sps:$4 sm:$0xff]  }
 0x25c   :  { %5114 = vmatpush1.bf16.msra.mxu0 %v6754_v63  ;;  %v6834_v63 = vld [vmem:[#allocation7 + $0x2e4] ss:$16 sps:$4 sm:$0xff]  }
 0x25d   :  { %5278 = vmatpush1.bf16.msra.mxu1 %v6757_v0  ;;  %5115 = vmatprep.subr.bf16.mxu0 %v6762_v2  ;;  %v6837_v0 = vld [vmem:[#allocation7 + $0x2ec] ss:$16 sps:$4 sm:$0xff]   ;;  %v6832_v2 = vld [vmem:[#allocation7 + $0x2e0] ss:$16 sps:$4 sm:$0xff]  }
 0x25e   :  { %5279 = vmatprep.subr.bf16.mxu1 %v6765_v3  ;;  %v6835_v3 = vld [vmem:[#allocation7 + $0x2e8] ss:$16 sps:$4 sm:$0xff]  }
 0x260   :  { %5116 = vmatpush1.bf16.msra.mxu0 %v6760_v4  ;;  %v6840_v4 = vld [vmem:[#allocation7 + $0x304] ss:$16 sps:$4 sm:$0xff]  }
 0x261   :  { %5280 = vmatpush1.bf16.msra.mxu1 %v6763_v5  ;;  %5117 = vmatprep.subr.bf16.mxu0 %v6768_v6  ;;  %v6843_v5 = vld [vmem:[#allocation7 + $0x30c] ss:$16 sps:$4 sm:$0xff]   ;;  %v6838_v6 = vld [vmem:[#allocation7 + $0x300] ss:$16 sps:$4 sm:$0xff]  }
 0x262   :  { %5281 = vmatprep.subr.bf16.mxu1 %v6771_v7  ;;  %v6841_v7 = vld [vmem:[#allocation7 + $0x308] ss:$16 sps:$4 sm:$0xff]  }
 0x264   :  { %5118 = vmatpush1.bf16.msra.mxu0 %v6766_v8  ;;  %v6846_v8 = vld [vmem:[#allocation7 + $0x324] ss:$16 sps:$4 sm:$0xff]  }
 0x265   :  { %5282 = vmatpush1.bf16.msra.mxu1 %v6769_v10  ;;  %5119 = vmatprep.subr.bf16.mxu0 %v6774_v11  ;;  %v6849_v10 = vld [vmem:[#allocation7 + $0x32c] ss:$16 sps:$4 sm:$0xff]   ;;  %v6844_v11 = vld [vmem:[#allocation7 + $0x320] ss:$16 sps:$4 sm:$0xff]  }
 0x266   :  { %5283 = vmatprep.subr.bf16.mxu1 %v6777_v57  ;;  %v6847_v57 = vld [vmem:[#allocation7 + $0x328] ss:$16 sps:$4 sm:$0xff]  }
 0x268   :  { %5120 = vmatpush1.bf16.msra.mxu0 %v6772_v12  ;;  %v6852_v12 = vld [vmem:[#allocation7 + $0x344] ss:$16 sps:$4 sm:$0xff]  }
 0x269   :  { %5284 = vmatpush1.bf16.msra.mxu1 %v6775_v16  ;;  %5121 = vmatprep.subr.bf16.mxu0 %v6780_v17  ;;  %v6850_v16 = vld [vmem:[#allocation7 + $0x340] ss:$16 sps:$4 sm:$0xff]   ;;  %v6853_v17 = vld [vmem:[#allocation7 + $0x348] ss:$16 sps:$4 sm:$0xff]  }
 0x26a   :  { %5285 = vmatprep.subr.bf16.mxu1 %v6783_v18  ;;  %v6858_v18 = vld [vmem:[#allocation7 + $0x364] ss:$16 sps:$4 sm:$0xff]  }
 0x26c   :  { %5122 = vmatpush1.bf16.msra.mxu0 %v6778_v20  ;;  %v6856_v20 = vld [vmem:[#allocation7 + $0x360] ss:$16 sps:$4 sm:$0xff]  }
 0x26d   :  { %5286 = vmatpush1.bf16.msra.mxu1 %v6781_v25  ;;  %5123 = vmatprep.subr.bf16.mxu0 %v6786_v22  ;;  %v6864_v25 = vld [vmem:[#allocation7 + $0x384] ss:$16 sps:$4 sm:$0xff]   ;;  %v6867_v22 = vld [vmem:[#allocation7 + $0x38c] ss:$16 sps:$4 sm:$0xff]  }
 0x26e   :  { %5287 = vmatprep.subr.bf16.mxu1 %v6789_v53  ;;  %v6862_v53 = vld [vmem:[#allocation7 + $0x380] ss:$16 sps:$4 sm:$0xff]  }
 0x270   :  { %5124 = vmatpush1.bf16.msra.mxu0 %v6784_v38  ;;  %v6865_v38 = vld [vmem:[#allocation7 + $0x388] ss:$16 sps:$4 sm:$0xff]  }
 0x271   :  { %5288 = vmatpush1.bf16.msra.mxu1 %v6787_v27  ;;  %5134 = vmatprep.subr.bf16.mxu0 %v6792_v28  ;;  %v6873_v27 = vld [vmem:[#allocation7 + $0x3ac] ss:$16 sps:$4 sm:$0xff]   ;;  %v6868_v28 = vld [vmem:[#allocation7 + $0x3a0] ss:$16 sps:$4 sm:$0xff]  }
 0x272   :  { %5298 = vmatprep.subr.bf16.mxu1 %v6795_v29  ;;  %v569_v29 = vrot.slane %v7479_v49, %v568_v23 }
 0x273   :  { %5126 = vmatmul.mubr.bf16.vlgmr.msra.gmra.mrb[8].mxu0 %v3527_v31 }
 0x274   :  { %5290 = vmatmul.mubr.bf16.vlgmr.msra.gmra.mrb[8].mxu1 %v3527_v31  ;;  %5135 = vmatpush1.bf16.msra.mxu0 %v6790_v54  ;;  %v6876_v54 = vld [vmem:[#allocation7 + $0x3c4] ss:$16 sps:$4 sm:$0xff]   ;;  %v6879_v31 = vld [vmem:[#allocation7 + $0x3cc] ss:$16 sps:$4 sm:$0xff]  }
 0x275   :  { %5166 = vmatprep.mubr.bf16.mxu0 %v3530_v33  ;;  %5299 = vmatpush1.bf16.msra.mxu1 %v6793_v34  ;;  %v6874_v34 = vld [vmem:[#allocation7 + $0x3c0] ss:$16 sps:$4 sm:$0xff]  }
 0x276   :  { %5330 = vmatprep.mubr.bf16.mxu1 %v3530_v33  ;;  %5136 = vmatprep.subr.bf16.mxu0 %v6798_v32  ;;  %v6591_v32 = vadd.f32 %v7483_v60, %v569_v29  ;;  %v6877_v33 = vld [vmem:[#allocation7 + $0x3c8] ss:$16 sps:$4 sm:$0xff]   ;;  %v6957_v29 = vld [vmem:[#allocation7 + $0x56c] ss:$16 sps:$4 sm:$0xff]  }
 0x277   :  { %5300 = vmatprep.subr.bf16.mxu1 %v6801_v1  ;;  %v6882_v1 = vld [vmem:[#allocation7 + $0x3e4] ss:$16 sps:$4 sm:$0xff]   ;;  %v6889_v60 = vld [vmem:[#allocation7 + $0x408] ss:$16 sps:$4 sm:$0xff]  }
 0x278   :  { %5137 = vmatpush1.bf16.msra.mxu0 %v6796_v15  ;;  %v6885_v15 = vld [vmem:[#allocation7 + $0x3ec] ss:$16 sps:$4 sm:$0xff]  }
 0x279   :  { %5301 = vmatpush1.bf16.msra.mxu1 %v6799_v55  ;;  %5138 = vmatprep.subr.bf16.mxu0 %v6804_v35  ;;  %v6880_v55 = vld [vmem:[#allocation7 + $0x3e0] ss:$16 sps:$4 sm:$0xff]   ;;  %v3521_v35 = vmax.f32 %v6591_v32, 0.0 }
 0x27a   :  { %5302 = vmatprep.subr.bf16.mxu1 %v6807_v36  ;;  %v6883_v36 = vld [vmem:[#allocation7 + $0x3e8] ss:$16 sps:$4 sm:$0xff]   ;;  %v6958_v32 = vld [vmem:[#allocation7 + $0x580] ss:$16 sps:$4 sm:$0xff]  }
 0x27c   :  { %5139 = vmatpush1.bf16.msra.mxu0 %v6802_v39  ;;  %v6888_v39 = vld [vmem:[#allocation7 + $0x404] ss:$16 sps:$4 sm:$0xff]  }
 0x27d   :  { %5303 = vmatpush1.bf16.msra.mxu1 %v6805_v40  ;;  %5140 = vmatprep.subr.bf16.mxu0 %v6810_v41  ;;  %v6891_v40 = vld [vmem:[#allocation7 + $0x40c] ss:$16 sps:$4 sm:$0xff]   ;;  %v6886_v41 = vld [vmem:[#allocation7 + $0x400] ss:$16 sps:$4 sm:$0xff]  }
 0x27e   :  { %5304 = vmatprep.subr.bf16.mxu1 %v6813_v42  ;;  %v3529_v42 = vpack.c.bf16 %v3521_v35, %v3521_v35  ;;  %v6967_v35 = vld [vmem:[#allocation7 + $0x5a8] ss:$16 sps:$4 sm:$0xff]  }
 0x280   :  { %5141 = vmatpush1.bf16.msra.mxu0 %v6808_v43  ;;  %v6894_v43 = vld [vmem:[#allocation7 + $0x424] ss:$16 sps:$4 sm:$0xff]  }
 0x281   :  { %5305 = vmatpush1.bf16.msra.mxu1 %v6811_v44  ;;  %5142 = vmatprep.subr.bf16.mxu0 %v6816_v45  ;;  %v6897_v44 = vld [vmem:[#allocation7 + $0x42c] ss:$16 sps:$4 sm:$0xff]   ;;  %v6892_v45 = vld [vmem:[#allocation7 + $0x420] ss:$16 sps:$4 sm:$0xff]  }
 0x282   :  { %5306 = vmatprep.subr.bf16.mxu1 %v6819_v46  ;;  %v6895_v46 = vld [vmem:[#allocation7 + $0x428] ss:$16 sps:$4 sm:$0xff]  }
 0x284   :  { %5143 = vmatpush1.bf16.msra.mxu0 %v6814_v24  ;;  %v6900_v24 = vld [vmem:[#allocation7 + $0x444] ss:$16 sps:$4 sm:$0xff]  }
 0x285   :  { %5307 = vmatpush1.bf16.msra.mxu1 %v6817_v48  ;;  %5144 = vmatprep.subr.bf16.mxu0 %v6822_v50  ;;  %v6903_v48 = vld [vmem:[#allocation7 + $0x44c] ss:$16 sps:$4 sm:$0xff]   ;;  %v6898_v50 = vld [vmem:[#allocation7 + $0x440] ss:$16 sps:$4 sm:$0xff]  }
 0x286   :  { %5308 = vmatprep.subr.bf16.mxu1 %v6825_v51  ;;  %v6901_v51 = vld [vmem:[#allocation7 + $0x448] ss:$16 sps:$4 sm:$0xff]  }
 0x288   :  { %5145 = vmatpush1.bf16.msra.mxu0 %v6820_v52  ;;  %v6906_v52 = vld [vmem:[#allocation7 + $0x464] ss:$16 sps:$4 sm:$0xff]  }
 0x289   :  { %5309 = vmatpush1.bf16.msra.mxu1 %v6823_v56  ;;  %5146 = vmatprep.subr.bf16.mxu0 %v6828_v58  ;;  %v6909_v56 = vld [vmem:[#allocation7 + $0x46c] ss:$16 sps:$4 sm:$0xff]   ;;  %v6904_v58 = vld [vmem:[#allocation7 + $0x460] ss:$16 sps:$4 sm:$0xff]  }
 0x28a   :  { %5310 = vmatprep.subr.bf16.mxu1 %v6831_v59  ;;  %v6907_v59 = vld [vmem:[#allocation7 + $0x468] ss:$16 sps:$4 sm:$0xff]  }
 0x28c   :  { %5147 = vmatpush1.bf16.msra.mxu0 %v6826_v61  ;;  %v6912_v61 = vld [vmem:[#allocation7 + $0x484] ss:$16 sps:$4 sm:$0xff]  }
 0x28d   :  { %5311 = vmatpush1.bf16.msra.mxu1 %v6829_v62  ;;  %5148 = vmatprep.subr.bf16.mxu0 %v6834_v63  ;;  %v6915_v62 = vld [vmem:[#allocation7 + $0x48c] ss:$16 sps:$4 sm:$0xff]   ;;  %v6910_v63 = vld [vmem:[#allocation7 + $0x480] ss:$16 sps:$4 sm:$0xff]  }
 0x28e   :  { %5312 = vmatprep.subr.bf16.mxu1 %v6837_v0  ;;  %v6913_v0 = vld [vmem:[#allocation7 + $0x488] ss:$16 sps:$4 sm:$0xff]  }
 0x290   :  { %5149 = vmatpush1.bf16.msra.mxu0 %v6832_v2  ;;  %v6918_v2 = vld [vmem:[#allocation7 + $0x4a4] ss:$16 sps:$4 sm:$0xff]  }
 0x291   :  { %5313 = vmatpush1.bf16.msra.mxu1 %v6835_v3  ;;  %5150 = vmatprep.subr.bf16.mxu0 %v6840_v4  ;;  %v6921_v3 = vld [vmem:[#allocation7 + $0x4ac] ss:$16 sps:$4 sm:$0xff]   ;;  %v6916_v4 = vld [vmem:[#allocation7 + $0x4a0] ss:$16 sps:$4 sm:$0xff]  }
 0x292   :  { %5314 = vmatprep.subr.bf16.mxu1 %v6843_v5  ;;  %v6919_v5 = vld [vmem:[#allocation7 + $0x4a8] ss:$16 sps:$4 sm:$0xff]  }
 0x294   :  { %5151 = vmatpush1.bf16.msra.mxu0 %v6838_v6  ;;  %v6924_v6 = vld [vmem:[#allocation7 + $0x4c4] ss:$16 sps:$4 sm:$0xff]  }
 0x295   :  { %5315 = vmatpush1.bf16.msra.mxu1 %v6841_v7  ;;  %5152 = vmatprep.subr.bf16.mxu0 %v6846_v8  ;;  %v6927_v7 = vld [vmem:[#allocation7 + $0x4cc] ss:$16 sps:$4 sm:$0xff]   ;;  %v6922_v8 = vld [vmem:[#allocation7 + $0x4c0] ss:$16 sps:$4 sm:$0xff]  }
 0x296   :  { %5316 = vmatprep.subr.bf16.mxu1 %v6849_v10  ;;  %v6925_v10 = vld [vmem:[#allocation7 + $0x4c8] ss:$16 sps:$4 sm:$0xff]  }
 0x298   :  { %5153 = vmatpush1.bf16.msra.mxu0 %v6844_v11  ;;  %v6930_v11 = vld [vmem:[#allocation7 + $0x4e4] ss:$16 sps:$4 sm:$0xff]  }
 0x299   :  { %5317 = vmatpush1.bf16.msra.mxu1 %v6847_v57  ;;  %5154 = vmatprep.subr.bf16.mxu0 %v6852_v12  ;;  %v6933_v57 = vld [vmem:[#allocation7 + $0x4ec] ss:$16 sps:$4 sm:$0xff]   ;;  %v6928_v12 = vld [vmem:[#allocation7 + $0x4e0] ss:$16 sps:$4 sm:$0xff]  }
 0x29a   :  { %5318 = vmatprep.subr.bf16.mxu1 %v6855_v14  ;;  %v6931_v14 = vld [vmem:[#allocation7 + $0x4e8] ss:$16 sps:$4 sm:$0xff]  }
 0x29c   :  { %5155 = vmatpush1.bf16.msra.mxu0 %v6850_v16  ;;  %v6936_v16 = vld [vmem:[#allocation7 + $0x504] ss:$16 sps:$4 sm:$0xff]  }
 0x29d   :  { %5319 = vmatpush1.bf16.msra.mxu1 %v6853_v17  ;;  %5156 = vmatprep.subr.bf16.mxu0 %v6858_v18  ;;  %v6939_v17 = vld [vmem:[#allocation7 + $0x50c] ss:$16 sps:$4 sm:$0xff]   ;;  %v6934_v18 = vld [vmem:[#allocation7 + $0x500] ss:$16 sps:$4 sm:$0xff]  }
 0x29e   :  { %5320 = vmatprep.subr.bf16.mxu1 %v6861_v19  ;;  %v6937_v19 = vld [vmem:[#allocation7 + $0x508] ss:$16 sps:$4 sm:$0xff]  }
 0x2a0   :  { %5157 = vmatpush1.bf16.msra.mxu0 %v6856_v20  ;;  %v6942_v20 = vld [vmem:[#allocation7 + $0x524] ss:$16 sps:$4 sm:$0xff]  }
 0x2a1   :  { %5321 = vmatpush1.bf16.msra.mxu1 %v6859_v21  ;;  %5158 = vmatprep.subr.bf16.mxu0 %v6864_v25  ;;  %v6945_v21 = vld [vmem:[#allocation7 + $0x52c] ss:$16 sps:$4 sm:$0xff]   ;;  %v6940_v25 = vld [vmem:[#allocation7 + $0x520] ss:$16 sps:$4 sm:$0xff]  }
 0x2a2   :  { %5322 = vmatprep.subr.bf16.mxu1 %v6867_v22  ;;  %v6943_v22 = vld [vmem:[#allocation7 + $0x528] ss:$16 sps:$4 sm:$0xff]  }
 0x2a4   :  { %5159 = vmatpush1.bf16.msra.mxu0 %v6862_v53  ;;  %v6948_v53 = vld [vmem:[#allocation7 + $0x544] ss:$16 sps:$4 sm:$0xff]  }
 0x2a5   :  { %5323 = vmatpush1.bf16.msra.mxu1 %v6865_v38  ;;  %5160 = vmatprep.subr.bf16.mxu0 %v6870_v26  ;;  %v6951_v38 = vld [vmem:[#allocation7 + $0x54c] ss:$16 sps:$4 sm:$0xff]   ;;  %v6946_v26 = vld [vmem:[#allocation7 + $0x540] ss:$16 sps:$4 sm:$0xff]  }
 0x2a6   :  { %5324 = vmatprep.subr.bf16.mxu1 %v6873_v27  ;;  %v6949_v27 = vld [vmem:[#allocation7 + $0x548] ss:$16 sps:$4 sm:$0xff]  }
 0x2a8   :  { %5161 = vmatpush1.bf16.msra.mxu0 %v6868_v28  ;;  %v6954_v28 = vld [vmem:[#allocation7 + $0x564] ss:$16 sps:$4 sm:$0xff]  }
 0x2a9   :  { %5325 = vmatpush1.bf16.msra.mxu1 %v6871_v30  ;;  %5162 = vmatprep.subr.bf16.mxu0 %v6876_v54  ;;  %v6952_v30 = vld [vmem:[#allocation7 + $0x560] ss:$16 sps:$4 sm:$0xff]   ;;  %v6955_v54 = vld [vmem:[#allocation7 + $0x568] ss:$16 sps:$4 sm:$0xff]  }
 0x2aa   :  { %5326 = vmatprep.subr.bf16.mxu1 %v6879_v31  ;;  %v6960_v31 = vld [vmem:[#allocation7 + $0x584] ss:$16 sps:$4 sm:$0xff]  }
 0x2ac   :  { %5163 = vmatpush1.bf16.msra.mxu0 %v6874_v34  ;;  %v6963_v34 = vld [vmem:[#allocation7 + $0x58c] ss:$16 sps:$4 sm:$0xff]  }
 0x2ad   :  { %5327 = vmatpush1.bf16.msra.mxu1 %v6877_v33  ;;  %5164 = vmatprep.subr.bf16.mxu0 %v6882_v1  ;;  %v6961_v33 = vld [vmem:[#allocation7 + $0x588] ss:$16 sps:$4 sm:$0xff]   ;;  %v6966_v1 = vld [vmem:[#allocation7 + $0x5a4] ss:$16 sps:$4 sm:$0xff]  }
 0x2ae   :  { %5328 = vmatprep.subr.bf16.mxu1 %v6885_v15  ;;  %v6969_v15 = vld [vmem:[#allocation7 + $0x5ac] ss:$16 sps:$4 sm:$0xff]  }
 0x2b0   :  { %5165 = vmatpush1.bf16.msra.mxu0 %v6880_v55  ;;  %v6964_v55 = vld [vmem:[#allocation7 + $0x5a0] ss:$16 sps:$4 sm:$0xff]  }
 0x2b1   :  { %5329 = vmatpush1.bf16.msra.mxu1 %v6883_v36  ;;  %5175 = vmatprep.subr.bf16.mxu0 %v6888_v39  ;;  %v6972_v36 = vld [vmem:[#allocation7 + $0x5c4] ss:$16 sps:$4 sm:$0xff]   ;;  %v6975_v39 = vld [vmem:[#allocation7 + $0x5cc] ss:$16 sps:$4 sm:$0xff]  }
 0x2b2   :  { %5339 = vmatprep.subr.bf16.mxu1 %v6891_v40  ;;  %v6970_v40 = vld [vmem:[#allocation7 + $0x5c0] ss:$16 sps:$4 sm:$0xff]  }
 0x2b3   :  { %5167 = vmatmul.mubr.bf16.vlgmr.msra.gmra.mrb[8].mxu0 %v3529_v42 }
 0x2b4   :  { %5331 = vmatmul.mubr.bf16.vlgmr.msra.gmra.mrb[8].mxu1 %v3529_v42  ;;  %5176 = vmatpush1.bf16.msra.mxu0 %v6886_v41  ;;  %v6973_v41 = vld [vmem:[#allocation7 + $0x5c8] ss:$16 sps:$4 sm:$0xff]   ;;  %v6978_v42 = vld [vmem:[#allocation7 + $0x5e4] ss:$16 sps:$4 sm:$0xff]  }
 0x2b5   :  { %5340 = vmatpush1.bf16.msra.mxu1 %v6889_v60  ;;  %5177 = vmatprep.subr.bf16.mxu0 %v6894_v43  ;;  %v6981_v60 = vld [vmem:[#allocation7 + $0x5ec] ss:$16 sps:$4 sm:$0xff]   ;;  %v6976_v43 = vld [vmem:[#allocation7 + $0x5e0] ss:$16 sps:$4 sm:$0xff]  }
 0x2b6   :  { %5341 = vmatprep.subr.bf16.mxu1 %v6897_v44  ;;  %v6979_v44 = vld [vmem:[#allocation7 + $0x5e8] ss:$16 sps:$4 sm:$0xff]  }
 0x2b8   :  { %5178 = vmatpush1.bf16.msra.mxu0 %v6892_v45  ;;  %v6984_v45 = vld [vmem:[#allocation7 + $0x604] ss:$16 sps:$4 sm:$0xff]  }
 0x2b9   :  { %5342 = vmatpush1.bf16.msra.mxu1 %v6895_v46  ;;  %5179 = vmatprep.subr.bf16.mxu0 %v6900_v24  ;;  %v6987_v46 = vld [vmem:[#allocation7 + $0x60c] ss:$16 sps:$4 sm:$0xff]   ;;  %v576_v24 = vsub.s32 4, %v7476_v37 }
 0x2ba   :  { %5343 = vmatprep.subr.bf16.mxu1 %v6903_v48  ;;  %v580_v48 = vsub.s32 5, %v7476_v37 }
 0x2bc   :  { %5180 = vmatpush1.bf16.msra.mxu0 %v6898_v50  ;;  %v588_v50 = vsub.s32 7, %v7476_v37 }
 0x2bd   :  { %5344 = vmatpush1.bf16.msra.mxu1 %v6901_v51  ;;  %5181 = vmatprep.subr.bf16.mxu0 %v6906_v52  ;;  %v577_v51 = vrot.slane %v7479_v49, %v576_v24  ;;  %v581_v52 = vrot.slane %v7479_v49, %v580_v48  ;;  %v7036_v24 = vld [vmem:[#allocation7 + $0x720] ss:$16 sps:$4 sm:$0xff]   ;;  %v7039_v48 = vld [vmem:[#allocation7 + $0x728] ss:$16 sps:$4 sm:$0xff]  }
 0x2be   :  { %5345 = vmatprep.subr.bf16.mxu1 %v6909_v56  ;;  %v589_v56 = vrot.slane %v7479_v49, %v588_v50  ;;  %v6990_v49 = vld [vmem:[#allocation7 + $0x624] ss:$16 sps:$4 sm:$0xff]  }
 0x2bf   :  { %v7044_v50 = vld [vmem:[#allocation7 + $0x744] ss:$16 sps:$4 sm:$0xff]  }
 0x2c0   :  { %5182 = vmatpush1.bf16.msra.mxu0 %v6904_v58 }
 0x2c1   :  { %5346 = vmatpush1.bf16.msra.mxu1 %v6907_v59  ;;  %5183 = vmatprep.subr.bf16.mxu0 %v6912_v61 }
 0x2c2   :  { %5347 = vmatprep.subr.bf16.mxu1 %v6915_v62 }
 0x2c4   :  { %5184 = vmatpush1.bf16.msra.mxu0 %v6910_v63 }
 0x2c5   :  { %5348 = vmatpush1.bf16.msra.mxu1 %v6913_v0  ;;  %5185 = vmatprep.subr.bf16.mxu0 %v6918_v2 }
 0x2c6   :  { %5349 = vmatprep.subr.bf16.mxu1 %v6921_v3 }
 0x2c8   :  { %5186 = vmatpush1.bf16.msra.mxu0 %v6916_v4 }
 0x2c9   :  { %5350 = vmatpush1.bf16.msra.mxu1 %v6919_v5  ;;  %5187 = vmatprep.subr.bf16.mxu0 %v6924_v6 }
 0x2ca   :  { %5351 = vmatprep.subr.bf16.mxu1 %v6927_v7 }
 0x2cc   :  { %5188 = vmatpush1.bf16.msra.mxu0 %v6922_v8 }
 0x2cd   :  { %5352 = vmatpush1.bf16.msra.mxu1 %v6925_v10  ;;  %5189 = vmatprep.subr.bf16.mxu0 %v6930_v11 }
 0x2ce   :  { %5353 = vmatprep.subr.bf16.mxu1 %v6933_v57  ;;  %v6982_v57 = vld [vmem:[#allocation7 + $0x600] ss:$16 sps:$4 sm:$0xff]  }
 0x2d0   :  { %5190 = vmatpush1.bf16.msra.mxu0 %v6928_v12  ;;  %v6985_v12 = vld [vmem:[#allocation7 + $0x608] ss:$16 sps:$4 sm:$0xff]  }
 0x2d1   :  { %5354 = vmatpush1.bf16.msra.mxu1 %v6931_v14  ;;  %5191 = vmatprep.subr.bf16.mxu0 %v6936_v16  ;;  %v6993_v16 = vld [vmem:[#allocation7 + $0x62c] ss:$16 sps:$4 sm:$0xff]  }
 0x2d2   :  { %5355 = vmatprep.subr.bf16.mxu1 %v6939_v17 }
 0x2d4   :  { %5192 = vmatpush1.bf16.msra.mxu0 %v6934_v18  ;;  %v6988_v18 = vld [vmem:[#allocation7 + $0x620] ss:$16 sps:$4 sm:$0xff]  }
 0x2d5   :  { %5356 = vmatpush1.bf16.msra.mxu1 %v6937_v19  ;;  %5193 = vmatprep.subr.bf16.mxu0 %v6942_v20  ;;  %v6991_v19 = vld [vmem:[#allocation7 + $0x628] ss:$16 sps:$4 sm:$0xff]   ;;  %v6996_v20 = vld [vmem:[#allocation7 + $0x644] ss:$16 sps:$4 sm:$0xff]  }
 0x2d6   :  { %5357 = vmatprep.subr.bf16.mxu1 %v6945_v21  ;;  %v6999_v21 = vld [vmem:[#allocation7 + $0x64c] ss:$16 sps:$4 sm:$0xff]  }
 0x2d8   :  { %5194 = vmatpush1.bf16.msra.mxu0 %v6940_v25  ;;  %v6994_v25 = vld [vmem:[#allocation7 + $0x640] ss:$16 sps:$4 sm:$0xff]  }
 0x2d9   :  { %5358 = vmatpush1.bf16.msra.mxu1 %v6943_v22  ;;  %5195 = vmatprep.subr.bf16.mxu0 %v6948_v53  ;;  %v6997_v22 = vld [vmem:[#allocation7 + $0x648] ss:$16 sps:$4 sm:$0xff]   ;;  %v7002_v53 = vld [vmem:[#allocation7 + $0x664] ss:$16 sps:$4 sm:$0xff]  }
 0x2da   :  { %5359 = vmatprep.subr.bf16.mxu1 %v6951_v38  ;;  %v7005_v38 = vld [vmem:[#allocation7 + $0x66c] ss:$16 sps:$4 sm:$0xff]  }
 0x2dc   :  { %5196 = vmatpush1.bf16.msra.mxu0 %v6946_v26  ;;  %v7000_v26 = vld [vmem:[#allocation7 + $0x660] ss:$16 sps:$4 sm:$0xff]  }
 0x2dd   :  { %5360 = vmatpush1.bf16.msra.mxu1 %v6949_v27  ;;  %5197 = vmatprep.subr.bf16.mxu0 %v6954_v28  ;;  %v7003_v27 = vld [vmem:[#allocation7 + $0x668] ss:$16 sps:$4 sm:$0xff]   ;;  %v7008_v28 = vld [vmem:[#allocation7 + $0x684] ss:$16 sps:$4 sm:$0xff]  }
 0x2de   :  { %5361 = vmatprep.subr.bf16.mxu1 %v6957_v29  ;;  %v7011_v29 = vld [vmem:[#allocation7 + $0x68c] ss:$16 sps:$4 sm:$0xff]  }
 0x2e0   :  { %5198 = vmatpush1.bf16.msra.mxu0 %v6952_v30  ;;  %v7006_v30 = vld [vmem:[#allocation7 + $0x680] ss:$16 sps:$4 sm:$0xff]  }
 0x2e1   :  { %5362 = vmatpush1.bf16.msra.mxu1 %v6955_v54  ;;  %5199 = vmatprep.subr.bf16.mxu0 %v6960_v31  ;;  %v7009_v54 = vld [vmem:[#allocation7 + $0x688] ss:$16 sps:$4 sm:$0xff]   ;;  %v7014_v31 = vld [vmem:[#allocation7 + $0x6a4] ss:$16 sps:$4 sm:$0xff]  }
 0x2e2   :  { %5363 = vmatprep.subr.bf16.mxu1 %v6963_v34  ;;  %v7017_v34 = vld [vmem:[#allocation7 + $0x6ac] ss:$16 sps:$4 sm:$0xff]  }
 0x2e4   :  { %5200 = vmatpush1.bf16.msra.mxu0 %v6958_v32  ;;  %v7012_v32 = vld [vmem:[#allocation7 + $0x6a0] ss:$16 sps:$4 sm:$0xff]  }
 0x2e5   :  { %5364 = vmatpush1.bf16.msra.mxu1 %v6961_v33  ;;  %5201 = vmatprep.subr.bf16.mxu0 %v6966_v1  ;;  %v7015_v33 = vld [vmem:[#allocation7 + $0x6a8] ss:$16 sps:$4 sm:$0xff]   ;;  %v7020_v1 = vld [vmem:[#allocation7 + $0x6c4] ss:$16 sps:$4 sm:$0xff]  }
 0x2e6   :  { %5365 = vmatprep.subr.bf16.mxu1 %v6969_v15  ;;  %v7023_v15 = vld [vmem:[#allocation7 + $0x6cc] ss:$16 sps:$4 sm:$0xff]  }
 0x2e8   :  { %5202 = vmatpush1.bf16.msra.mxu0 %v6964_v55  ;;  %v7018_v55 = vld [vmem:[#allocation7 + $0x6c0] ss:$16 sps:$4 sm:$0xff]  }
 0x2e9   :  { %5366 = vmatpush1.bf16.msra.mxu1 %v6967_v35  ;;  %5203 = vmatprep.subr.bf16.mxu0 %v6972_v36  ;;  %v7021_v35 = vld [vmem:[#allocation7 + $0x6c8] ss:$16 sps:$4 sm:$0xff]   ;;  %v7026_v36 = vld [vmem:[#allocation7 + $0x6e4] ss:$16 sps:$4 sm:$0xff]  }
 0x2ea   :  { %5367 = vmatprep.subr.bf16.mxu1 %v6975_v39  ;;  %v7029_v39 = vld [vmem:[#allocation7 + $0x6ec] ss:$16 sps:$4 sm:$0xff]  }
 0x2ec   :  { %5204 = vmatpush1.bf16.msra.mxu0 %v6970_v40  ;;  %v7024_v40 = vld [vmem:[#allocation7 + $0x6e0] ss:$16 sps:$4 sm:$0xff]  }
 0x2ed   :  { %5368 = vmatpush1.bf16.msra.mxu1 %v6973_v41  ;;  %5205 = vmatprep.subr.bf16.mxu0 %v6978_v42  ;;  %v7027_v41 = vld [vmem:[#allocation7 + $0x6e8] ss:$16 sps:$4 sm:$0xff]   ;;  %v7032_v42 = vld [vmem:[#allocation7 + $0x704] ss:$16 sps:$4 sm:$0xff]  }
 0x2ee   :  { %5369 = vmatprep.subr.bf16.mxu1 %v6981_v60  ;;  %v7035_v60 = vld [vmem:[#allocation7 + $0x70c] ss:$16 sps:$4 sm:$0xff]  }
 0x2f0   :  { %5206 = vmatpush1.bf16.msra.mxu0 %v6976_v43  ;;  %v7030_v43 = vld [vmem:[#allocation7 + $0x700] ss:$16 sps:$4 sm:$0xff]  }
 0x2f1   :  { %5370 = vmatpush1.bf16.msra.mxu1 %v6979_v44  ;;  %5216 = vmatprep.subr.bf16.mxu0 %v6984_v45  ;;  %v7033_v44 = vld [vmem:[#allocation7 + $0x708] ss:$16 sps:$4 sm:$0xff]   ;;  %v7038_v45 = vld [vmem:[#allocation7 + $0x724] ss:$16 sps:$4 sm:$0xff]  }
 0x2f2   :  { %5380 = vmatprep.subr.bf16.mxu1 %v6987_v46  ;;  %v7041_v46 = vld [vmem:[#allocation7 + $0x72c] ss:$16 sps:$4 sm:$0xff]  }
 0x306   :  { %v3348_v58 = vpop.f32.mrb[4].mxu0  ;;  %v7514_v61 = vpop.f32.mrb[4].mxu1 }
 0x307   :  { %v6593_v59 = vadd.f32 %v3348_v58, %v577_v51  ;;  %v3350_v62 = vpop.f32.mrb[5].mxu0  ;;  %v3514_v0 = vpop.f32.mrb[5].mxu1  ;;  %v7047_v51 = vld [vmem:[#allocation7 + $0x74c] ss:$16 sps:$4 sm:$0xff]   ;;  %v7050_v58 = vld [vmem:[#allocation7 + $0x764] ss:$16 sps:$4 sm:$0xff]  }
 0x308   :  { %v6594_v63 = vadd.f32 %v3350_v62, %v581_v52  ;;  %v3352_v2 = vpop.f32.mrb[6].mxu0  ;;  %v6596_v4 = vadd.f32 %v3514_v0, %v589_v56  ;;  %v3516_v5 = vpop.f32.mrb[6].mxu1  ;;  %v7042_v52 = vld [vmem:[#allocation7 + $0x740] ss:$16 sps:$4 sm:$0xff]   ;;  %v7045_v56 = vld [vmem:[#allocation7 + $0x748] ss:$16 sps:$4 sm:$0xff]  }
 0x309   :  { %v3523_v3 = vmax.f32 %v6593_v59, 0.0  ;;  %v3353_v6 = vpop.f32.mrb[7].mxu0  ;;  %v3517_v8 = vpop.f32.mrb[7].mxu1  ;;  %v7053_v59 = vld [vmem:[#allocation7 + $0x76c] ss:$16 sps:$4 sm:$0xff]   ;;  %v584_v5 = vsub.s32 6, %v7476_v37 }
 0x30a   :  { %v3524_v7 = vmax.f32 %v6594_v63, 0.0  ;;  %v3526_v10 = vmax.f32 %v6596_v4, 0.0  ;;  %v7048_v62 = vld [vmem:[#allocation7 + $0x760] ss:$16 sps:$4 sm:$0xff]   ;;  %v7051_v63 = vld [vmem:[#allocation7 + $0x768] ss:$16 sps:$4 sm:$0xff]  }
 0x30b   :  { %v3531_v14 = vpack.c.bf16 %v3523_v3, %v3523_v3  ;;  %v7056_v0 = vld [vmem:[#allocation7 + $0x784] ss:$16 sps:$4 sm:$0xff]   ;;  %v7059_v2 = vld [vmem:[#allocation7 + $0x78c] ss:$16 sps:$4 sm:$0xff]   ;;  %v7054_v3 = vld [vmem:[#allocation7 + $0x780] ss:$16 sps:$4 sm:$0xff]  }
 0x30c   :  { %v3532_v11 = vpack.c.bf16 %v3524_v7, %v3524_v7  ;;  %v3534_v17 = vpack.c.bf16 %v3526_v10, %v3526_v10  ;;  %v7057_v4 = vld [vmem:[#allocation7 + $0x788] ss:$16 sps:$4 sm:$0xff]   ;;  %v7062_v6 = vld [vmem:[#allocation7 + $0x7a4] ss:$16 sps:$4 sm:$0xff]   ;;  %v7065_v7 = vld [vmem:[#allocation7 + $0x7ac] ss:$16 sps:$4 sm:$0xff]  }
 0x30d   :  { %v7060_v8 = vld [vmem:[#allocation7 + $0x7a0] ss:$16 sps:$4 sm:$0xff]   ;;  %v7063_v10 = vld [vmem:[#allocation7 + $0x7a8] ss:$16 sps:$4 sm:$0xff]  }
 0x30e   :  { %5207 = vmatprep.mubr.bf16.mxu0 %v3532_v11  ;;  %5371 = vmatprep.mubr.bf16.mxu1 %v3532_v11  ;;  %v7115_v11 = vld [vmem:[#allocation5] sm:$0xff] }
 0x30f   :  { %5208 = vmatmul.mubr.bf16.vlgmr.msra.gmra.mrb[8].mxu0 %v3531_v14  ;;  %5372 = vmatmul.mubr.bf16.vlgmr.msra.gmra.mrb[8].mxu1 %v3531_v14  ;;  %v7071_v14 = vld [vmem:[#allocation7 + $0x7cc] ss:$16 sps:$4 sm:$0xff]  }
 0x310   :  { %5217 = vmatpush1.bf16.msra.mxu0 %v6982_v57  ;;  %5381 = vmatpush1.bf16.msra.mxu1 %v6985_v12  ;;  %v585_v57 = vrot.slane %v7115_v11, %v584_v5  ;;  %v7068_v12 = vld [vmem:[#allocation7 + $0x7c4] ss:$16 sps:$4 sm:$0xff]  }
 0x311   :  { %5248 = vmatprep.mubr.bf16.mxu0 %v3534_v17  ;;  %5412 = vmatprep.mubr.bf16.mxu1 %v3534_v17 }
 0x312   :  { %5218 = vmatprep.subr.bf16.mxu0 %v6990_v49  ;;  %5382 = vmatprep.subr.bf16.mxu1 %v6993_v16  ;;  %v7066_v49 = vld [vmem:[#allocation7 + $0x7c0] ss:$16 sps:$4 sm:$0xff]   ;;  %v7069_v16 = vld [vmem:[#allocation7 + $0x7c8] ss:$16 sps:$4 sm:$0xff]   ;;  %v6595_v17 = vadd.f32 %v7514_v61, %v585_v57 }
 0x313   :  { %v7082_v61 = vld [vmem:[#allocation10 + $0x48] sm:$0xff]  }
 0x314   :  { %5219 = vmatpush1.bf16.msra.mxu0 %v6988_v18  ;;  %5383 = vmatpush1.bf16.msra.mxu1 %v6991_v19  ;;  %v7074_v18 = vld [vmem:[#allocation7 + $0x7e4] ss:$16 sps:$4 sm:$0xff]   ;;  %v7077_v19 = vld [vmem:[#allocation7 + $0x7ec] ss:$16 sps:$4 sm:$0xff]  }
 0x315   :  { %5220 = vmatprep.subr.bf16.mxu0 %v6996_v20  ;;  %5384 = vmatprep.subr.bf16.mxu1 %v6999_v21  ;;  %v7072_v20 = vld [vmem:[#allocation7 + $0x7e0] ss:$16 sps:$4 sm:$0xff]   ;;  %v7075_v21 = vld [vmem:[#allocation7 + $0x7e8] ss:$16 sps:$4 sm:$0xff]  }
 0x318   :  { %5221 = vmatpush1.bf16.msra.mxu0 %v6994_v25  ;;  %5385 = vmatpush1.bf16.msra.mxu1 %v6997_v22  ;;  %v3525_v25 = vmax.f32 %v6595_v17, 0.0  ;;  %v7078_v22 = vld [vmem:[#allocation10 + $0x40] sm:$0xff]  }
 0x319   :  { %5222 = vmatprep.subr.bf16.mxu0 %v7002_v53  ;;  %5386 = vmatprep.subr.bf16.mxu1 %v7005_v38  ;;  %v7079_v53 = vld [vmem:[#allocation10 + $0xc0] sm:$0xff]  }
 0x31a   :  { %v7080_v38 = vld [vmem:[#allocation10] sm:$0xff]  }
 0x31c   :  { %5223 = vmatpush1.bf16.msra.mxu0 %v7000_v26  ;;  %5387 = vmatpush1.bf16.msra.mxu1 %v7003_v27  ;;  %v7081_v26 = vld [vmem:[#allocation10 + $0x80] sm:$0xff]   ;;  %v3533_v27 = vpack.c.bf16 %v3525_v25, %v3525_v25 }
 0x31d   :  { %5224 = vmatprep.subr.bf16.mxu0 %v7008_v28  ;;  %5388 = vmatprep.subr.bf16.mxu1 %v7011_v29  ;;  %v7083_v28 = vld [vmem:[#allocation10 + $0xc8] sm:$0xff]  }
 0x31e   :  { %v7084_v29 = vld [vmem:[#allocation10 + $0x8] sm:$0xff]  }
 0x320   :  { %5225 = vmatpush1.bf16.msra.mxu0 %v7006_v30  ;;  %5389 = vmatpush1.bf16.msra.mxu1 %v7009_v54  ;;  %v7085_v30 = vld [vmem:[#allocation10 + $0x88] sm:$0xff]   ;;  %v7086_v54 = vld [vmem:[#allocation10 + $0x50] sm:$0xff]  }
 0x321   :  { %5226 = vmatprep.subr.bf16.mxu0 %v7014_v31  ;;  %5390 = vmatprep.subr.bf16.mxu1 %v7017_v34  ;;  %v7087_v31 = vld [vmem:[#allocation10 + $0xd0] sm:$0xff]  }
 0x322   :  { %v7088_v34 = vld [vmem:[#allocation10 + $0x10] sm:$0xff]  }
 0x324   :  { %5227 = vmatpush1.bf16.msra.mxu0 %v7012_v32  ;;  %5391 = vmatpush1.bf16.msra.mxu1 %v7015_v33  ;;  %v7089_v32 = vld [vmem:[#allocation10 + $0x90] sm:$0xff]   ;;  %v7090_v33 = vld [vmem:[#allocation10 + $0x58] sm:$0xff]  }
 0x325   :  { %5228 = vmatprep.subr.bf16.mxu0 %v7020_v1  ;;  %5392 = vmatprep.subr.bf16.mxu1 %v7023_v15  ;;  %v7091_v1 = vld [vmem:[#allocation10 + $0xd8] sm:$0xff]  }
 0x326   :  { %v7092_v15 = vld [vmem:[#allocation10 + $0x18] sm:$0xff]  }
 0x328   :  { %5229 = vmatpush1.bf16.msra.mxu0 %v7018_v55  ;;  %5393 = vmatpush1.bf16.msra.mxu1 %v7021_v35  ;;  %v7093_v55 = vld [vmem:[#allocation10 + $0x98] sm:$0xff]   ;;  %v7094_v35 = vld [vmem:[#allocation10 + $0x60] sm:$0xff]  }
 0x329   :  { %5230 = vmatprep.subr.bf16.mxu0 %v7026_v36  ;;  %5394 = vmatprep.subr.bf16.mxu1 %v7029_v39  ;;  %v7095_v36 = vld [vmem:[#allocation10 + $0xe0] sm:$0xff]  }
 0x32a   :  { %v7096_v39 = vld [vmem:[#allocation10 + $0x20] sm:$0xff]  }
 0x32c   :  { %5231 = vmatpush1.bf16.msra.mxu0 %v7024_v40  ;;  %5395 = vmatpush1.bf16.msra.mxu1 %v7027_v41  ;;  %v7097_v40 = vld [vmem:[#allocation10 + $0xa0] sm:$0xff]   ;;  %v7098_v41 = vld [vmem:[#allocation10 + $0x68] sm:$0xff]  }
 0x32d   :  { %5232 = vmatprep.subr.bf16.mxu0 %v7032_v42  ;;  %5396 = vmatprep.subr.bf16.mxu1 %v7035_v60  ;;  %v7099_v42 = vld [vmem:[#allocation10 + $0xe8] sm:$0xff]  }
 0x32e   :  { %v7100_v60 = vld [vmem:[#allocation10 + $0x28] sm:$0xff]  }
 0x330   :  { %5233 = vmatpush1.bf16.msra.mxu0 %v7030_v43  ;;  %5397 = vmatpush1.bf16.msra.mxu1 %v7033_v44  ;;  %v7101_v43 = vld [vmem:[#allocation10 + $0xa8] sm:$0xff]   ;;  %v7102_v44 = vld [vmem:[#allocation10 + $0x70] sm:$0xff]  }
 0x331   :  { %5234 = vmatprep.subr.bf16.mxu0 %v7038_v45  ;;  %5398 = vmatprep.subr.bf16.mxu1 %v7041_v46  ;;  %v7103_v45 = vld [vmem:[#allocation10 + $0xf0] sm:$0xff]  }
 0x332   :  { %v7104_v46 = vld [vmem:[#allocation10 + $0x30] sm:$0xff]  }
 0x334   :  { %5235 = vmatpush1.bf16.msra.mxu0 %v7036_v24  ;;  %5399 = vmatpush1.bf16.msra.mxu1 %v7039_v48  ;;  %v7105_v24 = vld [vmem:[#allocation10 + $0xb0] sm:$0xff]   ;;  %v7106_v48 = vld [vmem:[#allocation10 + $0x78] sm:$0xff]  }
 0x335   :  { %5236 = vmatprep.subr.bf16.mxu0 %v7044_v50  ;;  %5400 = vmatprep.subr.bf16.mxu1 %v7047_v51  ;;  %v7107_v50 = vld [vmem:[#allocation10 + $0xf8] sm:$0xff]  }
 0x336   :  { %v7108_v51 = vld [vmem:[#allocation10 + $0x38] sm:$0xff]  }
 0x338   :  { %5237 = vmatpush1.bf16.msra.mxu0 %v7042_v52  ;;  %5401 = vmatpush1.bf16.msra.mxu1 %v7045_v56  ;;  %v7109_v52 = vld [vmem:[#allocation10 + $0xb8] sm:$0xff]  }
 0x339   :  { %5238 = vmatprep.subr.bf16.mxu0 %v7050_v58  ;;  %5402 = vmatprep.subr.bf16.mxu1 %v7053_v59  ;;  %v3791_v56 = vld [vmem:[#allocation8] sm:$0xf] }
 0x33a   :  { %v3796_v58 = vrot.slane %v3791_v56, %v560_v9  ;;  %v3804_v59 = vrot.slane %v3791_v56, %v568_v23 }
 0x33c   :  { %5239 = vmatpush1.bf16.msra.mxu0 %v7048_v62  ;;  %5403 = vmatpush1.bf16.msra.mxu1 %v7051_v63  ;;  %v3800_v62 = vrot.slane %v3791_v56, %v564_v47  ;;  %v3808_v63 = vrot.slane %v3791_v56, %v572_v13 }
 0x33d   :  { %5240 = vmatprep.subr.bf16.mxu0 %v7056_v0  ;;  %5404 = vmatprep.subr.bf16.mxu1 %v7059_v2 }
 0x340   :  { %5241 = vmatpush1.bf16.msra.mxu0 %v7054_v3  ;;  %5405 = vmatpush1.bf16.msra.mxu1 %v7057_v4 }
 0x341   :  { %5242 = vmatprep.subr.bf16.mxu0 %v7062_v6  ;;  %5406 = vmatprep.subr.bf16.mxu1 %v7065_v7 }
 0x344   :  { %5243 = vmatpush1.bf16.msra.mxu0 %v7060_v8  ;;  %5407 = vmatpush1.bf16.msra.mxu1 %v7063_v10 }
 0x345   :  { %5244 = vmatprep.subr.bf16.mxu0 %v7068_v12  ;;  %5408 = vmatprep.subr.bf16.mxu1 %v7071_v14 }
 0x348   :  { %5245 = vmatpush1.bf16.msra.mxu0 %v7066_v49  ;;  %5409 = vmatpush1.bf16.msra.mxu1 %v7069_v16 }
 0x349   :  { %5246 = vmatprep.subr.bf16.mxu0 %v7074_v18  ;;  %5410 = vmatprep.subr.bf16.mxu1 %v7077_v19  ;;  %v6512_v19 = vld [vmem:[#allocation11] ss:$0 sm:$0xff] }
 0x34c   :  { %5247 = vmatpush1.bf16.msra.mxu0 %v7072_v20  ;;  %5411 = vmatpush1.bf16.msra.mxu1 %v7075_v21 }
 0x34d   :  { %6545 = vmatprep.subr.bf16.mxu0 %v7078_v22  ;;  %6567 = vmatprep.subr.bf16.mxu1 %v7079_v53 }
 0x34f   :  { %5249 = vmatmul.mubr.bf16.vlgmr.msra.gmra.mrb[8].mxu0 %v3533_v27  ;;  %5413 = vmatmul.mubr.bf16.vlgmr.msra.gmra.mrb[8].mxu1 %v3533_v27 }
 0x350   :  { %6546 = vmatpush3.bf16.msra.mxu0 %v7080_v38  ;;  %6568 = vmatpush3.bf16.msra.mxu1 %v7081_v26 }
 0x351   :  { %6547 = vmatprep.subr.bf16.mxu0 %v7082_v61  ;;  %6569 = vmatprep.subr.bf16.mxu1 %v7083_v28 }
 0x354   :  { %6548 = vmatpush3.bf16.msra.mxu0 %v7084_v29  ;;  %6570 = vmatpush3.bf16.msra.mxu1 %v7085_v30 }
 0x355   :  { %6549 = vmatprep.subr.bf16.mxu0 %v7086_v54  ;;  %6571 = vmatprep.subr.bf16.mxu1 %v7087_v31 }
 0x358   :  { %6550 = vmatpush3.bf16.msra.mxu0 %v7088_v34  ;;  %6572 = vmatpush3.bf16.msra.mxu1 %v7089_v32 }
 0x359   :  { %6551 = vmatprep.subr.bf16.mxu0 %v7090_v33  ;;  %6573 = vmatprep.subr.bf16.mxu1 %v7091_v1 }
 0x35c   :  { %6552 = vmatpush3.bf16.msra.mxu0 %v7092_v15  ;;  %6574 = vmatpush3.bf16.msra.mxu1 %v7093_v55 }
 0x35d   :  { %6553 = vmatprep.subr.bf16.mxu0 %v7094_v35  ;;  %6575 = vmatprep.subr.bf16.mxu1 %v7095_v36 }
 0x360   :  { %6554 = vmatpush3.bf16.msra.mxu0 %v7096_v39  ;;  %6576 = vmatpush3.bf16.msra.mxu1 %v7097_v40 }
 0x361   :  { %6555 = vmatprep.subr.bf16.mxu0 %v7098_v41  ;;  %6577 = vmatprep.subr.bf16.mxu1 %v7099_v42 }
 0x364   :  { %6556 = vmatpush3.bf16.msra.mxu0 %v7100_v60  ;;  %6578 = vmatpush3.bf16.msra.mxu1 %v7101_v43 }
 0x365   :  { %6557 = vmatprep.subr.bf16.mxu0 %v7102_v44  ;;  %6579 = vmatprep.subr.bf16.mxu1 %v7103_v45 }
 0x368   :  { %6558 = vmatpush3.bf16.msra.mxu0 %v7104_v46  ;;  %6580 = vmatpush3.bf16.msra.mxu1 %v7105_v24 }
 0x369   :  { %6559 = vmatprep.subr.bf16.mxu0 %v7106_v48  ;;  %6581 = vmatprep.subr.bf16.mxu1 %v7107_v50 }
 0x36c   :  { %6560 = vmatpush3.bf16.msra.mxu0 %v7108_v51  ;;  %6582 = vmatpush3.bf16.msra.mxu1 %v7109_v52 }
 0x422   :  { %v5250_v0 = vpop.f32.mrb[8].mxu0  ;;  %v5414_v2 = vpop.f32.mrb[8].mxu1 }
 0x423   :  { %v6597_v3 = vadd.f32 %v5250_v0, %v3796_v58  ;;  %v6599_v4 = vadd.f32 %v5414_v2, %v3804_v59  ;;  %v5252_v5 = vpop.f32.mrb[9].mxu0  ;;  %v5416_v6 = vpop.f32.mrb[9].mxu1 }
 0x424   :  { %v6598_v7 = vadd.f32 %v5252_v5, %v3800_v62  ;;  %v6600_v8 = vadd.f32 %v5416_v6, %v3808_v63  ;;  %v5254_v10 = vpop.f32.mrb[10].mxu0  ;;  %v5418_v11 = vpop.f32.mrb[10].mxu1 }
 0x425   :  { %v5421_v9 = vmax.f32 %v6597_v3, 0.0  ;;  %v5423_v57 = vmax.f32 %v6599_v4, 0.0  ;;  %v5255_v12 = vpop.f32.mrb[11].mxu0  ;;  %v5419_v23 = vpop.f32.mrb[11].mxu1 }
 0x426   :  { %v5422_v14 = vmax.f32 %v6598_v7, 0.0  ;;  %v5424_v49 = vmax.f32 %v6600_v8, 0.0 }
 0x427   :  { %v5425_v37 = vpack.c.bf16 %v5421_v9, %v5421_v9  ;;  %v5427_v13 = vpack.c.bf16 %v5423_v57, %v5423_v57 }
 0x428   :  { %v5426_v47 = vpack.c.bf16 %v5422_v14, %v5422_v14  ;;  %v5428_v16 = vpack.c.bf16 %v5424_v49, %v5424_v49 }
 0x42a   :  { %5724 = vmatprep.mubr.bf16.mxu0 %v5426_v47  ;;  %5764 = vmatprep.mubr.bf16.mxu1 %v5428_v16 }
 0x42b   :  { %5725 = vmatmul.mubr.bf16.vlgmr.msra.gmra.mrb[12].mxu0 %v5425_v37  ;;  %5765 = vmatmul.mubr.bf16.vlgmr.msra.gmra.mrb[12].mxu1 %v5427_v13 }
 0x4fe   :  { %v6561_v17 = vpop.f32.mrb[12].mxu0  ;;  %v6583_v18 = vpop.f32.mrb[12].mxu1 }
 0x4ff   :  { %v6562_v20 = vpop.f32.mrb[13].mxu0  ;;  %v6584_v21 = vpop.f32.mrb[13].mxu1 }
 0x500   :  { %v6563_v25 = vadd.f32 %v6562_v20, %v6561_v17  ;;  %v6585_v22 = vadd.f32 %v6584_v21, %v6583_v18  ;;  %v6564_v53 = vpop.f32.mrb[14].mxu0  ;;  %v6586_v38 = vpop.f32.mrb[14].mxu1 }
 0x501   :  { %v6565_v26 = vpop.f32.mrb[15].mxu0  ;;  %v6587_v27 = vpop.f32.mrb[15].mxu1 }
 0x502   :  { %v5727_v61 = vadd.f32 %v6563_v25, %v6512_v19 }
 0x504   :  { %v5767_v28 = vadd.f32 %v6585_v22, %v5727_v61 }
 0x506   :  { %5772 = vmax.xlane.f32.xlu0 %v5767_v28 }
 0x593   :  { %v5773_v29 = vpop.xlane.xlu0 %5772 }
 0x594   :  { %v5774_v30 = vsub.f32 %v5767_v28, %v5773_v29 }
 0x596   :  { %v5775_v54 = vmul.f32 1.442695, %v5774_v30 }
 0x598   :  { %7110 = vpow2.f32 %v5775_v54 }
 0x5a2   :  { %v7111_v31 = vpop.eup %7110 }
 0x5a3   :  { %5777 = vadd.xlane.f32.xlu0 %v7111_v31 }
 0x630   :  { %v5778_v34 = vpop.xlane.xlu0 %5777 }
 0x631   :  { %7112 = vlog2.f32 %v5778_v34 }
 0x63b   :  { %v7113_v32 = vpop.eup %7112 }
 0x63c   :  { %v5780_v33 = vmul.f32 0.6931472, %v7113_v32 }
 0x63e   :  { %v5781_v1 = vsub.f32 %v5774_v30, %v5780_v33 }
 0x640   :  { %5782 = vst [vmem:[#allocation13] sm:$0xff] %v5781_v1 }
 0x641   :  { %7259 = shalt.err (!%p7256_p10)
}
 0x642   :  { %s7260_s13 = scalar_lea.hbm %s7545_s7, 128 }
 0x643   :  { %p7261_p11 = scmp.ne.s32.totalorder %s7545_s7, %s7260_s13  ;;  %p7264_p12 = scmp.lt.u32.totalorder %s7260_s13, %s7545_s7 }
 0x645   :  { %p7266_p13 = pnand %p7264_p12, %p7261_p11 }
 0x647   :  { %7269 = shalt.err (!%p7266_p13)
}
 0x648   :  { %5792 = dma.vmem_to_hbm [thread:$0]  %s5790_s4, 128, %s7545_s7, [#allocation4]  }
 0x649   :  { %7278 = dma.done.wait [#allocation4], 128  }
 0x64a   :  { %7279 = vsyncadd [#allocation4], 4294967168 }
 0x64b   :  { %5796 = vsyncpa [#allocation3], 1 }
 0x64c   :  { %5797 = vsyncpa [#allocation6], 1 }
 0x64d   :  { %5798 = vsyncpa [#allocation9], 1 }
 0x64e   :  { %5799 = vsyncpa [#allocation12], 1 }
 0x64f   :  { %5800 = vsyncpa [#allocation4], 1 }

</bundles_post_ra>
